<compile_context>
chip_gen: v7x
topology: tpu7x:2x2x1
jax: 0.10.0
libtpu: 0.0.40
codegen_flags: <defaults>
</compile_context>

<pallas_src>
import jax
import jax.numpy as jnp
from jax.experimental import pallas as pl
from jax.experimental.pallas import tpu as pltpu


# ----------------------------------------------------------------------------
# Fused kernel
# ----------------------------------------------------------------------------

def _make_decoder_kernel(n_layers, batch, emb_dim, hid_dim):
    E, H = emb_dim, hid_dim

    def kernel(tok_ref, emb_hbm, h_ref, c_ref, *refs):
        # refs: [w_0, b_0, ..., w_{L-1}, b_{L-1}, fc_w, fc_b,
        #        pred_out, h_out, c_out, xh, htop, emb_buf, dma_sem]
        layer_refs = refs[:2 * n_layers]
        fc_w_ref = refs[2 * n_layers]
        fc_b_ref = refs[2 * n_layers + 1]
        pred_ref, h_out_ref, c_out_ref = refs[2 * n_layers + 2:2 * n_layers + 5]
        xh_ref, htop_ref, emb_buf, dma_sem = refs[2 * n_layers + 5:]

        # ---- Phase 1 (first vocab tile only): embedding gather + LSTM stack.
        @pl.when(pl.program_id(0) == 0)
        def _():
            # Gather exactly B rows of the embedding table straight from HBM;
            # the (O, E) table never enters VMEM.
            copies = [
                pltpu.make_async_copy(
                    emb_hbm.at[pl.ds(tok_ref[b], 1), :],   # (1, E) HBM row
                    emb_buf.at[pl.ds(b, 1), :],            # (1, E) VMEM row
                    dma_sem.at[b])
                for b in range(batch)
            ]
            for cp in copies:
                cp.start()
            for cp in copies:
                cp.wait()
            # TODO(synk): nn.Dropout on the embedded input treated as identity (eval mode).

            # Persistent [x | h] scratch: x lives in lanes [0:in_dim), h in
            # [in_dim:in_dim+H) -> no per-layer jnp.concatenate copies.
            xh_ref[:, 0:E] = emb_buf[...]

            in_dim = E
            for l in range(n_layers):
                w_ref = layer_refs[2 * l]       # (in_dim + H, 4H) bf16 = [W_ih^T ; W_hh^T]
                b_ref = layer_refs[2 * l + 1]   # (1, 4H) f32          = b_ih + b_hh
                xh_ref[:, in_dim:in_dim + H] = h_ref[l]

                # Merged matmul: gates = [x, h] @ W_stacked + b  (bf16 in, f32 acc)
                gates = (jnp.dot(xh_ref[:, 0:in_dim + H].astype(jnp.bfloat16),
                                 w_ref[...],
                                 preferred_element_type=jnp.float32)
                         + b_ref[...])                                   # (B, 4H) f32

                # PyTorch gate order: i, f, g, o (H multiple of 128 -> lane-aligned).
                i = jax.nn.sigmoid(gates[:, 0 * H:1 * H])
                f = jax.nn.sigmoid(gates[:, 1 * H:2 * H])
                g = jnp.tanh(gates[:, 2 * H:3 * H])
                o = jax.nn.sigmoid(gates[:, 3 * H:4 * H])

                c_new = f * c_ref[l] + i * g
                h_new = o * jnp.tanh(c_new)

                h_out_ref[l] = h_new
                c_out_ref[l] = c_new
                # h_new becomes the next layer's x.
                xh_ref[:, 0:H] = h_new
                in_dim = H
                # TODO(synk): inter-layer LSTM dropout treated as identity (eval mode).

            # Park the top-layer hidden state (matmul-ready bf16) for all FC tiles.
            htop_ref[...] = xh_ref[:, 0:H].astype(jnp.bfloat16)

        # ---- Phase 2 (every vocab tile): pred[:, j*T:(j+1)*T] = h_top @ W_fc^T + b_fc
        pred_ref[...] = (jnp.dot(htop_ref[...], fc_w_ref[...],
                                 preferred_element_type=jnp.float32)
                         + fc_b_ref[...])

    return kernel


# ----------------------------------------------------------------------------
# Wrapper (single pallas_call, vocab-tiled grid)
# ----------------------------------------------------------------------------

def decoder_forward(params, tokens, hidden, cell, *, vocab_tile=128,
                    single_buffer_weights=True):
    """tokens (B,) int32, hidden/cell (L,B,H) f32 -> (pred (B,O), h, c)."""
    n_layers, B, H = hidden.shape
    O, E = params["embedding"].shape

    num_tiles = pl.cdiv(O, vocab_tile)
    O_pad = num_tiles * vocab_tile

    fc_w = params["fc_w_t"]          # (H, O) bf16
    fc_b = params["fc_b"]            # (1, O) f32
    if O_pad != O:                   # pad vocab to a lane-dense tile multiple
        fc_w = jnp.pad(fc_w, ((0, 0), (0, O_pad - O)))
        fc_b = jnp.pad(fc_b, ((0, 0), (0, O_pad - O)))

    # Single-buffer the whole-array weight/bias blocks (they are fetched once;
    # default double buffering would just waste VMEM, which matters on v7x).
    weight_mode = dict(pipeline_mode=pl.Buffered(1)) if single_buffer_weights else {}

    def _const_spec(shape, single_buffer=False):
        nd = len(shape)
        kwargs = weight_mode if single_buffer else {}
        return pl.BlockSpec(shape, lambda j, tok, nd=nd: (0,) * nd, **kwargs)

    in_specs = [pl.BlockSpec(memory_space=pl.ANY),        # embedding table stays in HBM
                _const_spec((n_layers, B, H)),            # hidden
                _const_spec((n_layers, B, H))]            # cell
    flat_inputs = [params["embedding"], hidden, cell]
    for (w_stacked, b) in params["lstm"]:
        in_specs += [_const_spec(w_stacked.shape, single_buffer=True),
                     _const_spec(b.shape, single_buffer=True)]
        flat_inputs += [w_stacked, b]
    # FC weight/bias are tiled over the vocab grid axis (keep default double
    # buffering so the next tile's weight DMA overlaps this tile's matmul).
    in_specs += [pl.BlockSpec((H, vocab_tile), lambda j, tok: (0, j)),
                 pl.BlockSpec((1, vocab_tile), lambda j, tok: (0, j))]
    flat_inputs += [fc_w, fc_b]

    out_shape = (jax.ShapeDtypeStruct((B, O_pad), jnp.float32),
                 jax.ShapeDtypeStruct((n_layers, B, H), jnp.float32),
                 jax.ShapeDtypeStruct((n_layers, B, H), jnp.float32))
    out_specs = (pl.BlockSpec((B, vocab_tile), lambda j, tok: (0, j)),
                 _const_spec((n_layers, B, H)),
                 _const_spec((n_layers, B, H)))

    xh_width = max(E, H) + H
    scratch_shapes = [
        pltpu.VMEM((B, xh_width), jnp.float32),    # persistent [x | h] matmul input
        pltpu.VMEM((B, H), jnp.bfloat16),          # top-layer h, reused by every FC tile
        pltpu.VMEM((B, E), jnp.float32),           # embedding gather landing buffer
        pltpu.SemaphoreType.DMA((B,)),             # one DMA sem per gathered row
    ]

    kernel = _make_decoder_kernel(n_layers, B, E, H)

    pred_pad, h_out, c_out = pl.pallas_call(
        kernel,
        grid_spec=pltpu.PrefetchScalarGridSpec(
            num_scalar_prefetch=1,                 # tokens -> SMEM
            grid=(num_tiles,),
            in_specs=in_specs,
            out_specs=out_specs,
            scratch_shapes=scratch_shapes),
        out_shape=out_shape,
        # Operand order (scalar-prefetch operand included in alias indexing,
        # verified by the numeric check below): tokens(0), emb(1), hidden(2),
        # cell(3), ... -> update the LSTM state buffers in place.
        input_output_aliases={2: 1, 3: 2},
        compiler_params=pltpu.CompilerParams(
            # The vocab axis must stay a serial loop: tiles > 0 reuse the
            # top-layer hidden state held in VMEM scratch from tile 0.
            # TODO(synk): for v7x megacore, recompute the LSTM per core (or
            # split the FC into its own call) and mark this axis "parallel".
            dimension_semantics=("arbitrary",),
            vmem_limit_bytes=32 * 1024 * 1024),    # explicit cap; raise when scaling up
    )(tokens, *flat_inputs)

    if O_pad != O:
        pred_pad = pred_pad[:, :O]
    return pred_pad, h_out, c_out


# ----------------------------------------------------------------------------
# Parameter init (deterministic, PyTorch-default-style ranges, bf16 weights)
# ----------------------------------------------------------------------------

def init_decoder_params(key, output_dim, emb_dim, hid_dim, n_layers,
                        weight_dtype=jnp.bfloat16):
    keys = jax.random.split(key, 4 * n_layers + 3)
    bound = 1.0 / jnp.sqrt(hid_dim)

    params = {
        "embedding": jax.random.normal(keys[0], (output_dim, emb_dim), jnp.float32),
        "lstm": [],
    }
    ki = 1
    for l in range(n_layers):
        in_dim = emb_dim if l == 0 else hid_dim
        w_ih = jax.random.uniform(keys[ki + 0], (4 * hid_dim, in_dim),
                                  jnp.float32, -bound, bound)
        w_hh = jax.random.uniform(keys[ki + 1], (4 * hid_dim, hid_dim),
                                  jnp.float32, -bound, bound)
        b_ih = jax.random.uniform(keys[ki + 2], (4 * hid_dim,),
                                  jnp.float32, -bound, bound)
        b_hh = jax.random.uniform(keys[ki + 3], (4 * hid_dim,),
                                  jnp.float32, -bound, bound)
        ki += 4
        # Pre-stack [W_ih^T ; W_hh^T] -> (in_dim + H, 4H) bf16; fuse biases (f32).
        w_stacked = jnp.concatenate([jnp.transpose(w_ih), jnp.transpose(w_hh)],
                                    axis=0).astype(weight_dtype)
        params["lstm"].append((w_stacked, (b_ih + b_hh).reshape(1, 4 * hid_dim)))

    fc_w = jax.random.uniform(keys[ki], (output_dim, hid_dim),
                              jnp.float32, -bound, bound)
    fc_b = jax.random.uniform(keys[ki + 1], (output_dim,),
                              jnp.float32, -bound, bound)
    params["fc_w_t"] = jnp.transpose(fc_w).astype(weight_dtype)   # (H, O)
    params["fc_b"] = fc_b.reshape(1, output_dim)                  # (1, O) f32
    return params


# ----------------------------------------------------------------------------
# Pure-JAX reference (mirrors Decoder.forward, eval mode, bf16-in / f32-acc matmuls)
# ----------------------------------------------------------------------------

def decoder_reference(params, tokens, hidden, cell):
    x = jnp.take(params["embedding"], tokens, axis=0)             # (B, E) f32
    H = hidden.shape[-1]
    new_h, new_c = [], []
    for l, (w_stacked, b) in enumerate(params["lstm"]):
        xh = jnp.concatenate([x, hidden[l]], axis=1).astype(jnp.bfloat16)
        gates = jnp.dot(xh, w_stacked, preferred_element_type=jnp.float32) + b
        i = jax.nn.sigmoid(gates[:, 0 * H:1 * H])
        f = jax.nn.sigmoid(gates[:, 1 * H:2 * H])
        g = jnp.tanh(gates[:, 2 * H:3 * H])
        o = jax.nn.sigmoid(gates[:, 3 * H:4 * H])
        c_new = f * cell[l] + i * g
        h_new = o * jnp.tanh(c_new)
        new_h.append(h_new)
        new_c.append(c_new)
        x = h_new
    pred = (jnp.dot(x.astype(jnp.bfloat16), params["fc_w_t"],
                    preferred_element_type=jnp.float32) + params["fc_b"])
    return pred, jnp.stack(new_h, axis=0), jnp.stack(new_c, axis=0)


# ----------------------------------------------------------------------------

if __name__ == "__main__":
    # Small but hardware-aligned: B = sublane multiple, E/H = lane multiples,
    # vocab = 2 x 128 so the vocab-tiled FC grid is actually exercised.
    OUTPUT_DIM, EMB_DIM, HID_DIM, N_LAYERS, DROPOUT = 256, 128, 128, 2, 0.1
    B = 8

    params = init_decoder_params(jax.random.PRNGKey(0),
                                 OUTPUT_DIM, EMB_DIM, HID_DIM, N_LAYERS)

    k_tok, k_h, k_c = jax.random.split(jax.random.PRNGKey(0), 3)
    tokens = jax.random.randint(k_tok, (B,), 0, OUTPUT_DIM, dtype=jnp.int32)
    hidden = jax.random.normal(k_h, (N_LAYERS, B, HID_DIM), jnp.float32)
    cell = jax.random.normal(k_c, (N_LAYERS, B, HID_DIM), jnp.float32)

    # Reference first (the kernel aliases/donates the hidden/cell HBM buffers).
    ref_pred, ref_h, ref_c = decoder_reference(params, tokens, hidden, cell)
    jax.block_until_ready((ref_pred, ref_h, ref_c))

    try:
        pred, h_out, c_out = decoder_forward(params, tokens, hidden, cell)
    except Exception:
        # Fallback for jax versions without BlockSpec pipeline_mode / pl.Buffered:
        # identical kernel, default (double-buffered) weight blocks.
        pred, h_out, c_out = decoder_forward(params, tokens, hidden, cell,
                                             single_buffer_weights=False)
    jax.block_until_ready((pred, h_out, c_out))

    assert pred.shape == (B, OUTPUT_DIM)
    assert h_out.shape == (N_LAYERS, B, HID_DIM)
    assert c_out.shape == (N_LAYERS, B, HID_DIM)
    assert jnp.allclose(pred, ref_pred, rtol=1e-2, atol=1e-2)
    assert jnp.allclose(h_out, ref_h, rtol=1e-2, atol=1e-2)
    assert jnp.allclose(c_out, ref_c, rtol=1e-2, atol=1e-2)
    print("KERNEL_OK")
</pallas_src>

<mosaic_0001>
module attributes {stable_mosaic.version = 11 : i64} {
  func.func @kernel(%arg0: i32, %arg1: memref<8xi32, #tpu.memory_space<smem>>, %arg2: memref<256x128xf32, #tpu.memory_space<any>>, %arg3: memref<2x8x128xf32, #tpu.memory_space<vmem>>, %arg4: memref<2x8x128xf32, #tpu.memory_space<vmem>>, %arg5: memref<256x512xbf16, #tpu.memory_space<vmem>>, %arg6: memref<1x512xf32, #tpu.memory_space<vmem>>, %arg7: memref<256x512xbf16, #tpu.memory_space<vmem>>, %arg8: memref<1x512xf32, #tpu.memory_space<vmem>>, %arg9: memref<128x128xbf16, #tpu.memory_space<vmem>>, %arg10: memref<1x128xf32, #tpu.memory_space<vmem>>, %arg11: memref<8x128xf32, #tpu.memory_space<vmem>>, %arg12: memref<2x8x128xf32, #tpu.memory_space<vmem>>, %arg13: memref<2x8x128xf32, #tpu.memory_space<vmem>>, %arg14: memref<8x256xf32, #tpu.memory_space<vmem>>, %arg15: memref<8x128xbf16, #tpu.memory_space<vmem>>, %arg16: memref<8x128xf32, #tpu.memory_space<vmem>>, %arg17: memref<8x!tpu.dma_semaphore, #tpu.memory_space<semaphore_mem>>) attributes {dimension_semantics = [#tpu.dimension_semantics<arbitrary>], iteration_bounds = array<i64: 2>, scalar_prefetch = 1 : i64, scratch_operands = 4 : i64, tpu.core_type = #tpu.core_type<tc>, window_params = [{}, {pipeline_mode = #tpu.pipeline_mode<synchronous>, transform_indices = @transform_1, window_bounds = array<i64: 2, 8, 128>}, {pipeline_mode = #tpu.pipeline_mode<synchronous>, transform_indices = @transform_2, window_bounds = array<i64: 2, 8, 128>}, {pipeline_mode = #tpu.pipeline_mode<synchronous>, transform_indices = @transform_3, window_bounds = array<i64: 256, 512>}, {pipeline_mode = #tpu.pipeline_mode<synchronous>, transform_indices = @transform_4, window_bounds = array<i64: 1, 512>}, {pipeline_mode = #tpu.pipeline_mode<synchronous>, transform_indices = @transform_5, window_bounds = array<i64: 256, 512>}, {pipeline_mode = #tpu.pipeline_mode<synchronous>, transform_indices = @transform_6, window_bounds = array<i64: 1, 512>}, {transform_indices = @transform_7, window_bounds = array<i64: 128, 128>}, {transform_indices = @transform_8, window_bounds = array<i64: 1, 128>}, {transform_indices = @transform_9, window_bounds = array<i64: 8, 128>}, {pipeline_mode = #tpu.pipeline_mode<synchronous>, transform_indices = @transform_10, window_bounds = array<i64: 2, 8, 128>}, {pipeline_mode = #tpu.pipeline_mode<synchronous>, transform_indices = @transform_11, window_bounds = array<i64: 2, 8, 128>}]} {
    %c0_i32 = arith.constant 0 : i32
    %0 = arith.cmpi eq, %arg0, %c0_i32 : i32
    %1 = arith.extui %0 : i1 to i32
    %c0_i32_0 = arith.constant 0 : i32
    %2 = arith.cmpi ne, %1, %c0_i32_0 : i32
    scf.if %2 {
      %c0_8 = arith.constant 0 : index
      %10 = memref.load %arg1[%c0_8] : memref<8xi32, #tpu.memory_space<smem>>
      %c1 = arith.constant 1 : index
      %11 = memref.load %arg1[%c1] : memref<8xi32, #tpu.memory_space<smem>>
      %c2 = arith.constant 2 : index
      %12 = memref.load %arg1[%c2] : memref<8xi32, #tpu.memory_space<smem>>
      %c3 = arith.constant 3 : index
      %13 = memref.load %arg1[%c3] : memref<8xi32, #tpu.memory_space<smem>>
      %c4 = arith.constant 4 : index
      %14 = memref.load %arg1[%c4] : memref<8xi32, #tpu.memory_space<smem>>
      %c5 = arith.constant 5 : index
      %15 = memref.load %arg1[%c5] : memref<8xi32, #tpu.memory_space<smem>>
      %c6 = arith.constant 6 : index
      %16 = memref.load %arg1[%c6] : memref<8xi32, #tpu.memory_space<smem>>
      %c7 = arith.constant 7 : index
      %17 = memref.load %arg1[%c7] : memref<8xi32, #tpu.memory_space<smem>>
      %c0_i32_9 = arith.constant 0 : i32
      %c0_i32_10 = arith.constant 0 : i32
      %18 = tpu.memref_slice %arg2[%10, %c0_i32_10] : memref<256x128xf32, #tpu.memory_space<any>> -> memref<1x128xf32, #tpu.memory_space<any>>
      %c0_i32_11 = arith.constant 0 : i32
      %c0_i32_12 = arith.constant 0 : i32
      %19 = tpu.memref_slice %arg16[%c0_i32_11, %c0_i32_12] : memref<8x128xf32, #tpu.memory_space<vmem>> -> memref<1x128xf32, #tpu.memory_space<vmem>>
      %20 = tpu.memref_slice %arg17[%c0_i32_9] : memref<8x!tpu.dma_semaphore, #tpu.memory_space<semaphore_mem>> -> memref<1x!tpu.dma_semaphore, #tpu.memory_space<semaphore_mem>>
      %21 = tpu.memref_squeeze %20 : memref<1x!tpu.dma_semaphore, #tpu.memory_space<semaphore_mem>> -> memref<!tpu.dma_semaphore, #tpu.memory_space<semaphore_mem>>
      tpu.enqueue_dma source(%18 : memref<1x128xf32, #tpu.memory_space<any>>) target(%19 : memref<1x128xf32, #tpu.memory_space<vmem>>) target_semaphore(%21 : memref<!tpu.dma_semaphore, #tpu.memory_space<semaphore_mem>>)
      %c1_i32 = arith.constant 1 : i32
      %c0_i32_13 = arith.constant 0 : i32
      %22 = tpu.memref_slice %arg2[%11, %c0_i32_13] : memref<256x128xf32, #tpu.memory_space<any>> -> memref<1x128xf32, #tpu.memory_space<any>>
      %c1_i32_14 = arith.constant 1 : i32
      %c0_i32_15 = arith.constant 0 : i32
      %23 = tpu.memref_slice %arg16[%c1_i32_14, %c0_i32_15] : memref<8x128xf32, #tpu.memory_space<vmem>> -> memref<1x128xf32, #tpu.memory_space<vmem>>
      %24 = tpu.memref_slice %arg17[%c1_i32] : memref<8x!tpu.dma_semaphore, #tpu.memory_space<semaphore_mem>> -> memref<1x!tpu.dma_semaphore, #tpu.memory_space<semaphore_mem>>
      %25 = tpu.memref_squeeze %24 : memref<1x!tpu.dma_semaphore, #tpu.memory_space<semaphore_mem>> -> memref<!tpu.dma_semaphore, #tpu.memory_space<semaphore_mem>>
      tpu.enqueue_dma source(%22 : memref<1x128xf32, #tpu.memory_space<any>>) target(%23 : memref<1x128xf32, #tpu.memory_space<vmem>>) target_semaphore(%25 : memref<!tpu.dma_semaphore, #tpu.memory_space<semaphore_mem>>)
      %c2_i32 = arith.constant 2 : i32
      %c0_i32_16 = arith.constant 0 : i32
      %26 = tpu.memref_slice %arg2[%12, %c0_i32_16] : memref<256x128xf32, #tpu.memory_space<any>> -> memref<1x128xf32, #tpu.memory_space<any>>
      %c2_i32_17 = arith.constant 2 : i32
      %c0_i32_18 = arith.constant 0 : i32
      %27 = tpu.memref_slice %arg16[%c2_i32_17, %c0_i32_18] : memref<8x128xf32, #tpu.memory_space<vmem>> -> memref<1x128xf32, #tpu.memory_space<vmem>>
      %28 = tpu.memref_slice %arg17[%c2_i32] : memref<8x!tpu.dma_semaphore, #tpu.memory_space<semaphore_mem>> -> memref<1x!tpu.dma_semaphore, #tpu.memory_space<semaphore_mem>>
      %29 = tpu.memref_squeeze %28 : memref<1x!tpu.dma_semaphore, #tpu.memory_space<semaphore_mem>> -> memref<!tpu.dma_semaphore, #tpu.memory_space<semaphore_mem>>
      tpu.enqueue_dma source(%26 : memref<1x128xf32, #tpu.memory_space<any>>) target(%27 : memref<1x128xf32, #tpu.memory_space<vmem>>) target_semaphore(%29 : memref<!tpu.dma_semaphore, #tpu.memory_space<semaphore_mem>>)
      %c3_i32 = arith.constant 3 : i32
      %c0_i32_19 = arith.constant 0 : i32
      %30 = tpu.memref_slice %arg2[%13, %c0_i32_19] : memref<256x128xf32, #tpu.memory_space<any>> -> memref<1x128xf32, #tpu.memory_space<any>>
      %c3_i32_20 = arith.constant 3 : i32
      %c0_i32_21 = arith.constant 0 : i32
      %31 = tpu.memref_slice %arg16[%c3_i32_20, %c0_i32_21] : memref<8x128xf32, #tpu.memory_space<vmem>> -> memref<1x128xf32, #tpu.memory_space<vmem>>
      %32 = tpu.memref_slice %arg17[%c3_i32] : memref<8x!tpu.dma_semaphore, #tpu.memory_space<semaphore_mem>> -> memref<1x!tpu.dma_semaphore, #tpu.memory_space<semaphore_mem>>
      %33 = tpu.memref_squeeze %32 : memref<1x!tpu.dma_semaphore, #tpu.memory_space<semaphore_mem>> -> memref<!tpu.dma_semaphore, #tpu.memory_space<semaphore_mem>>
      tpu.enqueue_dma source(%30 : memref<1x128xf32, #tpu.memory_space<any>>) target(%31 : memref<1x128xf32, #tpu.memory_space<vmem>>) target_semaphore(%33 : memref<!tpu.dma_semaphore, #tpu.memory_space<semaphore_mem>>)
      %c4_i32 = arith.constant 4 : i32
      %c0_i32_22 = arith.constant 0 : i32
      %34 = tpu.memref_slice %arg2[%14, %c0_i32_22] : memref<256x128xf32, #tpu.memory_space<any>> -> memref<1x128xf32, #tpu.memory_space<any>>
      %c4_i32_23 = arith.constant 4 : i32
      %c0_i32_24 = arith.constant 0 : i32
      %35 = tpu.memref_slice %arg16[%c4_i32_23, %c0_i32_24] : memref<8x128xf32, #tpu.memory_space<vmem>> -> memref<1x128xf32, #tpu.memory_space<vmem>>
      %36 = tpu.memref_slice %arg17[%c4_i32] : memref<8x!tpu.dma_semaphore, #tpu.memory_space<semaphore_mem>> -> memref<1x!tpu.dma_semaphore, #tpu.memory_space<semaphore_mem>>
      %37 = tpu.memref_squeeze %36 : memref<1x!tpu.dma_semaphore, #tpu.memory_space<semaphore_mem>> -> memref<!tpu.dma_semaphore, #tpu.memory_space<semaphore_mem>>
      tpu.enqueue_dma source(%34 : memref<1x128xf32, #tpu.memory_space<any>>) target(%35 : memref<1x128xf32, #tpu.memory_space<vmem>>) target_semaphore(%37 : memref<!tpu.dma_semaphore, #tpu.memory_space<semaphore_mem>>)
      %c5_i32 = arith.constant 5 : i32
      %c0_i32_25 = arith.constant 0 : i32
      %38 = tpu.memref_slice %arg2[%15, %c0_i32_25] : memref<256x128xf32, #tpu.memory_space<any>> -> memref<1x128xf32, #tpu.memory_space<any>>
      %c5_i32_26 = arith.constant 5 : i32
      %c0_i32_27 = arith.constant 0 : i32
      %39 = tpu.memref_slice %arg16[%c5_i32_26, %c0_i32_27] : memref<8x128xf32, #tpu.memory_space<vmem>> -> memref<1x128xf32, #tpu.memory_space<vmem>>
      %40 = tpu.memref_slice %arg17[%c5_i32] : memref<8x!tpu.dma_semaphore, #tpu.memory_space<semaphore_mem>> -> memref<1x!tpu.dma_semaphore, #tpu.memory_space<semaphore_mem>>
      %41 = tpu.memref_squeeze %40 : memref<1x!tpu.dma_semaphore, #tpu.memory_space<semaphore_mem>> -> memref<!tpu.dma_semaphore, #tpu.memory_space<semaphore_mem>>
      tpu.enqueue_dma source(%38 : memref<1x128xf32, #tpu.memory_space<any>>) target(%39 : memref<1x128xf32, #tpu.memory_space<vmem>>) target_semaphore(%41 : memref<!tpu.dma_semaphore, #tpu.memory_space<semaphore_mem>>)
      %c6_i32 = arith.constant 6 : i32
      %c0_i32_28 = arith.constant 0 : i32
      %42 = tpu.memref_slice %arg2[%16, %c0_i32_28] : memref<256x128xf32, #tpu.memory_space<any>> -> memref<1x128xf32, #tpu.memory_space<any>>
      %c6_i32_29 = arith.constant 6 : i32
      %c0_i32_30 = arith.constant 0 : i32
      %43 = tpu.memref_slice %arg16[%c6_i32_29, %c0_i32_30] : memref<8x128xf32, #tpu.memory_space<vmem>> -> memref<1x128xf32, #tpu.memory_space<vmem>>
      %44 = tpu.memref_slice %arg17[%c6_i32] : memref<8x!tpu.dma_semaphore, #tpu.memory_space<semaphore_mem>> -> memref<1x!tpu.dma_semaphore, #tpu.memory_space<semaphore_mem>>
      %45 = tpu.memref_squeeze %44 : memref<1x!tpu.dma_semaphore, #tpu.memory_space<semaphore_mem>> -> memref<!tpu.dma_semaphore, #tpu.memory_space<semaphore_mem>>
      tpu.enqueue_dma source(%42 : memref<1x128xf32, #tpu.memory_space<any>>) target(%43 : memref<1x128xf32, #tpu.memory_space<vmem>>) target_semaphore(%45 : memref<!tpu.dma_semaphore, #tpu.memory_space<semaphore_mem>>)
      %c7_i32 = arith.constant 7 : i32
      %c0_i32_31 = arith.constant 0 : i32
      %46 = tpu.memref_slice %arg2[%17, %c0_i32_31] : memref<256x128xf32, #tpu.memory_space<any>> -> memref<1x128xf32, #tpu.memory_space<any>>
      %c7_i32_32 = arith.constant 7 : i32
      %c0_i32_33 = arith.constant 0 : i32
      %47 = tpu.memref_slice %arg16[%c7_i32_32, %c0_i32_33] : memref<8x128xf32, #tpu.memory_space<vmem>> -> memref<1x128xf32, #tpu.memory_space<vmem>>
      %48 = tpu.memref_slice %arg17[%c7_i32] : memref<8x!tpu.dma_semaphore, #tpu.memory_space<semaphore_mem>> -> memref<1x!tpu.dma_semaphore, #tpu.memory_space<semaphore_mem>>
      %49 = tpu.memref_squeeze %48 : memref<1x!tpu.dma_semaphore, #tpu.memory_space<semaphore_mem>> -> memref<!tpu.dma_semaphore, #tpu.memory_space<semaphore_mem>>
      tpu.enqueue_dma source(%46 : memref<1x128xf32, #tpu.memory_space<any>>) target(%47 : memref<1x128xf32, #tpu.memory_space<vmem>>) target_semaphore(%49 : memref<!tpu.dma_semaphore, #tpu.memory_space<semaphore_mem>>)
      %c0_i32_34 = arith.constant 0 : i32
      %c0_i32_35 = arith.constant 0 : i32
      %50 = tpu.memref_slice %arg2[%10, %c0_i32_35] : memref<256x128xf32, #tpu.memory_space<any>> -> memref<1x128xf32, #tpu.memory_space<any>>
      %c0_i32_36 = arith.constant 0 : i32
      %c0_i32_37 = arith.constant 0 : i32
      %51 = tpu.memref_slice %arg16[%c0_i32_36, %c0_i32_37] : memref<8x128xf32, #tpu.memory_space<vmem>> -> memref<1x128xf32, #tpu.memory_space<vmem>>
      %52 = tpu.memref_slice %arg17[%c0_i32_34] : memref<8x!tpu.dma_semaphore, #tpu.memory_space<semaphore_mem>> -> memref<1x!tpu.dma_semaphore, #tpu.memory_space<semaphore_mem>>
      %53 = tpu.memref_squeeze %52 : memref<1x!tpu.dma_semaphore, #tpu.memory_space<semaphore_mem>> -> memref<!tpu.dma_semaphore, #tpu.memory_space<semaphore_mem>>
      tpu.wait_dma2 semaphore(%53 : memref<!tpu.dma_semaphore, #tpu.memory_space<semaphore_mem>>) src(%50 : memref<1x128xf32, #tpu.memory_space<any>>) dst(%51 : memref<1x128xf32, #tpu.memory_space<vmem>>)
      %c1_i32_38 = arith.constant 1 : i32
      %c0_i32_39 = arith.constant 0 : i32
      %54 = tpu.memref_slice %arg2[%11, %c0_i32_39] : memref<256x128xf32, #tpu.memory_space<any>> -> memref<1x128xf32, #tpu.memory_space<any>>
      %c1_i32_40 = arith.constant 1 : i32
      %c0_i32_41 = arith.constant 0 : i32
      %55 = tpu.memref_slice %arg16[%c1_i32_40, %c0_i32_41] : memref<8x128xf32, #tpu.memory_space<vmem>> -> memref<1x128xf32, #tpu.memory_space<vmem>>
      %56 = tpu.memref_slice %arg17[%c1_i32_38] : memref<8x!tpu.dma_semaphore, #tpu.memory_space<semaphore_mem>> -> memref<1x!tpu.dma_semaphore, #tpu.memory_space<semaphore_mem>>
      %57 = tpu.memref_squeeze %56 : memref<1x!tpu.dma_semaphore, #tpu.memory_space<semaphore_mem>> -> memref<!tpu.dma_semaphore, #tpu.memory_space<semaphore_mem>>
      tpu.wait_dma2 semaphore(%57 : memref<!tpu.dma_semaphore, #tpu.memory_space<semaphore_mem>>) src(%54 : memref<1x128xf32, #tpu.memory_space<any>>) dst(%55 : memref<1x128xf32, #tpu.memory_space<vmem>>)
      %c2_i32_42 = arith.constant 2 : i32
      %c0_i32_43 = arith.constant 0 : i32
      %58 = tpu.memref_slice %arg2[%12, %c0_i32_43] : memref<256x128xf32, #tpu.memory_space<any>> -> memref<1x128xf32, #tpu.memory_space<any>>
      %c2_i32_44 = arith.constant 2 : i32
      %c0_i32_45 = arith.constant 0 : i32
      %59 = tpu.memref_slice %arg16[%c2_i32_44, %c0_i32_45] : memref<8x128xf32, #tpu.memory_space<vmem>> -> memref<1x128xf32, #tpu.memory_space<vmem>>
      %60 = tpu.memref_slice %arg17[%c2_i32_42] : memref<8x!tpu.dma_semaphore, #tpu.memory_space<semaphore_mem>> -> memref<1x!tpu.dma_semaphore, #tpu.memory_space<semaphore_mem>>
      %61 = tpu.memref_squeeze %60 : memref<1x!tpu.dma_semaphore, #tpu.memory_space<semaphore_mem>> -> memref<!tpu.dma_semaphore, #tpu.memory_space<semaphore_mem>>
      tpu.wait_dma2 semaphore(%61 : memref<!tpu.dma_semaphore, #tpu.memory_space<semaphore_mem>>) src(%58 : memref<1x128xf32, #tpu.memory_space<any>>) dst(%59 : memref<1x128xf32, #tpu.memory_space<vmem>>)
      %c3_i32_46 = arith.constant 3 : i32
      %c0_i32_47 = arith.constant 0 : i32
      %62 = tpu.memref_slice %arg2[%13, %c0_i32_47] : memref<256x128xf32, #tpu.memory_space<any>> -> memref<1x128xf32, #tpu.memory_space<any>>
      %c3_i32_48 = arith.constant 3 : i32
      %c0_i32_49 = arith.constant 0 : i32
      %63 = tpu.memref_slice %arg16[%c3_i32_48, %c0_i32_49] : memref<8x128xf32, #tpu.memory_space<vmem>> -> memref<1x128xf32, #tpu.memory_space<vmem>>
      %64 = tpu.memref_slice %arg17[%c3_i32_46] : memref<8x!tpu.dma_semaphore, #tpu.memory_space<semaphore_mem>> -> memref<1x!tpu.dma_semaphore, #tpu.memory_space<semaphore_mem>>
      %65 = tpu.memref_squeeze %64 : memref<1x!tpu.dma_semaphore, #tpu.memory_space<semaphore_mem>> -> memref<!tpu.dma_semaphore, #tpu.memory_space<semaphore_mem>>
      tpu.wait_dma2 semaphore(%65 : memref<!tpu.dma_semaphore, #tpu.memory_space<semaphore_mem>>) src(%62 : memref<1x128xf32, #tpu.memory_space<any>>) dst(%63 : memref<1x128xf32, #tpu.memory_space<vmem>>)
      %c4_i32_50 = arith.constant 4 : i32
      %c0_i32_51 = arith.constant 0 : i32
      %66 = tpu.memref_slice %arg2[%14, %c0_i32_51] : memref<256x128xf32, #tpu.memory_space<any>> -> memref<1x128xf32, #tpu.memory_space<any>>
      %c4_i32_52 = arith.constant 4 : i32
      %c0_i32_53 = arith.constant 0 : i32
      %67 = tpu.memref_slice %arg16[%c4_i32_52, %c0_i32_53] : memref<8x128xf32, #tpu.memory_space<vmem>> -> memref<1x128xf32, #tpu.memory_space<vmem>>
      %68 = tpu.memref_slice %arg17[%c4_i32_50] : memref<8x!tpu.dma_semaphore, #tpu.memory_space<semaphore_mem>> -> memref<1x!tpu.dma_semaphore, #tpu.memory_space<semaphore_mem>>
      %69 = tpu.memref_squeeze %68 : memref<1x!tpu.dma_semaphore, #tpu.memory_space<semaphore_mem>> -> memref<!tpu.dma_semaphore, #tpu.memory_space<semaphore_mem>>
      tpu.wait_dma2 semaphore(%69 : memref<!tpu.dma_semaphore, #tpu.memory_space<semaphore_mem>>) src(%66 : memref<1x128xf32, #tpu.memory_space<any>>) dst(%67 : memref<1x128xf32, #tpu.memory_space<vmem>>)
      %c5_i32_54 = arith.constant 5 : i32
      %c0_i32_55 = arith.constant 0 : i32
      %70 = tpu.memref_slice %arg2[%15, %c0_i32_55] : memref<256x128xf32, #tpu.memory_space<any>> -> memref<1x128xf32, #tpu.memory_space<any>>
      %c5_i32_56 = arith.constant 5 : i32
      %c0_i32_57 = arith.constant 0 : i32
      %71 = tpu.memref_slice %arg16[%c5_i32_56, %c0_i32_57] : memref<8x128xf32, #tpu.memory_space<vmem>> -> memref<1x128xf32, #tpu.memory_space<vmem>>
      %72 = tpu.memref_slice %arg17[%c5_i32_54] : memref<8x!tpu.dma_semaphore, #tpu.memory_space<semaphore_mem>> -> memref<1x!tpu.dma_semaphore, #tpu.memory_space<semaphore_mem>>
      %73 = tpu.memref_squeeze %72 : memref<1x!tpu.dma_semaphore, #tpu.memory_space<semaphore_mem>> -> memref<!tpu.dma_semaphore, #tpu.memory_space<semaphore_mem>>
      tpu.wait_dma2 semaphore(%73 : memref<!tpu.dma_semaphore, #tpu.memory_space<semaphore_mem>>) src(%70 : memref<1x128xf32, #tpu.memory_space<any>>) dst(%71 : memref<1x128xf32, #tpu.memory_space<vmem>>)
      %c6_i32_58 = arith.constant 6 : i32
      %c0_i32_59 = arith.constant 0 : i32
      %74 = tpu.memref_slice %arg2[%16, %c0_i32_59] : memref<256x128xf32, #tpu.memory_space<any>> -> memref<1x128xf32, #tpu.memory_space<any>>
      %c6_i32_60 = arith.constant 6 : i32
      %c0_i32_61 = arith.constant 0 : i32
      %75 = tpu.memref_slice %arg16[%c6_i32_60, %c0_i32_61] : memref<8x128xf32, #tpu.memory_space<vmem>> -> memref<1x128xf32, #tpu.memory_space<vmem>>
      %76 = tpu.memref_slice %arg17[%c6_i32_58] : memref<8x!tpu.dma_semaphore, #tpu.memory_space<semaphore_mem>> -> memref<1x!tpu.dma_semaphore, #tpu.memory_space<semaphore_mem>>
      %77 = tpu.memref_squeeze %76 : memref<1x!tpu.dma_semaphore, #tpu.memory_space<semaphore_mem>> -> memref<!tpu.dma_semaphore, #tpu.memory_space<semaphore_mem>>
      tpu.wait_dma2 semaphore(%77 : memref<!tpu.dma_semaphore, #tpu.memory_space<semaphore_mem>>) src(%74 : memref<1x128xf32, #tpu.memory_space<any>>) dst(%75 : memref<1x128xf32, #tpu.memory_space<vmem>>)
      %c7_i32_62 = arith.constant 7 : i32
      %c0_i32_63 = arith.constant 0 : i32
      %78 = tpu.memref_slice %arg2[%17, %c0_i32_63] : memref<256x128xf32, #tpu.memory_space<any>> -> memref<1x128xf32, #tpu.memory_space<any>>
      %c7_i32_64 = arith.constant 7 : i32
      %c0_i32_65 = arith.constant 0 : i32
      %79 = tpu.memref_slice %arg16[%c7_i32_64, %c0_i32_65] : memref<8x128xf32, #tpu.memory_space<vmem>> -> memref<1x128xf32, #tpu.memory_space<vmem>>
      %80 = tpu.memref_slice %arg17[%c7_i32_62] : memref<8x!tpu.dma_semaphore, #tpu.memory_space<semaphore_mem>> -> memref<1x!tpu.dma_semaphore, #tpu.memory_space<semaphore_mem>>
      %81 = tpu.memref_squeeze %80 : memref<1x!tpu.dma_semaphore, #tpu.memory_space<semaphore_mem>> -> memref<!tpu.dma_semaphore, #tpu.memory_space<semaphore_mem>>
      tpu.wait_dma2 semaphore(%81 : memref<!tpu.dma_semaphore, #tpu.memory_space<semaphore_mem>>) src(%78 : memref<1x128xf32, #tpu.memory_space<any>>) dst(%79 : memref<1x128xf32, #tpu.memory_space<vmem>>)
      %c0_66 = arith.constant 0 : index
      %c0_67 = arith.constant 0 : index
      %82 = vector.load %arg16[%c0_66, %c0_67] : memref<8x128xf32, #tpu.memory_space<vmem>>, vector<8x128xf32>
      %c0_68 = arith.constant 0 : index
      %c0_69 = arith.constant 0 : index
      %83 = vector.load %arg14[%c0_68, %c0_69] : memref<8x256xf32, #tpu.memory_space<vmem>>, vector<8x128xf32>
      tpu.vector_store %arg14[%c0_68, %c0_69], %82 {strides = array<i32>} : memref<8x256xf32, #tpu.memory_space<vmem>>, vector<8x128xf32>,
      %c0_70 = arith.constant 0 : index
      %c0_71 = arith.constant 0 : index
      %c0_72 = arith.constant 0 : index
      %84 = vector.load %arg3[%c0_70, %c0_71, %c0_72] : memref<2x8x128xf32, #tpu.memory_space<vmem>>, vector<1x8x128xf32>
      %85 = vector.shape_cast %84 : vector<1x8x128xf32> to vector<8x128xf32>
      %c0_73 = arith.constant 0 : index
      %c128 = arith.constant 128 : index
      %86 = vector.load %arg14[%c0_73, %c128] : memref<8x256xf32, #tpu.memory_space<vmem>>, vector<8x128xf32>
      tpu.vector_store %arg14[%c0_73, %c128], %85 {strides = array<i32>} : memref<8x256xf32, #tpu.memory_space<vmem>>, vector<8x128xf32>,
      %c0_74 = arith.constant 0 : index
      %c0_75 = arith.constant 0 : index
      %87 = vector.load %arg14[%c0_74, %c0_75] : memref<8x256xf32, #tpu.memory_space<vmem>>, vector<8x256xf32>
      %88 = arith.truncf %87 : vector<8x256xf32> to vector<8x256xbf16>
      %c0_76 = arith.constant 0 : index
      %c0_77 = arith.constant 0 : index
      %89 = vector.load %arg5[%c0_76, %c0_77] : memref<256x512xbf16, #tpu.memory_space<vmem>>, vector<256x512xbf16>
      %cst_78 = arith.constant dense<0.000000e+00> : vector<8x512xf32>
      %90 = tpu.matmul %88, %89, %cst_78 {dimension_numbers = #tpu.dot_dimension_numbers<[1], [0], [0], [1], [0, 0, 1, 1], [], []>} : vector<8x256xbf16>, vector<256x512xbf16>, vector<8x512xf32> -> vector<8x512xf32>
      %c0_79 = arith.constant 0 : index
      %c0_80 = arith.constant 0 : index
      %91 = vector.load %arg6[%c0_79, %c0_80] : memref<1x512xf32, #tpu.memory_space<vmem>>, vector<1x512xf32>
      %92 = vector.broadcast %91 : vector<1x512xf32> to vector<8x512xf32>
      %93 = arith.addf %90, %92 : vector<8x512xf32>
      %94 = vector.extract_strided_slice %93 {offsets = [0, 0], sizes = [8, 128], strides = [1, 1]} : vector<8x512xf32> to vector<8x128xf32>
      %95 = arith.negf %94 : vector<8x128xf32>
      %96 = math.exp %95 : vector<8x128xf32>
      %cst_81 = arith.constant 1.000000e+00 : f32
      %97 = vector.broadcast %cst_81 : f32 to vector<8x128xf32>
      %98 = arith.addf %97, %96 : vector<8x128xf32>
      %99 = arith.divf %97, %98 : vector<8x128xf32>
      %100 = vector.extract_strided_slice %93 {offsets = [0, 128], sizes = [8, 128], strides = [1, 1]} : vector<8x512xf32> to vector<8x128xf32>
      %101 = arith.negf %100 : vector<8x128xf32>
      %102 = math.exp %101 : vector<8x128xf32>
      %cst_82 = arith.constant 1.000000e+00 : f32
      %103 = vector.broadcast %cst_82 : f32 to vector<8x128xf32>
      %104 = arith.addf %103, %102 : vector<8x128xf32>
      %105 = arith.divf %103, %104 : vector<8x128xf32>
      %106 = vector.extract_strided_slice %93 {offsets = [0, 256], sizes = [8, 128], strides = [1, 1]} : vector<8x512xf32> to vector<8x128xf32>
      %107 = math.tanh %106 : vector<8x128xf32>
      %108 = vector.extract_strided_slice %93 {offsets = [0, 384], sizes = [8, 128], strides = [1, 1]} : vector<8x512xf32> to vector<8x128xf32>
      %109 = arith.negf %108 : vector<8x128xf32>
      %110 = math.exp %109 : vector<8x128xf32>
      %cst_83 = arith.constant 1.000000e+00 : f32
      %111 = vector.broadcast %cst_83 : f32 to vector<8x128xf32>
      %112 = arith.addf %111, %110 : vector<8x128xf32>
      %113 = arith.divf %111, %112 : vector<8x128xf32>
      %c0_84 = arith.constant 0 : index
      %c0_85 = arith.constant 0 : index
      %c0_86 = arith.constant 0 : index
      %114 = vector.load %arg4[%c0_84, %c0_85, %c0_86] : memref<2x8x128xf32, #tpu.memory_space<vmem>>, vector<1x8x128xf32>
      %115 = vector.shape_cast %114 : vector<1x8x128xf32> to vector<8x128xf32>
      %116 = arith.mulf %105, %115 : vector<8x128xf32>
      %117 = arith.mulf %99, %107 : vector<8x128xf32>
      %118 = arith.addf %116, %117 : vector<8x128xf32>
      %119 = math.tanh %118 : vector<8x128xf32>
      %120 = arith.mulf %113, %119 : vector<8x128xf32>
      %c0_87 = arith.constant 0 : index
      %c0_88 = arith.constant 0 : index
      %c0_89 = arith.constant 0 : index
      %121 = vector.load %arg12[%c0_87, %c0_88, %c0_89] : memref<2x8x128xf32, #tpu.memory_space<vmem>>, vector<1x8x128xf32>
      %122 = vector.shape_cast %121 : vector<1x8x128xf32> to vector<8x128xf32>
      %123 = vector.shape_cast %120 : vector<8x128xf32> to vector<1x8x128xf32>
      tpu.vector_store %arg12[%c0_87, %c0_88, %c0_89], %123 {strides = array<i32>} : memref<2x8x128xf32, #tpu.memory_space<vmem>>, vector<1x8x128xf32>,
      %c0_90 = arith.constant 0 : index
      %c0_91 = arith.constant 0 : index
      %c0_92 = arith.constant 0 : index
      %124 = vector.load %arg13[%c0_90, %c0_91, %c0_92] : memref<2x8x128xf32, #tpu.memory_space<vmem>>, vector<1x8x128xf32>
      %125 = vector.shape_cast %124 : vector<1x8x128xf32> to vector<8x128xf32>
      %126 = vector.shape_cast %118 : vector<8x128xf32> to vector<1x8x128xf32>
      tpu.vector_store %arg13[%c0_90, %c0_91, %c0_92], %126 {strides = array<i32>} : memref<2x8x128xf32, #tpu.memory_space<vmem>>, vector<1x8x128xf32>,
      %c0_93 = arith.constant 0 : index
      %c0_94 = arith.constant 0 : index
      %127 = vector.load %arg14[%c0_93, %c0_94] : memref<8x256xf32, #tpu.memory_space<vmem>>, vector<8x128xf32>
      tpu.vector_store %arg14[%c0_93, %c0_94], %120 {strides = array<i32>} : memref<8x256xf32, #tpu.memory_space<vmem>>, vector<8x128xf32>,
      %c1_95 = arith.constant 1 : index
      %c0_96 = arith.constant 0 : index
      %c0_97 = arith.constant 0 : index
      %128 = vector.load %arg3[%c1_95, %c0_96, %c0_97] : memref<2x8x128xf32, #tpu.memory_space<vmem>>, vector<1x8x128xf32>
      %129 = vector.shape_cast %128 : vector<1x8x128xf32> to vector<8x128xf32>
      %c0_98 = arith.constant 0 : index
      %c128_99 = arith.constant 128 : index
      %130 = vector.load %arg14[%c0_98, %c128_99] : memref<8x256xf32, #tpu.memory_space<vmem>>, vector<8x128xf32>
      tpu.vector_store %arg14[%c0_98, %c128_99], %129 {strides = array<i32>} : memref<8x256xf32, #tpu.memory_space<vmem>>, vector<8x128xf32>,
      %c0_100 = arith.constant 0 : index
      %c0_101 = arith.constant 0 : index
      %131 = vector.load %arg14[%c0_100, %c0_101] : memref<8x256xf32, #tpu.memory_space<vmem>>, vector<8x256xf32>
      %132 = arith.truncf %131 : vector<8x256xf32> to vector<8x256xbf16>
      %c0_102 = arith.constant 0 : index
      %c0_103 = arith.constant 0 : index
      %133 = vector.load %arg7[%c0_102, %c0_103] : memref<256x512xbf16, #tpu.memory_space<vmem>>, vector<256x512xbf16>
      %cst_104 = arith.constant dense<0.000000e+00> : vector<8x512xf32>
      %134 = tpu.matmul %132, %133, %cst_104 {dimension_numbers = #tpu.dot_dimension_numbers<[1], [0], [0], [1], [0, 0, 1, 1], [], []>} : vector<8x256xbf16>, vector<256x512xbf16>, vector<8x512xf32> -> vector<8x512xf32>
      %c0_105 = arith.constant 0 : index
      %c0_106 = arith.constant 0 : index
      %135 = vector.load %arg8[%c0_105, %c0_106] : memref<1x512xf32, #tpu.memory_space<vmem>>, vector<1x512xf32>
      %136 = vector.broadcast %135 : vector<1x512xf32> to vector<8x512xf32>
      %137 = arith.addf %134, %136 : vector<8x512xf32>
      %138 = vector.extract_strided_slice %137 {offsets = [0, 0], sizes = [8, 128], strides = [1, 1]} : vector<8x512xf32> to vector<8x128xf32>
      %139 = arith.negf %138 : vector<8x128xf32>
      %140 = math.exp %139 : vector<8x128xf32>
      %cst_107 = arith.constant 1.000000e+00 : f32
      %141 = vector.broadcast %cst_107 : f32 to vector<8x128xf32>
      %142 = arith.addf %141, %140 : vector<8x128xf32>
      %143 = arith.divf %141, %142 : vector<8x128xf32>
      %144 = vector.extract_strided_slice %137 {offsets = [0, 128], sizes = [8, 128], strides = [1, 1]} : vector<8x512xf32> to vector<8x128xf32>
      %145 = arith.negf %144 : vector<8x128xf32>
      %146 = math.exp %145 : vector<8x128xf32>
      %cst_108 = arith.constant 1.000000e+00 : f32
      %147 = vector.broadcast %cst_108 : f32 to vector<8x128xf32>
      %148 = arith.addf %147, %146 : vector<8x128xf32>
      %149 = arith.divf %147, %148 : vector<8x128xf32>
      %150 = vector.extract_strided_slice %137 {offsets = [0, 256], sizes = [8, 128], strides = [1, 1]} : vector<8x512xf32> to vector<8x128xf32>
      %151 = math.tanh %150 : vector<8x128xf32>
      %152 = vector.extract_strided_slice %137 {offsets = [0, 384], sizes = [8, 128], strides = [1, 1]} : vector<8x512xf32> to vector<8x128xf32>
      %153 = arith.negf %152 : vector<8x128xf32>
      %154 = math.exp %153 : vector<8x128xf32>
      %cst_109 = arith.constant 1.000000e+00 : f32
      %155 = vector.broadcast %cst_109 : f32 to vector<8x128xf32>
      %156 = arith.addf %155, %154 : vector<8x128xf32>
      %157 = arith.divf %155, %156 : vector<8x128xf32>
      %c1_110 = arith.constant 1 : index
      %c0_111 = arith.constant 0 : index
      %c0_112 = arith.constant 0 : index
      %158 = vector.load %arg4[%c1_110, %c0_111, %c0_112] : memref<2x8x128xf32, #tpu.memory_space<vmem>>, vector<1x8x128xf32>
      %159 = vector.shape_cast %158 : vector<1x8x128xf32> to vector<8x128xf32>
      %160 = arith.mulf %149, %159 : vector<8x128xf32>
      %161 = arith.mulf %143, %151 : vector<8x128xf32>
      %162 = arith.addf %160, %161 : vector<8x128xf32>
      %163 = math.tanh %162 : vector<8x128xf32>
      %164 = arith.mulf %157, %163 : vector<8x128xf32>
      %c1_113 = arith.constant 1 : index
      %c0_114 = arith.constant 0 : index
      %c0_115 = arith.constant 0 : index
      %165 = vector.load %arg12[%c1_113, %c0_114, %c0_115] : memref<2x8x128xf32, #tpu.memory_space<vmem>>, vector<1x8x128xf32>
      %166 = vector.shape_cast %165 : vector<1x8x128xf32> to vector<8x128xf32>
      %167 = vector.shape_cast %164 : vector<8x128xf32> to vector<1x8x128xf32>
      tpu.vector_store %arg12[%c1_113, %c0_114, %c0_115], %167 {strides = array<i32>} : memref<2x8x128xf32, #tpu.memory_space<vmem>>, vector<1x8x128xf32>,
      %c1_116 = arith.constant 1 : index
      %c0_117 = arith.constant 0 : index
      %c0_118 = arith.constant 0 : index
      %168 = vector.load %arg13[%c1_116, %c0_117, %c0_118] : memref<2x8x128xf32, #tpu.memory_space<vmem>>, vector<1x8x128xf32>
      %169 = vector.shape_cast %168 : vector<1x8x128xf32> to vector<8x128xf32>
      %170 = vector.shape_cast %162 : vector<8x128xf32> to vector<1x8x128xf32>
      tpu.vector_store %arg13[%c1_116, %c0_117, %c0_118], %170 {strides = array<i32>} : memref<2x8x128xf32, #tpu.memory_space<vmem>>, vector<1x8x128xf32>,
      %c0_119 = arith.constant 0 : index
      %c0_120 = arith.constant 0 : index
      %171 = vector.load %arg14[%c0_119, %c0_120] : memref<8x256xf32, #tpu.memory_space<vmem>>, vector<8x128xf32>
      tpu.vector_store %arg14[%c0_119, %c0_120], %164 {strides = array<i32>} : memref<8x256xf32, #tpu.memory_space<vmem>>, vector<8x128xf32>,
      %c0_121 = arith.constant 0 : index
      %c0_122 = arith.constant 0 : index
      %172 = vector.load %arg14[%c0_121, %c0_122] : memref<8x256xf32, #tpu.memory_space<vmem>>, vector<8x128xf32>
      %173 = arith.truncf %172 : vector<8x128xf32> to vector<8x128xbf16>
      %c0_123 = arith.constant 0 : index
      %c0_124 = arith.constant 0 : index
      %174 = vector.load %arg15[%c0_123, %c0_124] : memref<8x128xbf16, #tpu.memory_space<vmem>>, vector<8x128xbf16>
      tpu.vector_store %arg15[%c0_123, %c0_124], %173 {strides = array<i32>} : memref<8x128xbf16, #tpu.memory_space<vmem>>, vector<8x128xbf16>,
    } else {
    }
    %c0 = arith.constant 0 : index
    %c0_1 = arith.constant 0 : index
    %3 = vector.load %arg15[%c0, %c0_1] : memref<8x128xbf16, #tpu.memory_space<vmem>>, vector<8x128xbf16>
    %c0_2 = arith.constant 0 : index
    %c0_3 = arith.constant 0 : index
    %4 = vector.load %arg9[%c0_2, %c0_3] : memref<128x128xbf16, #tpu.memory_space<vmem>>, vector<128x128xbf16>
    %cst = arith.constant dense<0.000000e+00> : vector<8x128xf32>
    %5 = tpu.matmul %3, %4, %cst {dimension_numbers = #tpu.dot_dimension_numbers<[1], [0], [0], [1], [0, 0, 1, 1], [], []>} : vector<8x128xbf16>, vector<128x128xbf16>, vector<8x128xf32> -> vector<8x128xf32>
    %c0_4 = arith.constant 0 : index
    %c0_5 = arith.constant 0 : index
    %6 = vector.load %arg10[%c0_4, %c0_5] : memref<1x128xf32, #tpu.memory_space<vmem>>, vector<1x128xf32>
    %7 = vector.broadcast %6 : vector<1x128xf32> to vector<8x128xf32>
    %8 = arith.addf %5, %7 : vector<8x128xf32>
    %c0_6 = arith.constant 0 : index
    %c0_7 = arith.constant 0 : index
    %9 = vector.load %arg11[%c0_6, %c0_7] : memref<8x128xf32, #tpu.memory_space<vmem>>, vector<8x128xf32>
    tpu.vector_store %arg11[%c0_6, %c0_7], %8 {strides = array<i32>} : memref<8x128xf32, #tpu.memory_space<vmem>>, vector<8x128xf32>,
    return
  }
  func.func @transform_1(%arg0: i32, %arg1: memref<8xi32, #tpu.memory_space<smem>>) -> (i32, i32, i32) {
    %c0_i32 = arith.constant 0 : i32
    %c0_i32_0 = arith.constant 0 : i32
    %c0_i32_1 = arith.constant 0 : i32
    %c0_i32_2 = arith.constant 0 : i32
    return %c0_i32, %c0_i32_0, %c0_i32_1 : i32, i32, i32
  }
  func.func @transform_2(%arg0: i32, %arg1: memref<8xi32, #tpu.memory_space<smem>>) -> (i32, i32, i32) {
    %c0_i32 = arith.constant 0 : i32
    %c0_i32_0 = arith.constant 0 : i32
    %c0_i32_1 = arith.constant 0 : i32
    %c0_i32_2 = arith.constant 0 : i32
    return %c0_i32, %c0_i32_0, %c0_i32_1 : i32, i32, i32
  }
  func.func @transform_3(%arg0: i32, %arg1: memref<8xi32, #tpu.memory_space<smem>>) -> (i32, i32) {
    %c0_i32 = arith.constant 0 : i32
    %c0_i32_0 = arith.constant 0 : i32
    %c0_i32_1 = arith.constant 0 : i32
    return %c0_i32, %c0_i32_0 : i32, i32
  }
  func.func @transform_4(%arg0: i32, %arg1: memref<8xi32, #tpu.memory_space<smem>>) -> (i32, i32) {
    %c0_i32 = arith.constant 0 : i32
    %c0_i32_0 = arith.constant 0 : i32
    %c0_i32_1 = arith.constant 0 : i32
    return %c0_i32, %c0_i32_0 : i32, i32
  }
  func.func @transform_5(%arg0: i32, %arg1: memref<8xi32, #tpu.memory_space<smem>>) -> (i32, i32) {
    %c0_i32 = arith.constant 0 : i32
    %c0_i32_0 = arith.constant 0 : i32
    %c0_i32_1 = arith.constant 0 : i32
    return %c0_i32, %c0_i32_0 : i32, i32
  }
  func.func @transform_6(%arg0: i32, %arg1: memref<8xi32, #tpu.memory_space<smem>>) -> (i32, i32) {
    %c0_i32 = arith.constant 0 : i32
    %c0_i32_0 = arith.constant 0 : i32
    %c0_i32_1 = arith.constant 0 : i32
    return %c0_i32, %c0_i32_0 : i32, i32
  }
  func.func @transform_7(%arg0: i32, %arg1: memref<8xi32, #tpu.memory_space<smem>>) -> (i32, i32) {
    %c0_i32 = arith.constant 0 : i32
    %c0_i32_0 = arith.constant 0 : i32
    return %c0_i32, %arg0 : i32, i32
  }
  func.func @transform_8(%arg0: i32, %arg1: memref<8xi32, #tpu.memory_space<smem>>) -> (i32, i32) {
    %c0_i32 = arith.constant 0 : i32
    %c0_i32_0 = arith.constant 0 : i32
    return %c0_i32, %arg0 : i32, i32
  }
  func.func @transform_9(%arg0: i32, %arg1: memref<8xi32, #tpu.memory_space<smem>>) -> (i32, i32) {
    %c0_i32 = arith.constant 0 : i32
    %c0_i32_0 = arith.constant 0 : i32
    return %c0_i32, %arg0 : i32, i32
  }
  func.func @transform_10(%arg0: i32, %arg1: memref<8xi32, #tpu.memory_space<smem>>) -> (i32, i32, i32) {
    %c0_i32 = arith.constant 0 : i32
    %c0_i32_0 = arith.constant 0 : i32
    %c0_i32_1 = arith.constant 0 : i32
    %c0_i32_2 = arith.constant 0 : i32
    return %c0_i32, %c0_i32_0, %c0_i32_1 : i32, i32, i32
  }
  func.func @transform_11(%arg0: i32, %arg1: memref<8xi32, #tpu.memory_space<smem>>) -> (i32, i32, i32) {
    %c0_i32 = arith.constant 0 : i32
    %c0_i32_0 = arith.constant 0 : i32
    %c0_i32_1 = arith.constant 0 : i32
    %c0_i32_2 = arith.constant 0 : i32
    return %c0_i32, %c0_i32_0, %c0_i32_1 : i32, i32, i32
  }
}

module attributes {stable_mosaic.version = 11 : i64} {
  func.func @kernel(%arg0: i32, %arg1: memref<8xi32, #tpu.memory_space<smem>>, %arg2: memref<256x128xf32, #tpu.memory_space<any>>, %arg3: memref<2x8x128xf32, #tpu.memory_space<vmem>>, %arg4: memref<2x8x128xf32, #tpu.memory_space<vmem>>, %arg5: memref<256x512xbf16, #tpu.memory_space<vmem>>, %arg6: memref<1x512xf32, #tpu.memory_space<vmem>>, %arg7: memref<256x512xbf16, #tpu.memory_space<vmem>>, %arg8: memref<1x512xf32, #tpu.memory_space<vmem>>, %arg9: memref<128x128xbf16, #tpu.memory_space<vmem>>, %arg10: memref<1x128xf32, #tpu.memory_space<vmem>>, %arg11: memref<8x128xf32, #tpu.memory_space<vmem>>, %arg12: memref<2x8x128xf32, #tpu.memory_space<vmem>>, %arg13: memref<2x8x128xf32, #tpu.memory_space<vmem>>, %arg14: memref<8x256xf32, #tpu.memory_space<vmem>>, %arg15: memref<8x128xbf16, #tpu.memory_space<vmem>>, %arg16: memref<8x128xf32, #tpu.memory_space<vmem>>, %arg17: memref<8x!tpu.dma_semaphore, #tpu.memory_space<semaphore_mem>>) attributes {dimension_semantics = [#tpu.dimension_semantics<arbitrary>], iteration_bounds = array<i64: 2>, scalar_prefetch = 1 : i64, scratch_operands = 4 : i64, tpu.core_type = #tpu.core_type<tc>, window_params = [{}, {pipeline_mode = #tpu.pipeline_mode<synchronous>, transform_indices = @transform_1, window_bounds = array<i64: 2, 8, 128>}, {pipeline_mode = #tpu.pipeline_mode<synchronous>, transform_indices = @transform_2, window_bounds = array<i64: 2, 8, 128>}, {pipeline_mode = #tpu.pipeline_mode<synchronous>, transform_indices = @transform_3, window_bounds = array<i64: 256, 512>}, {pipeline_mode = #tpu.pipeline_mode<synchronous>, transform_indices = @transform_4, window_bounds = array<i64: 1, 512>}, {pipeline_mode = #tpu.pipeline_mode<synchronous>, transform_indices = @transform_5, window_bounds = array<i64: 256, 512>}, {pipeline_mode = #tpu.pipeline_mode<synchronous>, transform_indices = @transform_6, window_bounds = array<i64: 1, 512>}, {transform_indices = @transform_7, window_bounds = array<i64: 128, 128>}, {transform_indices = @transform_8, window_bounds = array<i64: 1, 128>}, {transform_indices = @transform_9, window_bounds = array<i64: 8, 128>}, {pipeline_mode = #tpu.pipeline_mode<synchronous>, transform_indices = @transform_10, window_bounds = array<i64: 2, 8, 128>}, {pipeline_mode = #tpu.pipeline_mode<synchronous>, transform_indices = @transform_11, window_bounds = array<i64: 2, 8, 128>}]} {
    %c0_i32 = arith.constant 0 : i32
    %0 = arith.cmpi eq, %arg0, %c0_i32 : i32
    %1 = arith.extui %0 : i1 to i32
    %c0_i32_0 = arith.constant 0 : i32
    %2 = arith.cmpi ne, %1, %c0_i32_0 : i32
    scf.if %2 {
      %c0_8 = arith.constant 0 : index
      %10 = memref.load %arg1[%c0_8] : memref<8xi32, #tpu.memory_space<smem>>
      %c1 = arith.constant 1 : index
      %11 = memref.load %arg1[%c1] : memref<8xi32, #tpu.memory_space<smem>>
      %c2 = arith.constant 2 : index
      %12 = memref.load %arg1[%c2] : memref<8xi32, #tpu.memory_space<smem>>
      %c3 = arith.constant 3 : index
      %13 = memref.load %arg1[%c3] : memref<8xi32, #tpu.memory_space<smem>>
      %c4 = arith.constant 4 : index
      %14 = memref.load %arg1[%c4] : memref<8xi32, #tpu.memory_space<smem>>
      %c5 = arith.constant 5 : index
      %15 = memref.load %arg1[%c5] : memref<8xi32, #tpu.memory_space<smem>>
      %c6 = arith.constant 6 : index
      %16 = memref.load %arg1[%c6] : memref<8xi32, #tpu.memory_space<smem>>
      %c7 = arith.constant 7 : index
      %17 = memref.load %arg1[%c7] : memref<8xi32, #tpu.memory_space<smem>>
      %c0_i32_9 = arith.constant 0 : i32
      %c0_i32_10 = arith.constant 0 : i32
      %18 = tpu.memref_slice %arg2[%10, %c0_i32_10] : memref<256x128xf32, #tpu.memory_space<any>> -> memref<1x128xf32, #tpu.memory_space<any>>
      %c0_i32_11 = arith.constant 0 : i32
      %c0_i32_12 = arith.constant 0 : i32
      %19 = tpu.memref_slice %arg16[%c0_i32_11, %c0_i32_12] : memref<8x128xf32, #tpu.memory_space<vmem>> -> memref<1x128xf32, #tpu.memory_space<vmem>>
      %20 = tpu.memref_slice %arg17[%c0_i32_9] : memref<8x!tpu.dma_semaphore, #tpu.memory_space<semaphore_mem>> -> memref<1x!tpu.dma_semaphore, #tpu.memory_space<semaphore_mem>>
      %21 = tpu.memref_squeeze %20 : memref<1x!tpu.dma_semaphore, #tpu.memory_space<semaphore_mem>> -> memref<!tpu.dma_semaphore, #tpu.memory_space<semaphore_mem>>
      tpu.enqueue_dma source(%18 : memref<1x128xf32, #tpu.memory_space<any>>) target(%19 : memref<1x128xf32, #tpu.memory_space<vmem>>) target_semaphore(%21 : memref<!tpu.dma_semaphore, #tpu.memory_space<semaphore_mem>>)
      %c1_i32 = arith.constant 1 : i32
      %c0_i32_13 = arith.constant 0 : i32
      %22 = tpu.memref_slice %arg2[%11, %c0_i32_13] : memref<256x128xf32, #tpu.memory_space<any>> -> memref<1x128xf32, #tpu.memory_space<any>>
      %c1_i32_14 = arith.constant 1 : i32
      %c0_i32_15 = arith.constant 0 : i32
      %23 = tpu.memref_slice %arg16[%c1_i32_14, %c0_i32_15] : memref<8x128xf32, #tpu.memory_space<vmem>> -> memref<1x128xf32, #tpu.memory_space<vmem>>
      %24 = tpu.memref_slice %arg17[%c1_i32] : memref<8x!tpu.dma_semaphore, #tpu.memory_space<semaphore_mem>> -> memref<1x!tpu.dma_semaphore, #tpu.memory_space<semaphore_mem>>
      %25 = tpu.memref_squeeze %24 : memref<1x!tpu.dma_semaphore, #tpu.memory_space<semaphore_mem>> -> memref<!tpu.dma_semaphore, #tpu.memory_space<semaphore_mem>>
      tpu.enqueue_dma source(%22 : memref<1x128xf32, #tpu.memory_space<any>>) target(%23 : memref<1x128xf32, #tpu.memory_space<vmem>>) target_semaphore(%25 : memref<!tpu.dma_semaphore, #tpu.memory_space<semaphore_mem>>)
      %c2_i32 = arith.constant 2 : i32
      %c0_i32_16 = arith.constant 0 : i32
      %26 = tpu.memref_slice %arg2[%12, %c0_i32_16] : memref<256x128xf32, #tpu.memory_space<any>> -> memref<1x128xf32, #tpu.memory_space<any>>
      %c2_i32_17 = arith.constant 2 : i32
      %c0_i32_18 = arith.constant 0 : i32
      %27 = tpu.memref_slice %arg16[%c2_i32_17, %c0_i32_18] : memref<8x128xf32, #tpu.memory_space<vmem>> -> memref<1x128xf32, #tpu.memory_space<vmem>>
      %28 = tpu.memref_slice %arg17[%c2_i32] : memref<8x!tpu.dma_semaphore, #tpu.memory_space<semaphore_mem>> -> memref<1x!tpu.dma_semaphore, #tpu.memory_space<semaphore_mem>>
      %29 = tpu.memref_squeeze %28 : memref<1x!tpu.dma_semaphore, #tpu.memory_space<semaphore_mem>> -> memref<!tpu.dma_semaphore, #tpu.memory_space<semaphore_mem>>
      tpu.enqueue_dma source(%26 : memref<1x128xf32, #tpu.memory_space<any>>) target(%27 : memref<1x128xf32, #tpu.memory_space<vmem>>) target_semaphore(%29 : memref<!tpu.dma_semaphore, #tpu.memory_space<semaphore_mem>>)
      %c3_i32 = arith.constant 3 : i32
      %c0_i32_19 = arith.constant 0 : i32
      %30 = tpu.memref_slice %arg2[%13, %c0_i32_19] : memref<256x128xf32, #tpu.memory_space<any>> -> memref<1x128xf32, #tpu.memory_space<any>>
      %c3_i32_20 = arith.constant 3 : i32
      %c0_i32_21 = arith.constant 0 : i32
      %31 = tpu.memref_slice %arg16[%c3_i32_20, %c0_i32_21] : memref<8x128xf32, #tpu.memory_space<vmem>> -> memref<1x128xf32, #tpu.memory_space<vmem>>
      %32 = tpu.memref_slice %arg17[%c3_i32] : memref<8x!tpu.dma_semaphore, #tpu.memory_space<semaphore_mem>> -> memref<1x!tpu.dma_semaphore, #tpu.memory_space<semaphore_mem>>
      %33 = tpu.memref_squeeze %32 : memref<1x!tpu.dma_semaphore, #tpu.memory_space<semaphore_mem>> -> memref<!tpu.dma_semaphore, #tpu.memory_space<semaphore_mem>>
      tpu.enqueue_dma source(%30 : memref<1x128xf32, #tpu.memory_space<any>>) target(%31 : memref<1x128xf32, #tpu.memory_space<vmem>>) target_semaphore(%33 : memref<!tpu.dma_semaphore, #tpu.memory_space<semaphore_mem>>)
      %c4_i32 = arith.constant 4 : i32
      %c0_i32_22 = arith.constant 0 : i32
      %34 = tpu.memref_slice %arg2[%14, %c0_i32_22] : memref<256x128xf32, #tpu.memory_space<any>> -> memref<1x128xf32, #tpu.memory_space<any>>
      %c4_i32_23 = arith.constant 4 : i32
      %c0_i32_24 = arith.constant 0 : i32
      %35 = tpu.memref_slice %arg16[%c4_i32_23, %c0_i32_24] : memref<8x128xf32, #tpu.memory_space<vmem>> -> memref<1x128xf32, #tpu.memory_space<vmem>>
      %36 = tpu.memref_slice %arg17[%c4_i32] : memref<8x!tpu.dma_semaphore, #tpu.memory_space<semaphore_mem>> -> memref<1x!tpu.dma_semaphore, #tpu.memory_space<semaphore_mem>>
      %37 = tpu.memref_squeeze %36 : memref<1x!tpu.dma_semaphore, #tpu.memory_space<semaphore_mem>> -> memref<!tpu.dma_semaphore, #tpu.memory_space<semaphore_mem>>
      tpu.enqueue_dma source(%34 : memref<1x128xf32, #tpu.memory_space<any>>) target(%35 : memref<1x128xf32, #tpu.memory_space<vmem>>) target_semaphore(%37 : memref<!tpu.dma_semaphore, #tpu.memory_space<semaphore_mem>>)
      %c5_i32 = arith.constant 5 : i32
      %c0_i32_25 = arith.constant 0 : i32
      %38 = tpu.memref_slice %arg2[%15, %c0_i32_25] : memref<256x128xf32, #tpu.memory_space<any>> -> memref<1x128xf32, #tpu.memory_space<any>>
      %c5_i32_26 = arith.constant 5 : i32
      %c0_i32_27 = arith.constant 0 : i32
      %39 = tpu.memref_slice %arg16[%c5_i32_26, %c0_i32_27] : memref<8x128xf32, #tpu.memory_space<vmem>> -> memref<1x128xf32, #tpu.memory_space<vmem>>
      %40 = tpu.memref_slice %arg17[%c5_i32] : memref<8x!tpu.dma_semaphore, #tpu.memory_space<semaphore_mem>> -> memref<1x!tpu.dma_semaphore, #tpu.memory_space<semaphore_mem>>
      %41 = tpu.memref_squeeze %40 : memref<1x!tpu.dma_semaphore, #tpu.memory_space<semaphore_mem>> -> memref<!tpu.dma_semaphore, #tpu.memory_space<semaphore_mem>>
      tpu.enqueue_dma source(%38 : memref<1x128xf32, #tpu.memory_space<any>>) target(%39 : memref<1x128xf32, #tpu.memory_space<vmem>>) target_semaphore(%41 : memref<!tpu.dma_semaphore, #tpu.memory_space<semaphore_mem>>)
      %c6_i32 = arith.constant 6 : i32
      %c0_i32_28 = arith.constant 0 : i32
      %42 = tpu.memref_slice %arg2[%16, %c0_i32_28] : memref<256x128xf32, #tpu.memory_space<any>> -> memref<1x128xf32, #tpu.memory_space<any>>
      %c6_i32_29 = arith.constant 6 : i32
      %c0_i32_30 = arith.constant 0 : i32
      %43 = tpu.memref_slice %arg16[%c6_i32_29, %c0_i32_30] : memref<8x128xf32, #tpu.memory_space<vmem>> -> memref<1x128xf32, #tpu.memory_space<vmem>>
      %44 = tpu.memref_slice %arg17[%c6_i32] : memref<8x!tpu.dma_semaphore, #tpu.memory_space<semaphore_mem>> -> memref<1x!tpu.dma_semaphore, #tpu.memory_space<semaphore_mem>>
      %45 = tpu.memref_squeeze %44 : memref<1x!tpu.dma_semaphore, #tpu.memory_space<semaphore_mem>> -> memref<!tpu.dma_semaphore, #tpu.memory_space<semaphore_mem>>
      tpu.enqueue_dma source(%42 : memref<1x128xf32, #tpu.memory_space<any>>) target(%43 : memref<1x128xf32, #tpu.memory_space<vmem>>) target_semaphore(%45 : memref<!tpu.dma_semaphore, #tpu.memory_space<semaphore_mem>>)
      %c7_i32 = arith.constant 7 : i32
      %c0_i32_31 = arith.constant 0 : i32
      %46 = tpu.memref_slice %arg2[%17, %c0_i32_31] : memref<256x128xf32, #tpu.memory_space<any>> -> memref<1x128xf32, #tpu.memory_space<any>>
      %c7_i32_32 = arith.constant 7 : i32
      %c0_i32_33 = arith.constant 0 : i32
      %47 = tpu.memref_slice %arg16[%c7_i32_32, %c0_i32_33] : memref<8x128xf32, #tpu.memory_space<vmem>> -> memref<1x128xf32, #tpu.memory_space<vmem>>
      %48 = tpu.memref_slice %arg17[%c7_i32] : memref<8x!tpu.dma_semaphore, #tpu.memory_space<semaphore_mem>> -> memref<1x!tpu.dma_semaphore, #tpu.memory_space<semaphore_mem>>
      %49 = tpu.memref_squeeze %48 : memref<1x!tpu.dma_semaphore, #tpu.memory_space<semaphore_mem>> -> memref<!tpu.dma_semaphore, #tpu.memory_space<semaphore_mem>>
      tpu.enqueue_dma source(%46 : memref<1x128xf32, #tpu.memory_space<any>>) target(%47 : memref<1x128xf32, #tpu.memory_space<vmem>>) target_semaphore(%49 : memref<!tpu.dma_semaphore, #tpu.memory_space<semaphore_mem>>)
      %c0_i32_34 = arith.constant 0 : i32
      %c0_i32_35 = arith.constant 0 : i32
      %50 = tpu.memref_slice %arg2[%10, %c0_i32_35] : memref<256x128xf32, #tpu.memory_space<any>> -> memref<1x128xf32, #tpu.memory_space<any>>
      %c0_i32_36 = arith.constant 0 : i32
      %c0_i32_37 = arith.constant 0 : i32
      %51 = tpu.memref_slice %arg16[%c0_i32_36, %c0_i32_37] : memref<8x128xf32, #tpu.memory_space<vmem>> -> memref<1x128xf32, #tpu.memory_space<vmem>>
      %52 = tpu.memref_slice %arg17[%c0_i32_34] : memref<8x!tpu.dma_semaphore, #tpu.memory_space<semaphore_mem>> -> memref<1x!tpu.dma_semaphore, #tpu.memory_space<semaphore_mem>>
      %53 = tpu.memref_squeeze %52 : memref<1x!tpu.dma_semaphore, #tpu.memory_space<semaphore_mem>> -> memref<!tpu.dma_semaphore, #tpu.memory_space<semaphore_mem>>
      tpu.wait_dma2 semaphore(%53 : memref<!tpu.dma_semaphore, #tpu.memory_space<semaphore_mem>>) src(%50 : memref<1x128xf32, #tpu.memory_space<any>>) dst(%51 : memref<1x128xf32, #tpu.memory_space<vmem>>)
      %c1_i32_38 = arith.constant 1 : i32
      %c0_i32_39 = arith.constant 0 : i32
      %54 = tpu.memref_slice %arg2[%11, %c0_i32_39] : memref<256x128xf32, #tpu.memory_space<any>> -> memref<1x128xf32, #tpu.memory_space<any>>
      %c1_i32_40 = arith.constant 1 : i32
      %c0_i32_41 = arith.constant 0 : i32
      %55 = tpu.memref_slice %arg16[%c1_i32_40, %c0_i32_41] : memref<8x128xf32, #tpu.memory_space<vmem>> -> memref<1x128xf32, #tpu.memory_space<vmem>>
      %56 = tpu.memref_slice %arg17[%c1_i32_38] : memref<8x!tpu.dma_semaphore, #tpu.memory_space<semaphore_mem>> -> memref<1x!tpu.dma_semaphore, #tpu.memory_space<semaphore_mem>>
      %57 = tpu.memref_squeeze %56 : memref<1x!tpu.dma_semaphore, #tpu.memory_space<semaphore_mem>> -> memref<!tpu.dma_semaphore, #tpu.memory_space<semaphore_mem>>
      tpu.wait_dma2 semaphore(%57 : memref<!tpu.dma_semaphore, #tpu.memory_space<semaphore_mem>>) src(%54 : memref<1x128xf32, #tpu.memory_space<any>>) dst(%55 : memref<1x128xf32, #tpu.memory_space<vmem>>)
      %c2_i32_42 = arith.constant 2 : i32
      %c0_i32_43 = arith.constant 0 : i32
      %58 = tpu.memref_slice %arg2[%12, %c0_i32_43] : memref<256x128xf32, #tpu.memory_space<any>> -> memref<1x128xf32, #tpu.memory_space<any>>
      %c2_i32_44 = arith.constant 2 : i32
      %c0_i32_45 = arith.constant 0 : i32
      %59 = tpu.memref_slice %arg16[%c2_i32_44, %c0_i32_45] : memref<8x128xf32, #tpu.memory_space<vmem>> -> memref<1x128xf32, #tpu.memory_space<vmem>>
      %60 = tpu.memref_slice %arg17[%c2_i32_42] : memref<8x!tpu.dma_semaphore, #tpu.memory_space<semaphore_mem>> -> memref<1x!tpu.dma_semaphore, #tpu.memory_space<semaphore_mem>>
      %61 = tpu.memref_squeeze %60 : memref<1x!tpu.dma_semaphore, #tpu.memory_space<semaphore_mem>> -> memref<!tpu.dma_semaphore, #tpu.memory_space<semaphore_mem>>
      tpu.wait_dma2 semaphore(%61 : memref<!tpu.dma_semaphore, #tpu.memory_space<semaphore_mem>>) src(%58 : memref<1x128xf32, #tpu.memory_space<any>>) dst(%59 : memref<1x128xf32, #tpu.memory_space<vmem>>)
      %c3_i32_46 = arith.constant 3 : i32
      %c0_i32_47 = arith.constant 0 : i32
      %62 = tpu.memref_slice %arg2[%13, %c0_i32_47] : memref<256x128xf32, #tpu.memory_space<any>> -> memref<1x128xf32, #tpu.memory_space<any>>
      %c3_i32_48 = arith.constant 3 : i32
      %c0_i32_49 = arith.constant 0 : i32
      %63 = tpu.memref_slice %arg16[%c3_i32_48, %c0_i32_49] : memref<8x128xf32, #tpu.memory_space<vmem>> -> memref<1x128xf32, #tpu.memory_space<vmem>>
      %64 = tpu.memref_slice %arg17[%c3_i32_46] : memref<8x!tpu.dma_semaphore, #tpu.memory_space<semaphore_mem>> -> memref<1x!tpu.dma_semaphore, #tpu.memory_space<semaphore_mem>>
      %65 = tpu.memref_squeeze %64 : memref<1x!tpu.dma_semaphore, #tpu.memory_space<semaphore_mem>> -> memref<!tpu.dma_semaphore, #tpu.memory_space<semaphore_mem>>
      tpu.wait_dma2 semaphore(%65 : memref<!tpu.dma_semaphore, #tpu.memory_space<semaphore_mem>>) src(%62 : memref<1x128xf32, #tpu.memory_space<any>>) dst(%63 : memref<1x128xf32, #tpu.memory_space<vmem>>)
      %c4_i32_50 = arith.constant 4 : i32
      %c0_i32_51 = arith.constant 0 : i32
      %66 = tpu.memref_slice %arg2[%14, %c0_i32_51] : memref<256x128xf32, #tpu.memory_space<any>> -> memref<1x128xf32, #tpu.memory_space<any>>
      %c4_i32_52 = arith.constant 4 : i32
      %c0_i32_53 = arith.constant 0 : i32
      %67 = tpu.memref_slice %arg16[%c4_i32_52, %c0_i32_53] : memref<8x128xf32, #tpu.memory_space<vmem>> -> memref<1x128xf32, #tpu.memory_space<vmem>>
      %68 = tpu.memref_slice %arg17[%c4_i32_50] : memref<8x!tpu.dma_semaphore, #tpu.memory_space<semaphore_mem>> -> memref<1x!tpu.dma_semaphore, #tpu.memory_space<semaphore_mem>>
      %69 = tpu.memref_squeeze %68 : memref<1x!tpu.dma_semaphore, #tpu.memory_space<semaphore_mem>> -> memref<!tpu.dma_semaphore, #tpu.memory_space<semaphore_mem>>
      tpu.wait_dma2 semaphore(%69 : memref<!tpu.dma_semaphore, #tpu.memory_space<semaphore_mem>>) src(%66 : memref<1x128xf32, #tpu.memory_space<any>>) dst(%67 : memref<1x128xf32, #tpu.memory_space<vmem>>)
      %c5_i32_54 = arith.constant 5 : i32
      %c0_i32_55 = arith.constant 0 : i32
      %70 = tpu.memref_slice %arg2[%15, %c0_i32_55] : memref<256x128xf32, #tpu.memory_space<any>> -> memref<1x128xf32, #tpu.memory_space<any>>
      %c5_i32_56 = arith.constant 5 : i32
      %c0_i32_57 = arith.constant 0 : i32
      %71 = tpu.memref_slice %arg16[%c5_i32_56, %c0_i32_57] : memref<8x128xf32, #tpu.memory_space<vmem>> -> memref<1x128xf32, #tpu.memory_space<vmem>>
      %72 = tpu.memref_slice %arg17[%c5_i32_54] : memref<8x!tpu.dma_semaphore, #tpu.memory_space<semaphore_mem>> -> memref<1x!tpu.dma_semaphore, #tpu.memory_space<semaphore_mem>>
      %73 = tpu.memref_squeeze %72 : memref<1x!tpu.dma_semaphore, #tpu.memory_space<semaphore_mem>> -> memref<!tpu.dma_semaphore, #tpu.memory_space<semaphore_mem>>
      tpu.wait_dma2 semaphore(%73 : memref<!tpu.dma_semaphore, #tpu.memory_space<semaphore_mem>>) src(%70 : memref<1x128xf32, #tpu.memory_space<any>>) dst(%71 : memref<1x128xf32, #tpu.memory_space<vmem>>)
      %c6_i32_58 = arith.constant 6 : i32
      %c0_i32_59 = arith.constant 0 : i32
      %74 = tpu.memref_slice %arg2[%16, %c0_i32_59] : memref<256x128xf32, #tpu.memory_space<any>> -> memref<1x128xf32, #tpu.memory_space<any>>
      %c6_i32_60 = arith.constant 6 : i32
      %c0_i32_61 = arith.constant 0 : i32
      %75 = tpu.memref_slice %arg16[%c6_i32_60, %c0_i32_61] : memref<8x128xf32, #tpu.memory_space<vmem>> -> memref<1x128xf32, #tpu.memory_space<vmem>>
      %76 = tpu.memref_slice %arg17[%c6_i32_58] : memref<8x!tpu.dma_semaphore, #tpu.memory_space<semaphore_mem>> -> memref<1x!tpu.dma_semaphore, #tpu.memory_space<semaphore_mem>>
      %77 = tpu.memref_squeeze %76 : memref<1x!tpu.dma_semaphore, #tpu.memory_space<semaphore_mem>> -> memref<!tpu.dma_semaphore, #tpu.memory_space<semaphore_mem>>
      tpu.wait_dma2 semaphore(%77 : memref<!tpu.dma_semaphore, #tpu.memory_space<semaphore_mem>>) src(%74 : memref<1x128xf32, #tpu.memory_space<any>>) dst(%75 : memref<1x128xf32, #tpu.memory_space<vmem>>)
      %c7_i32_62 = arith.constant 7 : i32
      %c0_i32_63 = arith.constant 0 : i32
      %78 = tpu.memref_slice %arg2[%17, %c0_i32_63] : memref<256x128xf32, #tpu.memory_space<any>> -> memref<1x128xf32, #tpu.memory_space<any>>
      %c7_i32_64 = arith.constant 7 : i32
      %c0_i32_65 = arith.constant 0 : i32
      %79 = tpu.memref_slice %arg16[%c7_i32_64, %c0_i32_65] : memref<8x128xf32, #tpu.memory_space<vmem>> -> memref<1x128xf32, #tpu.memory_space<vmem>>
      %80 = tpu.memref_slice %arg17[%c7_i32_62] : memref<8x!tpu.dma_semaphore, #tpu.memory_space<semaphore_mem>> -> memref<1x!tpu.dma_semaphore, #tpu.memory_space<semaphore_mem>>
      %81 = tpu.memref_squeeze %80 : memref<1x!tpu.dma_semaphore, #tpu.memory_space<semaphore_mem>> -> memref<!tpu.dma_semaphore, #tpu.memory_space<semaphore_mem>>
      tpu.wait_dma2 semaphore(%81 : memref<!tpu.dma_semaphore, #tpu.memory_space<semaphore_mem>>) src(%78 : memref<1x128xf32, #tpu.memory_space<any>>) dst(%79 : memref<1x128xf32, #tpu.memory_space<vmem>>)
      %c0_66 = arith.constant 0 : index
      %c0_67 = arith.constant 0 : index
      %82 = vector.load %arg16[%c0_66, %c0_67] : memref<8x128xf32, #tpu.memory_space<vmem>>, vector<8x128xf32>
      %c0_68 = arith.constant 0 : index
      %c0_69 = arith.constant 0 : index
      %83 = vector.load %arg14[%c0_68, %c0_69] : memref<8x256xf32, #tpu.memory_space<vmem>>, vector<8x128xf32>
      tpu.vector_store %arg14[%c0_68, %c0_69], %82 {strides = array<i32>} : memref<8x256xf32, #tpu.memory_space<vmem>>, vector<8x128xf32>,
      %c0_70 = arith.constant 0 : index
      %c0_71 = arith.constant 0 : index
      %c0_72 = arith.constant 0 : index
      %84 = vector.load %arg3[%c0_70, %c0_71, %c0_72] : memref<2x8x128xf32, #tpu.memory_space<vmem>>, vector<1x8x128xf32>
      %85 = vector.shape_cast %84 : vector<1x8x128xf32> to vector<8x128xf32>
      %c0_73 = arith.constant 0 : index
      %c128 = arith.constant 128 : index
      %86 = vector.load %arg14[%c0_73, %c128] : memref<8x256xf32, #tpu.memory_space<vmem>>, vector<8x128xf32>
      tpu.vector_store %arg14[%c0_73, %c128], %85 {strides = array<i32>} : memref<8x256xf32, #tpu.memory_space<vmem>>, vector<8x128xf32>,
      %c0_74 = arith.constant 0 : index
      %c0_75 = arith.constant 0 : index
      %87 = vector.load %arg14[%c0_74, %c0_75] : memref<8x256xf32, #tpu.memory_space<vmem>>, vector<8x256xf32>
      %88 = arith.truncf %87 : vector<8x256xf32> to vector<8x256xbf16>
      %c0_76 = arith.constant 0 : index
      %c0_77 = arith.constant 0 : index
      %89 = vector.load %arg5[%c0_76, %c0_77] : memref<256x512xbf16, #tpu.memory_space<vmem>>, vector<256x512xbf16>
      %cst_78 = arith.constant dense<0.000000e+00> : vector<8x512xf32>
      %90 = tpu.matmul %88, %89, %cst_78 {dimension_numbers = #tpu.dot_dimension_numbers<[1], [0], [0], [1], [0, 0, 1, 1], [], []>} : vector<8x256xbf16>, vector<256x512xbf16>, vector<8x512xf32> -> vector<8x512xf32>
      %c0_79 = arith.constant 0 : index
      %c0_80 = arith.constant 0 : index
      %91 = vector.load %arg6[%c0_79, %c0_80] : memref<1x512xf32, #tpu.memory_space<vmem>>, vector<1x512xf32>
      %92 = vector.broadcast %91 : vector<1x512xf32> to vector<8x512xf32>
      %93 = arith.addf %90, %92 : vector<8x512xf32>
      %94 = vector.extract_strided_slice %93 {offsets = [0, 0], sizes = [8, 128], strides = [1, 1]} : vector<8x512xf32> to vector<8x128xf32>
      %95 = arith.negf %94 : vector<8x128xf32>
      %96 = math.exp %95 : vector<8x128xf32>
      %cst_81 = arith.constant 1.000000e+00 : f32
      %97 = vector.broadcast %cst_81 : f32 to vector<8x128xf32>
      %98 = arith.addf %97, %96 : vector<8x128xf32>
      %99 = arith.divf %97, %98 : vector<8x128xf32>
      %100 = vector.extract_strided_slice %93 {offsets = [0, 128], sizes = [8, 128], strides = [1, 1]} : vector<8x512xf32> to vector<8x128xf32>
      %101 = arith.negf %100 : vector<8x128xf32>
      %102 = math.exp %101 : vector<8x128xf32>
      %cst_82 = arith.constant 1.000000e+00 : f32
      %103 = vector.broadcast %cst_82 : f32 to vector<8x128xf32>
      %104 = arith.addf %103, %102 : vector<8x128xf32>
      %105 = arith.divf %103, %104 : vector<8x128xf32>
      %106 = vector.extract_strided_slice %93 {offsets = [0, 256], sizes = [8, 128], strides = [1, 1]} : vector<8x512xf32> to vector<8x128xf32>
      %107 = math.tanh %106 : vector<8x128xf32>
      %108 = vector.extract_strided_slice %93 {offsets = [0, 384], sizes = [8, 128], strides = [1, 1]} : vector<8x512xf32> to vector<8x128xf32>
      %109 = arith.negf %108 : vector<8x128xf32>
      %110 = math.exp %109 : vector<8x128xf32>
      %cst_83 = arith.constant 1.000000e+00 : f32
      %111 = vector.broadcast %cst_83 : f32 to vector<8x128xf32>
      %112 = arith.addf %111, %110 : vector<8x128xf32>
      %113 = arith.divf %111, %112 : vector<8x128xf32>
      %c0_84 = arith.constant 0 : index
      %c0_85 = arith.constant 0 : index
      %c0_86 = arith.constant 0 : index
      %114 = vector.load %arg4[%c0_84, %c0_85, %c0_86] : memref<2x8x128xf32, #tpu.memory_space<vmem>>, vector<1x8x128xf32>
      %115 = vector.shape_cast %114 : vector<1x8x128xf32> to vector<8x128xf32>
      %116 = arith.mulf %105, %115 : vector<8x128xf32>
      %117 = arith.mulf %99, %107 : vector<8x128xf32>
      %118 = arith.addf %116, %117 : vector<8x128xf32>
      %119 = math.tanh %118 : vector<8x128xf32>
      %120 = arith.mulf %113, %119 : vector<8x128xf32>
      %c0_87 = arith.constant 0 : index
      %c0_88 = arith.constant 0 : index
      %c0_89 = arith.constant 0 : index
      %121 = vector.load %arg12[%c0_87, %c0_88, %c0_89] : memref<2x8x128xf32, #tpu.memory_space<vmem>>, vector<1x8x128xf32>
      %122 = vector.shape_cast %121 : vector<1x8x128xf32> to vector<8x128xf32>
      %123 = vector.shape_cast %120 : vector<8x128xf32> to vector<1x8x128xf32>
      tpu.vector_store %arg12[%c0_87, %c0_88, %c0_89], %123 {strides = array<i32>} : memref<2x8x128xf32, #tpu.memory_space<vmem>>, vector<1x8x128xf32>,
      %c0_90 = arith.constant 0 : index
      %c0_91 = arith.constant 0 : index
      %c0_92 = arith.constant 0 : index
      %124 = vector.load %arg13[%c0_90, %c0_91, %c0_92] : memref<2x8x128xf32, #tpu.memory_space<vmem>>, vector<1x8x128xf32>
      %125 = vector.shape_cast %124 : vector<1x8x128xf32> to vector<8x128xf32>
      %126 = vector.shape_cast %118 : vector<8x128xf32> to vector<1x8x128xf32>
      tpu.vector_store %arg13[%c0_90, %c0_91, %c0_92], %126 {strides = array<i32>} : memref<2x8x128xf32, #tpu.memory_space<vmem>>, vector<1x8x128xf32>,
      %c0_93 = arith.constant 0 : index
      %c0_94 = arith.constant 0 : index
      %127 = vector.load %arg14[%c0_93, %c0_94] : memref<8x256xf32, #tpu.memory_space<vmem>>, vector<8x128xf32>
      tpu.vector_store %arg14[%c0_93, %c0_94], %120 {strides = array<i32>} : memref<8x256xf32, #tpu.memory_space<vmem>>, vector<8x128xf32>,
      %c1_95 = arith.constant 1 : index
      %c0_96 = arith.constant 0 : index
      %c0_97 = arith.constant 0 : index
      %128 = vector.load %arg3[%c1_95, %c0_96, %c0_97] : memref<2x8x128xf32, #tpu.memory_space<vmem>>, vector<1x8x128xf32>
      %129 = vector.shape_cast %128 : vector<1x8x128xf32> to vector<8x128xf32>
      %c0_98 = arith.constant 0 : index
      %c128_99 = arith.constant 128 : index
      %130 = vector.load %arg14[%c0_98, %c128_99] : memref<8x256xf32, #tpu.memory_space<vmem>>, vector<8x128xf32>
      tpu.vector_store %arg14[%c0_98, %c128_99], %129 {strides = array<i32>} : memref<8x256xf32, #tpu.memory_space<vmem>>, vector<8x128xf32>,
      %c0_100 = arith.constant 0 : index
      %c0_101 = arith.constant 0 : index
      %131 = vector.load %arg14[%c0_100, %c0_101] : memref<8x256xf32, #tpu.memory_space<vmem>>, vector<8x256xf32>
      %132 = arith.truncf %131 : vector<8x256xf32> to vector<8x256xbf16>
      %c0_102 = arith.constant 0 : index
      %c0_103 = arith.constant 0 : index
      %133 = vector.load %arg7[%c0_102, %c0_103] : memref<256x512xbf16, #tpu.memory_space<vmem>>, vector<256x512xbf16>
      %cst_104 = arith.constant dense<0.000000e+00> : vector<8x512xf32>
      %134 = tpu.matmul %132, %133, %cst_104 {dimension_numbers = #tpu.dot_dimension_numbers<[1], [0], [0], [1], [0, 0, 1, 1], [], []>} : vector<8x256xbf16>, vector<256x512xbf16>, vector<8x512xf32> -> vector<8x512xf32>
      %c0_105 = arith.constant 0 : index
      %c0_106 = arith.constant 0 : index
      %135 = vector.load %arg8[%c0_105, %c0_106] : memref<1x512xf32, #tpu.memory_space<vmem>>, vector<1x512xf32>
      %136 = vector.broadcast %135 : vector<1x512xf32> to vector<8x512xf32>
      %137 = arith.addf %134, %136 : vector<8x512xf32>
      %138 = vector.extract_strided_slice %137 {offsets = [0, 0], sizes = [8, 128], strides = [1, 1]} : vector<8x512xf32> to vector<8x128xf32>
      %139 = arith.negf %138 : vector<8x128xf32>
      %140 = math.exp %139 : vector<8x128xf32>
      %cst_107 = arith.constant 1.000000e+00 : f32
      %141 = vector.broadcast %cst_107 : f32 to vector<8x128xf32>
      %142 = arith.addf %141, %140 : vector<8x128xf32>
      %143 = arith.divf %141, %142 : vector<8x128xf32>
      %144 = vector.extract_strided_slice %137 {offsets = [0, 128], sizes = [8, 128], strides = [1, 1]} : vector<8x512xf32> to vector<8x128xf32>
      %145 = arith.negf %144 : vector<8x128xf32>
      %146 = math.exp %145 : vector<8x128xf32>
      %cst_108 = arith.constant 1.000000e+00 : f32
      %147 = vector.broadcast %cst_108 : f32 to vector<8x128xf32>
      %148 = arith.addf %147, %146 : vector<8x128xf32>
      %149 = arith.divf %147, %148 : vector<8x128xf32>
      %150 = vector.extract_strided_slice %137 {offsets = [0, 256], sizes = [8, 128], strides = [1, 1]} : vector<8x512xf32> to vector<8x128xf32>
      %151 = math.tanh %150 : vector<8x128xf32>
      %152 = vector.extract_strided_slice %137 {offsets = [0, 384], sizes = [8, 128], strides = [1, 1]} : vector<8x512xf32> to vector<8x128xf32>
      %153 = arith.negf %152 : vector<8x128xf32>
      %154 = math.exp %153 : vector<8x128xf32>
      %cst_109 = arith.constant 1.000000e+00 : f32
      %155 = vector.broadcast %cst_109 : f32 to vector<8x128xf32>
      %156 = arith.addf %155, %154 : vector<8x128xf32>
      %157 = arith.divf %155, %156 : vector<8x128xf32>
      %c1_110 = arith.constant 1 : index
      %c0_111 = arith.constant 0 : index
      %c0_112 = arith.constant 0 : index
      %158 = vector.load %arg4[%c1_110, %c0_111, %c0_112] : memref<2x8x128xf32, #tpu.memory_space<vmem>>, vector<1x8x128xf32>
      %159 = vector.shape_cast %158 : vector<1x8x128xf32> to vector<8x128xf32>
      %160 = arith.mulf %149, %159 : vector<8x128xf32>
      %161 = arith.mulf %143, %151 : vector<8x128xf32>
      %162 = arith.addf %160, %161 : vector<8x128xf32>
      %163 = math.tanh %162 : vector<8x128xf32>
      %164 = arith.mulf %157, %163 : vector<8x128xf32>
      %c1_113 = arith.constant 1 : index
      %c0_114 = arith.constant 0 : index
      %c0_115 = arith.constant 0 : index
      %165 = vector.load %arg12[%c1_113, %c0_114, %c0_115] : memref<2x8x128xf32, #tpu.memory_space<vmem>>, vector<1x8x128xf32>
      %166 = vector.shape_cast %165 : vector<1x8x128xf32> to vector<8x128xf32>
      %167 = vector.shape_cast %164 : vector<8x128xf32> to vector<1x8x128xf32>
      tpu.vector_store %arg12[%c1_113, %c0_114, %c0_115], %167 {strides = array<i32>} : memref<2x8x128xf32, #tpu.memory_space<vmem>>, vector<1x8x128xf32>,
      %c1_116 = arith.constant 1 : index
      %c0_117 = arith.constant 0 : index
      %c0_118 = arith.constant 0 : index
      %168 = vector.load %arg13[%c1_116, %c0_117, %c0_118] : memref<2x8x128xf32, #tpu.memory_space<vmem>>, vector<1x8x128xf32>
      %169 = vector.shape_cast %168 : vector<1x8x128xf32> to vector<8x128xf32>
      %170 = vector.shape_cast %162 : vector<8x128xf32> to vector<1x8x128xf32>
      tpu.vector_store %arg13[%c1_116, %c0_117, %c0_118], %170 {strides = array<i32>} : memref<2x8x128xf32, #tpu.memory_space<vmem>>, vector<1x8x128xf32>,
      %c0_119 = arith.constant 0 : index
      %c0_120 = arith.constant 0 : index
      %171 = vector.load %arg14[%c0_119, %c0_120] : memref<8x256xf32, #tpu.memory_space<vmem>>, vector<8x128xf32>
      tpu.vector_store %arg14[%c0_119, %c0_120], %164 {strides = array<i32>} : memref<8x256xf32, #tpu.memory_space<vmem>>, vector<8x128xf32>,
      %c0_121 = arith.constant 0 : index
      %c0_122 = arith.constant 0 : index
      %172 = vector.load %arg14[%c0_121, %c0_122] : memref<8x256xf32, #tpu.memory_space<vmem>>, vector<8x128xf32>
      %173 = arith.truncf %172 : vector<8x128xf32> to vector<8x128xbf16>
      %c0_123 = arith.constant 0 : index
      %c0_124 = arith.constant 0 : index
      %174 = vector.load %arg15[%c0_123, %c0_124] : memref<8x128xbf16, #tpu.memory_space<vmem>>, vector<8x128xbf16>
      tpu.vector_store %arg15[%c0_123, %c0_124], %173 {strides = array<i32>} : memref<8x128xbf16, #tpu.memory_space<vmem>>, vector<8x128xbf16>,
    } else {
    }
    %c0 = arith.constant 0 : index
    %c0_1 = arith.constant 0 : index
    %3 = vector.load %arg15[%c0, %c0_1] : memref<8x128xbf16, #tpu.memory_space<vmem>>, vector<8x128xbf16>
    %c0_2 = arith.constant 0 : index
    %c0_3 = arith.constant 0 : index
    %4 = vector.load %arg9[%c0_2, %c0_3] : memref<128x128xbf16, #tpu.memory_space<vmem>>, vector<128x128xbf16>
    %cst = arith.constant dense<0.000000e+00> : vector<8x128xf32>
    %5 = tpu.matmul %3, %4, %cst {dimension_numbers = #tpu.dot_dimension_numbers<[1], [0], [0], [1], [0, 0, 1, 1], [], []>} : vector<8x128xbf16>, vector<128x128xbf16>, vector<8x128xf32> -> vector<8x128xf32>
    %c0_4 = arith.constant 0 : index
    %c0_5 = arith.constant 0 : index
    %6 = vector.load %arg10[%c0_4, %c0_5] : memref<1x128xf32, #tpu.memory_space<vmem>>, vector<1x128xf32>
    %7 = vector.broadcast %6 : vector<1x128xf32> to vector<8x128xf32>
    %8 = arith.addf %5, %7 : vector<8x128xf32>
    %c0_6 = arith.constant 0 : index
    %c0_7 = arith.constant 0 : index
    %9 = vector.load %arg11[%c0_6, %c0_7] : memref<8x128xf32, #tpu.memory_space<vmem>>, vector<8x128xf32>
    tpu.vector_store %arg11[%c0_6, %c0_7], %8 {strides = array<i32>} : memref<8x128xf32, #tpu.memory_space<vmem>>, vector<8x128xf32>,
    return
  }
  func.func @transform_1(%arg0: i32, %arg1: memref<8xi32, #tpu.memory_space<smem>>) -> (i32, i32, i32) {
    %c0_i32 = arith.constant 0 : i32
    %c0_i32_0 = arith.constant 0 : i32
    %c0_i32_1 = arith.constant 0 : i32
    %c0_i32_2 = arith.constant 0 : i32
    return %c0_i32, %c0_i32_0, %c0_i32_1 : i32, i32, i32
  }
  func.func @transform_2(%arg0: i32, %arg1: memref<8xi32, #tpu.memory_space<smem>>) -> (i32, i32, i32) {
    %c0_i32 = arith.constant 0 : i32
    %c0_i32_0 = arith.constant 0 : i32
    %c0_i32_1 = arith.constant 0 : i32
    %c0_i32_2 = arith.constant 0 : i32
    return %c0_i32, %c0_i32_0, %c0_i32_1 : i32, i32, i32
  }
  func.func @transform_3(%arg0: i32, %arg1: memref<8xi32, #tpu.memory_space<smem>>) -> (i32, i32) {
    %c0_i32 = arith.constant 0 : i32
    %c0_i32_0 = arith.constant 0 : i32
    %c0_i32_1 = arith.constant 0 : i32
    return %c0_i32, %c0_i32_0 : i32, i32
  }
  func.func @transform_4(%arg0: i32, %arg1: memref<8xi32, #tpu.memory_space<smem>>) -> (i32, i32) {
    %c0_i32 = arith.constant 0 : i32
    %c0_i32_0 = arith.constant 0 : i32
    %c0_i32_1 = arith.constant 0 : i32
    return %c0_i32, %c0_i32_0 : i32, i32
  }
  func.func @transform_5(%arg0: i32, %arg1: memref<8xi32, #tpu.memory_space<smem>>) -> (i32, i32) {
    %c0_i32 = arith.constant 0 : i32
    %c0_i32_0 = arith.constant 0 : i32
    %c0_i32_1 = arith.constant 0 : i32
    return %c0_i32, %c0_i32_0 : i32, i32
  }
  func.func @transform_6(%arg0: i32, %arg1: memref<8xi32, #tpu.memory_space<smem>>) -> (i32, i32) {
    %c0_i32 = arith.constant 0 : i32
    %c0_i32_0 = arith.constant 0 : i32
    %c0_i32_1 = arith.constant 0 : i32
    return %c0_i32, %c0_i32_0 : i32, i32
  }
  func.func @transform_7(%arg0: i32, %arg1: memref<8xi32, #tpu.memory_space<smem>>) -> (i32, i32) {
    %c0_i32 = arith.constant 0 : i32
    %c0_i32_0 = arith.constant 0 : i32
    return %c0_i32, %arg0 : i32, i32
  }
  func.func @transform_8(%arg0: i32, %arg1: memref<8xi32, #tpu.memory_space<smem>>) -> (i32, i32) {
    %c0_i32 = arith.constant 0 : i32
    %c0_i32_0 = arith.constant 0 : i32
    return %c0_i32, %arg0 : i32, i32
  }
  func.func @transform_9(%arg0: i32, %arg1: memref<8xi32, #tpu.memory_space<smem>>) -> (i32, i32) {
    %c0_i32 = arith.constant 0 : i32
    %c0_i32_0 = arith.constant 0 : i32
    return %c0_i32, %arg0 : i32, i32
  }
  func.func @transform_10(%arg0: i32, %arg1: memref<8xi32, #tpu.memory_space<smem>>) -> (i32, i32, i32) {
    %c0_i32 = arith.constant 0 : i32
    %c0_i32_0 = arith.constant 0 : i32
    %c0_i32_1 = arith.constant 0 : i32
    %c0_i32_2 = arith.constant 0 : i32
    return %c0_i32, %c0_i32_0, %c0_i32_1 : i32, i32, i32
  }
  func.func @transform_11(%arg0: i32, %arg1: memref<8xi32, #tpu.memory_space<smem>>) -> (i32, i32, i32) {
    %c0_i32 = arith.constant 0 : i32
    %c0_i32_0 = arith.constant 0 : i32
    %c0_i32_1 = arith.constant 0 : i32
    %c0_i32_2 = arith.constant 0 : i32
    return %c0_i32, %c0_i32_0, %c0_i32_1 : i32, i32, i32
  }
}

</mosaic_0001>

<bundles_post_ra>
// kernel: tpu_custom_call.1
= control target key start
LH: loop header
LB: loop body
LE: loop exit
PB: predicated region body
PF: predicated region fallthrough
CT: control target
= control target key end

     0   :  { %s3672_s0 = inlined_call_operand.vmem [shape: s32[8], index: 0, kind: input, shape index: {}]   ;;  %s3673_s1 = inlined_call_operand.hbm [shape: f32[256,128], index: 1, kind: input, shape index: {}]   ;;  %s3674_s2 = inlined_call_operand.hbm [shape: f32[2,8,128], index: 2, kind: input, shape index: {}, may-alias: {2,11}]   ;;  %s3675_s3 = inlined_call_operand.hbm [shape: f32[2,8,128], index: 3, kind: input, shape index: {}, may-alias: {3,12}]   ;;  %s3676_s4 = inlined_call_operand.hbm [shape: bf16[256,512], index: 4, kind: input, shape index: {}]   ;;  %s3677_s5 = inlined_call_operand.vmem [shape: f32[1,512], index: 5, kind: input, shape index: {}]   ;;  %s3678_s6 = inlined_call_operand.hbm [shape: bf16[256,512], index: 6, kind: input, shape index: {}]   ;;  %s3679_s7 = inlined_call_operand.vmem [shape: f32[1,512], index: 7, kind: input, shape index: {}]   ;;  %s3680_s8 = inlined_call_operand.hbm [shape: bf16[128,256], index: 8, kind: input, shape index: {}]   ;;  %s3681_s9 = inlined_call_operand.vmem [shape: f32[1,256], index: 9, kind: input, shape index: {}]   ;;  %s3682_s10 = inlined_call_operand.hbm [shape: f32[8,256], index: 10, kind: output, shape index: {0}]   ;;  %s3683_s11 = inlined_call_operand.hbm [shape: f32[2,8,128], index: 11, kind: output, shape index: {1}, may-alias: {2,11}]   ;;  %s3684_s12 = inlined_call_operand.hbm [shape: f32[2,8,128], index: 12, kind: output, shape index: {2}, may-alias: {3,12}]  }
   0x1   :  { %3701 = sst [smem:[#allocation59_spill]] %s3674_s2  ;;  %s18_s23 = sshll.u32 %s3672_s0, 4  ;;  %s19_s23 = int_to_ptr.vmem [resolvable:$true] %s18_s23 }
   0x2   :  { %3702 = sst [smem:[#allocation60_spill]] %s3675_s3  ;;  %s2586_s24 = scalar_lea.vmem %s19_s23, 16 }
   0x3   :  { %3703 = sst [smem:[#allocation61_spill]] %s3676_s4  ;;  %p2587_p0 = scmp.ne.s32.totalorder %s19_s23, %s2586_s24 }
   0x4   :  { %3704 = sst [smem:[#allocation62_spill]] %s3678_s6  ;;  %p2591_p1 = scmp.lt.s32.totalorder %s19_s23, %s19_s23 }
   0x5   :  { %3705 = sst [smem:[#allocation63_spill]] %s3679_s7  ;;  %p2592_p2 = scmp.lt.s32.totalorder %s2586_s24, %s2586_s24 }
   0x6   :  { %3706 = sst [smem:[#allocation64_spill]] %s3682_s10 }
   0x7   :  { %3707 = sst [smem:[#allocation65_spill]] %s3683_s11  ;;  %p2593_p3 = por %p2592_p2, %p2591_p1 }
   0x8   :  { %3708 = sst [smem:[#allocation66_spill]] %s3684_s12 }
   0x9   :  { %p2594_p4 = pnand %p2593_p3, %p2587_p0 }
   0xb   :  { %2597 = shalt.err (!%p2594_p4)  }
   0xc   :  { %s3086_s25 = smov [#allocation7]  }
   0xd   :  { %21 = dma.vmem_to_smem %s19_s23, 16, %s3086_s25, [#allocation6] }
   0xe   :  { %3028 = dma.done.wait [#allocation6], 16 }
   0xf   :  { %3029 = vsyncadd [#allocation6], 4294967280 }
  0x10   :  { %23 = sfence }
  0x11   :  { %24 = vsyncpa [#allocation9], 0 }
  0x12   :  { %25 = vsyncpa [#allocation12], 0 }
  0x13   :  { %26 = vsyncpa [#allocation15], 0 }
  0x14   :  { %27 = vsyncpa [#allocation10], 0 }
  0x15   :  { %29 = vsyncpa [#allocation10 + $0x1], 0 }
  0x16   :  { %30 = vsyncpa [#allocation19], 0  ;;  %s3181_s0 = smov 0   ;;  %s3183_s26 = smov 0  }
  0x17   :  { %s3185_s27 = smov 0   ;;  %s3187_s28 = smov 0  }
  0x18 LB: > { %3709 = sst [smem:[#allocation54_spill]] %s3072_s0  ;;  %s3202_s29 = sadd.s32 4294967295, %s3084_s28   ;;  %s3084_s28 = sphi %s3187_s28, %s3759_s28   ;;  %s3080_s27 = sphi %s3185_s27, %s3763_s27   ;;  %s3076_s26 = sphi %s3183_s26, %s3762_s26   ;;  %s3072_s0 = sphi %s3181_s0, %s3761_s0  }
  0x19   : > { %s2014_s30 = sadd.s32 4294967294, %s3084_s28   ;;  %s3206_s13 = sadd.s32 1, %s3084_s28  }
  0x1a   : > { %3710 = sst [smem:[#allocation55_spill]] %s3206_s13  ;;  %s169_s14 = sadd.s32 1, %s3080_s27 }
  0x1b   : > { %s166_s15 = ssub.s32 %s3084_s28, %s3206_s13  ;;  %p176_p5 = scmp.ne.s32.totalorder %s3080_s27, %s3076_s26 }
  0x1c   : > { %p167_p6 = scmp.eq.s32.totalorder %s166_s15, 0  ;;  %p177_p7 = scmp.eq.s32.totalorder %s3084_s28, 0 }
  0x1d   : > { %p182_p8 = scmp.ne.s32.totalorder %s3076_s26, %s3072_s0  ;;  %p3691_p9 = scmp.eq.s32.totalorder %s3202_s29, 0 }
  0x1e   : > { %s3218_s16 = scalar_select %p167_p6, %s3080_s27, %s169_s14  }
  0x1f   : > { %p3220_p10 = por %p177_p7, %p176_p5  ;;  %p3226_p11 = por %p3691_p9, %p182_p8 }
  0x20   : > { %3711 = sst [smem:[#allocation56_spill]] %s3218_s16  ;;  %p3690_p12 = scmp.eq.s32.totalorder %s3202_s29, 1 }
  0x21   : > { %s3712_s17 = scalar_select %p3220_p10, 1, 0 }
  0x22   : > { %s3713_s18 = scalar_select %p3226_p11, 1, 0 }
  0x23   : > { %p238_p13 = scmp.eq.s32.totalorder %s2014_s30, 1  ;;  %p2015_p0 = scmp.ge.s32.totalorder %s3084_s28, 1 }
  0x24   : > { %p287_p1 = scmp.lt.s32.totalorder %s3084_s28, 3  ;;  %p3235_p2 = por %p3690_p12, %p176_p5 }
  0x25   : > { %p3239_p3 = por %p238_p13, %p182_p8  ;;  %s3087_s22 = smov [#allocation8]  }
  0x26   : > { %s3714_s19 = scalar_select %p3235_p2, 1, 0 }
  0x27   : > { %s3716_s20 = scalar_select %p3239_p3, 1, 0 }
  0x28   : > { %3715 = sst [smem:[#allocation57_spill]] %s3714_s19  ;;  %p3243_p4 = pnand %p2015_p0, %p287_p1 }
  0x29   : > { %3717 = sst [smem:[#allocation58_spill]] %s3716_s20  ;;  %s299_s23 = sshll.u32 %s3087_s22, 4  ;;  %s300_s23 = int_to_ptr.vmem [resolvable:$true] %s299_s23 }
  0x2a   : > { %s3718_s21 = scalar_select %p3243_p4, 1, 0 }
  0x2b   : > { %p2262_p7 = pneg %p3243_p4  ;;  %s3088_s25 = smov [#allocation11]  }
  0x2c   : > { %s312_s30 = sshll.u32 %s3088_s25, 4  ;;  %s3720_s2 = sld [smem:[#allocation59_spill]]  ;;  %s313_s30 = int_to_ptr.vmem [resolvable:$true] %s312_s30 }
  0x2d   : > { %p3252_p5 = pnand %p2262_p7, %p3691_p9 }
  0x2f   : > { %p3266_p1 = pneg %p3252_p5 }
  0x32   : > { %s2598_s16 = scalar_lea.hbm %s3720_s2, 256 }
  0x33   : > { %p2599_p0 = scmp.ne.s32.totalorder %s3720_s2, %s2598_s16  ;;  %p2605_p12 = scmp.lt.u32.totalorder %s2598_s16, %s3720_s2 }
  0x35   : > { %p2601_p7 = pnand %p3266_p1, %p2599_p0 }
  0x37   : > { %p2602_p8 = pneg %p2601_p7 }
  0x39   : > { %p2607_p6 = pnand %p2605_p12, %p2602_p8 }
  0x3b   : > { %2610 = shalt.err (!%p2607_p6)
}
  0x3c   : > { %s2611_s25 = scalar_lea.vmem %s300_s23, 256  ;;  %p2619_p2 = scmp.lt.s32.totalorder %s300_s23, %s300_s23 }
  0x3d   : > { %p2612_p9 = scmp.ne.s32.totalorder %s300_s23, %s2611_s25  ;;  %p2620_p11 = scmp.lt.s32.totalorder %s2611_s25, %s2611_s25 }
  0x3f   : > { %p2614_p13 = pnand %p2612_p9, %p3266_p1  ;;  %p2621_p4 = por %p2620_p11, %p2619_p2 }
  0x41   : > { %p2615_p3 = pneg %p2614_p13 }
  0x43   : > { %p2622_p10 = pnand %p2621_p4, %p2615_p3 }
  0x45   : > { %2625 = shalt.err (!%p2622_p10)
}
  0x46   : > { %s3700_s13 = smov 128   ;;  %s3090_s10 = smov 8  }
  0x47   : > { %2265 = dma.hbm_to_vmem [thread:$0]  (!%p3252_p5), %s3720_s2, 256, %s300_s23, [#allocation9], %s3700_s13, %s3700_s13, %s3090_s10  }
  0x48   : > { %p3722_p9 = scmp.ne.s32.totalorder %s3712_s17, 0  ;;  %p3723_p12 = scmp.lt.s32.totalorder %s3084_s28, 2 }
  0x49   : > { %s3725_s3 = sld [smem:[#allocation60_spill]] }
  0x4a   : > { %p3288_p6 = pnand %p3723_p12, %p3722_p9 }
  0x4c   : > { %s3724_s20 = scalar_select %p3288_p6, 1, 0 }
  0x4f   : > { %s2626_s25 = scalar_lea.hbm %s3725_s3, 256 }
  0x50   : > { %p2627_p10 = scmp.ne.s32.totalorder %s3725_s3, %s2626_s25  ;;  %p2633_p3 = scmp.lt.u32.totalorder %s2626_s25, %s3725_s3 }
  0x52   : > { %p2629_p11 = pnand %p2627_p10, %p3266_p1 }
  0x54   : > { %p2630_p2 = pneg %p2629_p11 }
  0x56   : > { %p2635_p4 = pnand %p2633_p3, %p2630_p2 }
  0x58   : > { %2638 = shalt.err (!%p2635_p4)
}
  0x59   : > { %s2639_s17 = scalar_lea.vmem %s313_s30, 256  ;;  %p2647_p7 = scmp.lt.s32.totalorder %s313_s30, %s313_s30 }
  0x5a   : > { %p2640_p8 = scmp.ne.s32.totalorder %s313_s30, %s2639_s17  ;;  %p2648_p9 = scmp.lt.s32.totalorder %s2639_s17, %s2639_s17 }
  0x5c   : > { %p2642_p13 = pnand %p2640_p8, %p3266_p1  ;;  %p2649_p12 = por %p2648_p9, %p2647_p7 }
  0x5e   : > { %p2643_p0 = pneg %p2642_p13 }
  0x60   : > { %p2650_p6 = pnand %p2649_p12, %p2643_p0 }
  0x62   : > { %2653 = shalt.err (!%p2650_p6)
}
  0x63   : > { %2268 = dma.hbm_to_vmem [thread:$0]  (!%p3252_p5), %s3725_s3, 256, %s313_s30, [#allocation12], %s3700_s13, %s3700_s13, %s3090_s10  }
  0x64   : > { %s3091_s16 = smov [#allocation13]   ;;  %s3726_s4 = sld [smem:[#allocation61_spill]] }
  0x65   : > { %s325_s14 = sshll.u32 %s3091_s16, 4  ;;  %s326_s14 = int_to_ptr.vmem [resolvable:$true] %s325_s14 }
  0x6a   : > { %s2654_s0 = scalar_lea.hbm %s3726_s4, 8192 }
  0x6b   : > { %p2655_p6 = scmp.ne.s32.totalorder %s3726_s4, %s2654_s0  ;;  %p2661_p2 = scmp.lt.u32.totalorder %s2654_s0, %s3726_s4 }
  0x6d   : > { %p2657_p10 = pnand %p2655_p6, %p3266_p1 }
  0x6f   : > { %p2658_p11 = pneg %p2657_p10 }
  0x71   : > { %p2663_p3 = pnand %p2661_p2, %p2658_p11 }
  0x73   : > { %2666 = shalt.err (!%p2663_p3)
}
  0x74   : > { %s2667_s30 = scalar_lea.vmem %s326_s14, 8192  ;;  %p2675_p0 = scmp.lt.s32.totalorder %s326_s14, %s326_s14 }
  0x75   : > { %p2668_p4 = scmp.ne.s32.totalorder %s326_s14, %s2667_s30  ;;  %p2676_p7 = scmp.lt.s32.totalorder %s2667_s30, %s2667_s30 }
  0x77   : > { %p2670_p8 = pnand %p2668_p4, %p3266_p1  ;;  %p2677_p9 = por %p2676_p7, %p2675_p0 }
  0x79   : > { %p2671_p13 = pneg %p2670_p8 }
  0x7b   : > { %p2678_p12 = pnand %p2677_p9, %p2671_p13 }
  0x7d   : > { %2681 = shalt.err (!%p2678_p12)
}
  0x7e   : > { %s3092_s10 = smov 256   ;;  %s3093_s2 = smov 16  }
  0x7f   : > { %2271 = dma.hbm_to_vmem [thread:$0]  (!%p3252_p5), %s3726_s4, 8192, %s326_s14, [#allocation12], %s3092_s10, %s3092_s10, %s3093_s2  }
  0x80   : > { %s358_s19 = sand.u32 1, %s3084_s28   ;;  %s3094_s16 = smov [#allocation14]  }
  0x81   : > { %s341_s15 = sshll.u32 %s3094_s16, 4  ;;  %s360_s25 = sand.u32 1, %s3080_s27   ;;  %s342_s15 = int_to_ptr.vmem [resolvable:$true] %s341_s15 }
  0x82   : > { %s3727_s6 = sld [smem:[#allocation62_spill]] }
  0x88   : > { %s2682_s17 = scalar_lea.hbm %s3727_s6, 8192 }
  0x89   : > { %p2683_p6 = scmp.ne.s32.totalorder %s3727_s6, %s2682_s17  ;;  %p2689_p2 = scmp.lt.u32.totalorder %s2682_s17, %s3727_s6 }
  0x8b   : > { %p2685_p10 = pnand %p2683_p6, %p3266_p1 }
  0x8d   : > { %p2686_p11 = pneg %p2685_p10 }
  0x8f   : > { %p2691_p3 = pnand %p2689_p2, %p2686_p11 }
  0x91   : > { %2694 = shalt.err (!%p2691_p3)
}
  0x92   : > { %s2695_s14 = scalar_lea.vmem %s342_s15, 8192  ;;  %p2703_p0 = scmp.lt.s32.totalorder %s342_s15, %s342_s15 }
  0x93   : > { %p2696_p4 = scmp.ne.s32.totalorder %s342_s15, %s2695_s14  ;;  %p2704_p7 = scmp.lt.s32.totalorder %s2695_s14, %s2695_s14 }
  0x95   : > { %p2698_p8 = pnand %p2696_p4, %p3266_p1  ;;  %p2705_p9 = por %p2704_p7, %p2703_p0 }
  0x97   : > { %p2699_p13 = pneg %p2698_p8 }
  0x99   : > { %p2706_p12 = pnand %p2705_p9, %p2699_p13 }
  0x9b   : > { %2709 = shalt.err (!%p2706_p12)
}
  0x9c   : > { %2274 = dma.hbm_to_vmem [thread:$0]  (!%p3252_p5), %s3727_s6, 8192, %s342_s15, [#allocation15], %s3092_s10, %s3092_s10, %s3093_s2  }
  0x9d   : > { %s2021_s3 = sshll.u32 %s360_s25, 6  ;;  %s2022_s7 = sshll.u32 %s3084_s28, 6 }
  0x9e   : > { %s3354_s16 = scalar_lea.hbm %s3680_s8, %s2022_s7  ;;  %s362_s0 = scalar_lea.vmem [#allocation16], %s2021_s3 }
  0x9f   : > { %s368_s24 = sshll.u32 %s362_s0, 4  ;;  %s3358_s23 = scalar_lea.sflag [#allocation9], %s358_s19  ;;  %s3356_s24 = int_to_ptr.vmem [resolvable:$true] %s368_s24 }
  0xa0   : > { %s2710_s17 = scalar_lea.hbm %s3354_s16, 1024  ;;  %p3728_p5 = scmp.ne.s32.totalorder %s3724_s20, 0 }
  0xa1   : > { %p2711_p1 = scmp.ne.s32.totalorder %s3354_s16, %s2710_s17  ;;  %s2715_s15 = scalar_lea.hbm %s3680_s8, 2048 }
  0xa2   : > { %p2712_p6 = pneg %p3728_p5  ;;  %p2716_p2 = scmp.lt.u32.totalorder %s3354_s16, %s3680_s8 }
  0xa3   : > { %p2717_p3 = scmp.lt.u32.totalorder %s2715_s15, %s2710_s17  ;;  %p2719_p8 = scmp.lt.u32.totalorder %s2710_s17, %s3354_s16 }
  0xa4   : > { %p2713_p10 = pnand %p2712_p6, %p2711_p1 }
  0xa5   : > { %p2718_p4 = por %p2717_p3, %p2716_p2 }
  0xa6   : > { %p2714_p11 = pneg %p2713_p10 }
  0xa7   : > { %p2720_p13 = por %p2719_p8, %p2718_p4 }
  0xa9   : > { %p2721_p0 = pnand %p2720_p13, %p2714_p11 }
  0xab   : > { %2724 = shalt.err (!%p2721_p0)
}
  0xac   : > { %s2725_s19 = scalar_lea.vmem %s3356_s24, 1024  ;;  %s3095_s14 = smov [#allocation16]  }
  0xad   : > { %p2726_p7 = scmp.ne.s32.totalorder %s3356_s24, %s2725_s19  ;;  %s2730_s13 = sshll.u32 %s3095_s14, 4  ;;  %s2731_s13 = int_to_ptr.vmem [resolvable:$false] %s2730_s13 }
  0xae   : > { %s2732_s11 = scalar_lea.vmem %s2731_s13, 2048  ;;  %p2733_p1 = scmp.lt.s32.totalorder %s3356_s24, %s2731_s13 }
  0xaf   : > { %p2728_p9 = pnand %p2726_p7, %p2712_p6  ;;  %p2734_p10 = scmp.lt.s32.totalorder %s2732_s11, %s2725_s19 }
  0xb1   : > { %p2729_p12 = pneg %p2728_p9  ;;  %p2735_p2 = por %p2734_p10, %p2733_p1 }
  0xb3   : > { %p2736_p3 = pnand %p2735_p2, %p2729_p12 }
  0xb5   : > { %2739 = shalt.err (!%p2736_p3)
}
  0xb6   : > { %s3096_s3 = smov 64   ;;  %s3097_s7 = smov 4  }
  0xb7   : > { %s3729_s12 = smov 128   ;;  %p3730_p6 = scmp.ne.s32.totalorder %s3718_s21, 0 }
  0xb8   : > { %2278 = dma.hbm_to_vmem [thread:$0]  (!%p3728_p5), %s3354_s16, 1024, %s3356_s24, %s3358_s23, %s3729_s12, %s3096_s3, %s3097_s7  }
  0xb9   : > { %386 = sbr.rel (%p3730_p6) target bundleno = 1251 (0x4e3), region = 52  ;;  %p3731_p11 = scmp.eq.s32.totalorder (!%p3730_p6), %s3202_s29, 0 }
  0xc0   : > { %3031 = dma.done.wait (%p3731_p11), [#allocation9], 256   ;;  %p3732_p4 = pmov %p3731_p11 }
  0xc2   : > { %3033 = vsyncadd (%p3732_p4), [#allocation9], 4294967040  ;;  %p3733_p8 = pmov %p3732_p4 }
  0xc3   : > { %p3734_p13 = pmov %p3732_p4 }
  0xc4   : > { %3035 = dma.done.wait (%p3733_p8), [#allocation12], 8448  }
  0xc5   : > { %3037 = vsyncadd (%p3734_p13), [#allocation12], 4294958848  ;;  %p3735_p0 = pmov %p3732_p4 }
  0xc7   : > { %3039 = dma.done.wait (%p3735_p0), [#allocation15], 8192   ;;  %p3736_p5 = pmov %p3735_p0 }
  0xc8   : > { %s404_s21 = sand.u32 1, %s3202_s29   ;;  %s3403_s20 = sand.u32 1, %s3076_s26  }
  0xc9   : > { %3041 = vsyncadd (%p3736_p5), [#allocation15], 4294959104  ;;  %s2028_s22 = sshll.u32 %s3403_s20, 6  ;;  %s405_s16 = scalar_lea.sflag [#allocation9], %s404_s21 }
  0xca   : > { %s3406_s0 = scalar_lea.vmem [#allocation16], %s2028_s22  ;;  %p3737_p7 = scmp.ne.s32.totalorder %s3713_s18, 0 }
  0xcc   : > { %3043 = dma.done.wait (%p3737_p7), %s405_s16, 1024  }
  0xcd   : > { %3045 = vsyncadd (%p3737_p7), %s405_s16, 4294966272  ;;  %s2029_s24 = sshll.u32 %s3403_s20, 3  ;;  %p448_p9 = scmp.lt.s32.totalorder %s3202_s29, 1 }
  0xce   : > { %s3421_s15 = scalar_lea.vmem [#allocation17], %s2029_s24  ;;  %p3738_p12 = scmp.ne.s32.totalorder %s3202_s29, 0 }
  0xcf   : > { %s3415_s23 = scalar_select %p448_p9, %s3202_s29, 1 }
  0xd0   : > { %455 = sbr.rel (%p3738_p12) target bundleno = 985 (0x3d9), region = 76  ;;  %s456_s25 = sld [smem:[#allocation7]] (!%p3738_p12) }
  0xd1   : > { %s3098_s18 = smov (!%p3738_p12), [#allocation4]   ;;  %s3425_s19 = sld [smem:[#allocation7 + $0x1]] (!%p3738_p12) }
  0xd2   : > { %s473_s30 = sshll.u32 (!%p3738_p12), %s3098_s18, 4  ;;  %s3099_s14 = smov (!%p3738_p12), [#allocation4 + $0x1]   ;;  %s3427_s30 = int_to_ptr.vmem [resolvable:$true] %s473_s30 }
  0xd3   : > { %s488_s13 = sshll.u32 (!%p3738_p12), %s3099_s14, 4  ;;  %s3429_s11 = sld [smem:[#allocation7 + $0x2]] (!%p3738_p12)  ;;  %s3431_s13 = int_to_ptr.vmem [resolvable:$true] %s488_s13 }
  0xd4   : > { %s3100_s3 = smov (!%p3738_p12), [#allocation4 + $0x2]   ;;  %s3433_s12 = sld [smem:[#allocation7 + $0x3]] (!%p3738_p12) }
  0xd5   : > { %s503_s7 = sshll.u32 (!%p3738_p12), %s3100_s3, 4  ;;  %s3444_s2 = scalar_lea.hbm (!%p3738_p12), %s3673_s1, 4096  ;;  %s3435_s7 = int_to_ptr.vmem [resolvable:$true] %s503_s7 }
  0xd6   : > { %s2038_s21 = sshll.u32 (!%p3738_p12), %s456_s25, 4 }
  0xd7   : > { %s465_s24 = scalar_lea.hbm %s3673_s1, %s2038_s21  ;;  %s2039_s17 = sshll.u32 %s3425_s19, 4 }
  0xd8   : > { %s2740_s10 = scalar_lea.hbm %s465_s24, 16  ;;  %p2743_p10 = scmp.lt.u32.totalorder %s465_s24, %s3673_s1 }
  0xd9   : > { %p2741_p1 = scmp.ne.s32.totalorder %s465_s24, %s2740_s10  ;;  %p2744_p2 = scmp.lt.u32.totalorder %s3444_s2, %s2740_s10 }
  0xda   : > { %p2746_p6 = scmp.lt.u32.totalorder %s2740_s10, %s465_s24 }
  0xdb   : > { %p2745_p3 = por %p2744_p2, %p2743_p10 }
  0xdd   : > { %p2747_p11 = por %p2746_p6, %p2745_p3 }
  0xdf   : > { %p2748_p4 = pnand %p2747_p11, %p2741_p1 }
  0xe1   : > { %2751 = shalt.err (!%p2748_p4)  }
  0xe2   : > { %s2752_s25 = scalar_lea.vmem %s3427_s30, 16  ;;  %s3453_s19 = scalar_lea.vmem %s3427_s30, 128 }
  0xe3   : > { %p2753_p8 = scmp.ne.s32.totalorder %s3427_s30, %s2752_s25  ;;  %p2757_p13 = scmp.lt.s32.totalorder %s3427_s30, %s3427_s30 }
  0xe4   : > { %p2758_p0 = scmp.lt.s32.totalorder %s3453_s19, %s2752_s25 }
  0xe6   : > { %p2759_p5 = por %p2758_p0, %p2757_p13 }
  0xe8   : > { %p2760_p7 = pnand %p2759_p5, %p2753_p8 }
  0xea   : > { %2763 = shalt.err (!%p2760_p7)  }
  0xeb   : > { %476 = dma.hbm_to_vmem [thread:$0]  %s465_s24, 16, %s3427_s30, [#allocation5] }
  0xec   : > { %s478_s3 = scalar_lea.hbm %s3673_s1, %s2039_s17  ;;  %s2040_s21 = sshll.u32 %s3429_s11, 4 }
  0xed   : > { %s2764_s22 = scalar_lea.hbm %s478_s3, 16  ;;  %p2767_p12 = scmp.lt.u32.totalorder %s478_s3, %s3673_s1 }
  0xee   : > { %p2765_p9 = scmp.ne.s32.totalorder %s478_s3, %s2764_s22  ;;  %p2768_p1 = scmp.lt.u32.totalorder %s3444_s2, %s2764_s22 }
  0xef   : > { %p2770_p2 = scmp.lt.u32.totalorder %s2764_s22, %s478_s3 }
  0xf0   : > { %p2769_p10 = por %p2768_p1, %p2767_p12 }
  0xf2   : > { %p2771_p3 = por %p2770_p2, %p2769_p10 }
  0xf4   : > { %p2772_p6 = pnand %p2771_p3, %p2765_p9 }
  0xf6   : > { %2775 = shalt.err (!%p2772_p6)  }
  0xf7   : > { %s2776_s24 = scalar_lea.vmem %s3431_s13, 16  ;;  %p2781_p4 = scmp.lt.s32.totalorder %s3431_s13, %s3427_s30 }
  0xf8   : > { %p2777_p11 = scmp.ne.s32.totalorder %s3431_s13, %s2776_s24  ;;  %p2782_p8 = scmp.lt.s32.totalorder %s3453_s19, %s2776_s24 }
  0xfa   : > { %p2783_p13 = por %p2782_p8, %p2781_p4 }
  0xfc   : > { %p2784_p0 = pnand %p2783_p13, %p2777_p11 }
  0xfe   : > { %2787 = shalt.err (!%p2784_p0)  }
  0xff   : > { %491 = dma.hbm_to_vmem [thread:$0]  %s478_s3, 16, %s3431_s13, [#allocation5 + $0x1] }
 0x100   : > { %s493_s18 = scalar_lea.hbm %s3673_s1, %s2040_s21  ;;  %s2041_s14 = sshll.u32 %s3433_s12, 4 }
 0x101   : > { %s2788_s25 = scalar_lea.hbm %s493_s18, 16  ;;  %p2791_p7 = scmp.lt.u32.totalorder %s493_s18, %s3673_s1 }
 0x102   : > { %p2789_p5 = scmp.ne.s32.totalorder %s493_s18, %s2788_s25  ;;  %p2792_p9 = scmp.lt.u32.totalorder %s3444_s2, %s2788_s25 }
 0x103   : > { %p2794_p1 = scmp.lt.u32.totalorder %s2788_s25, %s493_s18 }
 0x104   : > { %p2793_p12 = por %p2792_p9, %p2791_p7 }
 0x106   : > { %p2795_p10 = por %p2794_p1, %p2793_p12 }
 0x108   : > { %p2796_p2 = pnand %p2795_p10, %p2789_p5 }
 0x10a   : > { %2799 = shalt.err (!%p2796_p2)  }
 0x10b   : > { %s2800_s13 = scalar_lea.vmem %s3435_s7, 16  ;;  %p2805_p6 = scmp.lt.s32.totalorder %s3435_s7, %s3427_s30 }
 0x10c   : > { %p2801_p3 = scmp.ne.s32.totalorder %s3435_s7, %s2800_s13  ;;  %p2806_p11 = scmp.lt.s32.totalorder %s3453_s19, %s2800_s13 }
 0x10e   : > { %p2807_p4 = por %p2806_p11, %p2805_p6 }
 0x110   : > { %p2808_p8 = pnand %p2807_p4, %p2801_p3 }
 0x112   : > { %2811 = shalt.err (!%p2808_p8)  }
 0x113   : > { %506 = dma.hbm_to_vmem [thread:$0]  %s493_s18, 16, %s3435_s7, [#allocation5 + $0x2] }
 0x114   : > { %s508_s21 = scalar_lea.hbm %s3673_s1, %s2041_s14  ;;  %s3101_s22 = smov [#allocation4 + $0x3]  }
 0x115   : > { %s518_s16 = sshll.u32 %s3101_s22, 4  ;;  %s3490_s10 = sld [smem:[#allocation7 + $0x4]]  ;;  %s519_s16 = int_to_ptr.vmem [resolvable:$true] %s518_s16 }
 0x116   : > { %s2812_s24 = scalar_lea.hbm %s508_s21, 16  ;;  %p2815_p0 = scmp.lt.u32.totalorder %s508_s21, %s3673_s1 }
 0x117   : > { %p2813_p13 = scmp.ne.s32.totalorder %s508_s21, %s2812_s24  ;;  %p2816_p5 = scmp.lt.u32.totalorder %s3444_s2, %s2812_s24 }
 0x118   : > { %p2818_p9 = scmp.lt.u32.totalorder %s2812_s24, %s508_s21 }
 0x119   : > { %p2817_p7 = por %p2816_p5, %p2815_p0 }
 0x11b   : > { %p2819_p12 = por %p2818_p9, %p2817_p7 }
 0x11d   : > { %p2820_p1 = pnand %p2819_p12, %p2813_p13 }
 0x11f   : > { %2823 = shalt.err (!%p2820_p1)  }
 0x120   : > { %s2824_s7 = scalar_lea.vmem %s519_s16, 16  ;;  %p2829_p2 = scmp.lt.s32.totalorder %s519_s16, %s3427_s30 }
 0x121   : > { %p2825_p10 = scmp.ne.s32.totalorder %s519_s16, %s2824_s7  ;;  %p2830_p3 = scmp.lt.s32.totalorder %s3453_s19, %s2824_s7 }
 0x123   : > { %p2831_p6 = por %p2830_p3, %p2829_p2 }
 0x125   : > { %p2832_p11 = pnand %p2831_p6, %p2825_p10 }
 0x127   : > { %2835 = shalt.err (!%p2832_p11)  }
 0x128   : > { %521 = dma.hbm_to_vmem [thread:$0]  %s508_s21, 16, %s519_s16, [#allocation5 + $0x3] }
 0x129   : > { %s3102_s18 = smov [#allocation4 + $0x4]   ;;  %s3498_s25 = sld [smem:[#allocation7 + $0x5]] }
 0x12a   : > { %s533_s14 = sshll.u32 %s3102_s18, 4  ;;  %s3103_s4 = smov [#allocation4 + $0x5]   ;;  %s534_s14 = int_to_ptr.vmem [resolvable:$true] %s533_s14 }
 0x12b   : > { %s548_s6 = sshll.u32 %s3103_s4, 4  ;;  %s3500_s13 = sld [smem:[#allocation7 + $0x6]]  ;;  %s3503_s6 = int_to_ptr.vmem [resolvable:$true] %s548_s6 }
 0x12c   : > { %s2042_s12 = sshll.u32 %s3490_s10, 4 }
 0x12d   : > { %s523_s24 = scalar_lea.hbm %s3673_s1, %s2042_s12 }
 0x12e   : > { %s2836_s11 = scalar_lea.hbm %s523_s24, 16  ;;  %p2839_p8 = scmp.lt.u32.totalorder %s523_s24, %s3673_s1 }
 0x12f   : > { %p2837_p4 = scmp.ne.s32.totalorder %s523_s24, %s2836_s11  ;;  %p2840_p13 = scmp.lt.u32.totalorder %s3444_s2, %s2836_s11 }
 0x130   : > { %p2842_p5 = scmp.lt.u32.totalorder %s2836_s11, %s523_s24 }
 0x131   : > { %p2841_p0 = por %p2840_p13, %p2839_p8 }
 0x133   : > { %p2843_p7 = por %p2842_p5, %p2841_p0 }
 0x135   : > { %p2844_p9 = pnand %p2843_p7, %p2837_p4 }
 0x137   : > { %2847 = shalt.err (!%p2844_p9)  }
 0x138   : > { %s2848_s17 = scalar_lea.vmem %s534_s14, 16  ;;  %p2853_p1 = scmp.lt.s32.totalorder %s534_s14, %s3427_s30 }
 0x139   : > { %p2849_p12 = scmp.ne.s32.totalorder %s534_s14, %s2848_s17  ;;  %p2854_p10 = scmp.lt.s32.totalorder %s3453_s19, %s2848_s17 }
 0x13b   : > { %p2855_p2 = por %p2854_p10, %p2853_p1 }
 0x13d   : > { %p2856_p3 = pnand %p2855_p2, %p2849_p12 }
 0x13f   : > { %2859 = shalt.err (!%p2856_p3)  }
 0x140   : > { %536 = dma.hbm_to_vmem [thread:$0]  %s523_s24, 16, %s534_s14, [#allocation5 + $0x4] }
 0x141   : > { %s2043_s10 = sshll.u32 %s3498_s25, 4  ;;  %s3104_s7 = smov [#allocation4 + $0x6]  }
 0x142   : > { %s563_s18 = sshll.u32 %s3104_s7, 4  ;;  %s538_s3 = scalar_lea.hbm %s3673_s1, %s2043_s10  ;;  %s3518_s18 = int_to_ptr.vmem [resolvable:$true] %s563_s18 }
 0x143   : > { %s2860_s22 = scalar_lea.hbm %s538_s3, 16  ;;  %p2863_p11 = scmp.lt.u32.totalorder %s538_s3, %s3673_s1 }
 0x144   : > { %p2861_p6 = scmp.ne.s32.totalorder %s538_s3, %s2860_s22  ;;  %p2864_p4 = scmp.lt.u32.totalorder %s3444_s2, %s2860_s22 }
 0x145   : > { %p2866_p13 = scmp.lt.u32.totalorder %s2860_s22, %s538_s3 }
 0x146   : > { %p2865_p8 = por %p2864_p4, %p2863_p11 }
 0x148   : > { %p2867_p0 = por %p2866_p13, %p2865_p8 }
 0x14a   : > { %p2868_p5 = pnand %p2867_p0, %p2861_p6 }
 0x14c   : > { %2871 = shalt.err (!%p2868_p5)  }
 0x14d   : > { %s2872_s14 = scalar_lea.vmem %s3503_s6, 16  ;;  %p2877_p9 = scmp.lt.s32.totalorder %s3503_s6, %s3427_s30 }
 0x14e   : > { %p2873_p7 = scmp.ne.s32.totalorder %s3503_s6, %s2872_s14  ;;  %p2878_p12 = scmp.lt.s32.totalorder %s3453_s19, %s2872_s14 }
 0x150   : > { %p2879_p1 = por %p2878_p12, %p2877_p9 }
 0x152   : > { %p2880_p10 = pnand %p2879_p1, %p2873_p7 }
 0x154   : > { %2883 = shalt.err (!%p2880_p10)  }
 0x155   : > { %551 = dma.hbm_to_vmem [thread:$0]  %s538_s3, 16, %s3503_s6, [#allocation5 + $0x5] }
 0x156   : > { %s2044_s25 = sshll.u32 %s3500_s13, 4  ;;  %s2037_s24 = sld [smem:[#allocation7 + $0x7]] }
 0x157   : > { %s553_s10 = scalar_lea.hbm %s3673_s1, %s2044_s25 }
 0x158   : > { %s2884_s7 = scalar_lea.hbm %s553_s10, 16  ;;  %p2887_p3 = scmp.lt.u32.totalorder %s553_s10, %s3673_s1 }
 0x159   : > { %p2885_p2 = scmp.ne.s32.totalorder %s553_s10, %s2884_s7  ;;  %p2888_p6 = scmp.lt.u32.totalorder %s3444_s2, %s2884_s7 }
 0x15a   : > { %p2890_p4 = scmp.lt.u32.totalorder %s2884_s7, %s553_s10 }
 0x15b   : > { %p2889_p11 = por %p2888_p6, %p2887_p3 }
 0x15d   : > { %p2891_p8 = por %p2890_p4, %p2889_p11 }
 0x15f   : > { %p2892_p13 = pnand %p2891_p8, %p2885_p2 }
 0x161   : > { %2895 = shalt.err (!%p2892_p13)  }
 0x162   : > { %s2896_s6 = scalar_lea.vmem %s3518_s18, 16  ;;  %p2901_p5 = scmp.lt.s32.totalorder %s3518_s18, %s3427_s30 }
 0x163   : > { %p2897_p0 = scmp.ne.s32.totalorder %s3518_s18, %s2896_s6  ;;  %p2902_p7 = scmp.lt.s32.totalorder %s3453_s19, %s2896_s6 }
 0x165   : > { %p2903_p9 = por %p2902_p7, %p2901_p5 }
 0x167   : > { %p2904_p12 = pnand %p2903_p9, %p2897_p0 }
 0x169   : > { %2907 = shalt.err (!%p2904_p12)  }
 0x16a   : > { %566 = dma.hbm_to_vmem [thread:$0]  %s553_s10, 16, %s3518_s18, [#allocation5 + $0x6] }
 0x16b   : > { %s3105_s13 = smov [#allocation4 + $0x7]   ;;  %s2045_s22 = sshll.u32 %s2037_s24, 4 }
 0x16c   : > { %s578_s3 = sshll.u32 %s3105_s13, 4  ;;  %s568_s14 = scalar_lea.hbm %s3673_s1, %s2045_s22  ;;  %s579_s3 = int_to_ptr.vmem [resolvable:$true] %s578_s3 }
 0x16d   : > { %s2908_s25 = scalar_lea.hbm %s568_s14, 16  ;;  %p2911_p10 = scmp.lt.u32.totalorder %s568_s14, %s3673_s1 }
 0x16e   : > { %p2909_p1 = scmp.ne.s32.totalorder %s568_s14, %s2908_s25  ;;  %p2912_p2 = scmp.lt.u32.totalorder %s3444_s2, %s2908_s25 }
 0x16f   : > { %p2914_p6 = scmp.lt.u32.totalorder %s2908_s25, %s568_s14 }
 0x170   : > { %p2913_p3 = por %p2912_p2, %p2911_p10 }
 0x172   : > { %p2915_p11 = por %p2914_p6, %p2913_p3 }
 0x174   : > { %p2916_p4 = pnand %p2915_p11, %p2909_p1 }
 0x176   : > { %2919 = shalt.err (!%p2916_p4)  }
 0x177   : > { %s2920_s18 = scalar_lea.vmem %s579_s3, 16  ;;  %p2925_p13 = scmp.lt.s32.totalorder %s579_s3, %s3427_s30 }
 0x178   : > { %p2921_p8 = scmp.ne.s32.totalorder %s579_s3, %s2920_s18  ;;  %p2926_p0 = scmp.lt.s32.totalorder %s3453_s19, %s2920_s18 }
 0x17a   : > { %p2927_p5 = por %p2926_p0, %p2925_p13 }
 0x17c   : > { %p2928_p7 = pnand %p2927_p5, %p2921_p8 }
 0x17e   : > { %2931 = shalt.err (!%p2928_p7)  }
 0x17f   : > { %581 = dma.hbm_to_vmem [thread:$0]  %s568_s14, 16, %s579_s3, [#allocation5 + $0x7] }
 0x180   : > { %3046 = dma.done.wait [#allocation5], 16 }
 0x181   : > { %3047 = vsyncadd [#allocation5], 4294967280 }
 0x182   : > { %3048 = dma.done.wait [#allocation5 + $0x1], 16 }
 0x183   : > { %3049 = vsyncadd [#allocation5 + $0x1], 4294967280 }
 0x184   : > { %3050 = dma.done.wait [#allocation5 + $0x2], 16 }
 0x185   : > { %3051 = vsyncadd [#allocation5 + $0x2], 4294967280 }
 0x186   : > { %3052 = dma.done.wait [#allocation5 + $0x3], 16 }
 0x187   : > { %3053 = vsyncadd [#allocation5 + $0x3], 4294967280 }
 0x188   : > { %3054 = dma.done.wait [#allocation5 + $0x4], 16 }
 0x189   : > { %3055 = vsyncadd [#allocation5 + $0x4], 4294967280 }
 0x18a   : > { %3056 = dma.done.wait [#allocation5 + $0x5], 16 }
 0x18b   : > { %3057 = vsyncadd [#allocation5 + $0x5], 4294967280 }
 0x18c   : > { %3058 = dma.done.wait [#allocation5 + $0x6], 16 }
 0x18d   : > { %3059 = vsyncadd [#allocation5 + $0x6], 4294967280 }
 0x18e   : > { %3060 = dma.done.wait [#allocation5 + $0x7], 16 }
 0x18f   : > { %3061 = vsyncadd [#allocation5 + $0x7], 4294967280  ;;  %v2354_v0 = vld [vmem:[#allocation13 + $0x4] ss:$16 sps:$4 sm:$0xff]   ;;  %v2356_v1 = vld [vmem:[#allocation13] ss:$16 sps:$4 sm:$0xff]  }
 0x190   : > { %1013 = vmatprep.subr.bf16.mxu0 %v2354_v0  ;;  %v2357_v2 = vld [vmem:[#allocation13 + $0x24] ss:$16 sps:$4 sm:$0xff]   ;;  %v2359_v3 = vld [vmem:[#allocation13 + $0x20] ss:$16 sps:$4 sm:$0xff]   ;;  %v2365_v5 = vld [vmem:[#allocation13 + $0xc] ss:$16 sps:$4 sm:$0xff]  }
 0x191   : > { %1014 = vmatpush1.bf16.msra.mxu0 %v2356_v1  ;;  %v2360_v4 = vld [vmem:[#allocation13 + $0x44] ss:$16 sps:$4 sm:$0xff]   ;;  %v2368_v6 = vld [vmem:[#allocation13 + $0x8] ss:$16 sps:$4 sm:$0xff]   ;;  %v2362_v7 = vld [vmem:[#allocation13 + $0x40] ss:$16 sps:$4 sm:$0xff]   ;;  %1054 = vmatprep.subr.bf16.mxu1 %v2365_v5 }
 0x192   : > { %1015 = vmatprep.subr.bf16.mxu0 %v2357_v2  ;;  %v2363_v8 = vld [vmem:[#allocation13 + $0x64] ss:$16 sps:$4 sm:$0xff]   ;;  %1055 = vmatpush1.bf16.msra.mxu1 %v2368_v6  ;;  %v2371_v9 = vld [vmem:[#allocation13 + $0x2c] ss:$16 sps:$4 sm:$0xff]   ;;  %v2374_v10 = vld [vmem:[#allocation13 + $0x28] ss:$16 sps:$4 sm:$0xff]  }
 0x193   : > { %1056 = vmatprep.subr.bf16.mxu1 %v2371_v9  ;;  %v2367_v11 = vld [vmem:[#allocation13 + $0x60] ss:$16 sps:$4 sm:$0xff]   ;;  %v2369_v12 = vld [vmem:[#allocation13 + $0x84] ss:$16 sps:$4 sm:$0xff]   ;;  %v2377_v13 = vld [vmem:[#allocation13 + $0x4c] ss:$16 sps:$4 sm:$0xff]  }
 0x194   : > { %v2380_v14 = vld [vmem:[#allocation13 + $0x48] ss:$16 sps:$4 sm:$0xff]   ;;  %v2383_v15 = vld [vmem:[#allocation13 + $0x6c] ss:$16 sps:$4 sm:$0xff]   ;;  %v2373_v16 = vld [vmem:[#allocation13 + $0x80] ss:$16 sps:$4 sm:$0xff]  }
 0x195   : > { %1016 = vmatpush1.bf16.msra.mxu0 %v2359_v3  ;;  %v2375_v17 = vld [vmem:[#allocation13 + $0xa4] ss:$16 sps:$4 sm:$0xff]   ;;  %v2386_v18 = vld [vmem:[#allocation13 + $0x68] ss:$16 sps:$4 sm:$0xff]   ;;  %v2389_v19 = vld [vmem:[#allocation13 + $0x8c] ss:$16 sps:$4 sm:$0xff]  }
 0x196   : > { %1017 = vmatprep.subr.bf16.mxu0 %v2360_v4  ;;  %1057 = vmatpush1.bf16.msra.mxu1 %v2374_v10  ;;  %v2379_v20 = vld [vmem:[#allocation13 + $0xa0] ss:$16 sps:$4 sm:$0xff]   ;;  %v2381_v21 = vld [vmem:[#allocation13 + $0xc4] ss:$16 sps:$4 sm:$0xff]   ;;  %v2392_v22 = vld [vmem:[#allocation13 + $0x88] ss:$16 sps:$4 sm:$0xff]  }
 0x197   : > { %1058 = vmatprep.subr.bf16.mxu1 %v2377_v13  ;;  %v2395_v23 = vld [vmem:[#allocation13 + $0xac] ss:$16 sps:$4 sm:$0xff]   ;;  %v2385_v24 = vld [vmem:[#allocation13 + $0xc0] ss:$16 sps:$4 sm:$0xff]   ;;  %v2387_v25 = vld [vmem:[#allocation13 + $0xe4] ss:$16 sps:$4 sm:$0xff]  }
 0x198   : > { %v2398_v26 = vld [vmem:[#allocation13 + $0xa8] ss:$16 sps:$4 sm:$0xff]   ;;  %v2401_v27 = vld [vmem:[#allocation13 + $0xcc] ss:$16 sps:$4 sm:$0xff]   ;;  %v2391_v28 = vld [vmem:[#allocation13 + $0xe0] ss:$16 sps:$4 sm:$0xff]  }
 0x199   : > { %1018 = vmatpush1.bf16.msra.mxu0 %v2362_v7  ;;  %v2393_v29 = vld [vmem:[#allocation13 + $0x104] ss:$16 sps:$4 sm:$0xff]   ;;  %v2404_v30 = vld [vmem:[#allocation13 + $0xc8] ss:$16 sps:$4 sm:$0xff]   ;;  %v2407_v31 = vld [vmem:[#allocation13 + $0xec] ss:$16 sps:$4 sm:$0xff]  }
 0x19a   : > { %1019 = vmatprep.subr.bf16.mxu0 %v2363_v8  ;;  %1059 = vmatpush1.bf16.msra.mxu1 %v2380_v14  ;;  %v2397_v32 = vld [vmem:[#allocation13 + $0x100] ss:$16 sps:$4 sm:$0xff]   ;;  %v2399_v33 = vld [vmem:[#allocation13 + $0x124] ss:$16 sps:$4 sm:$0xff]   ;;  %v2410_v34 = vld [vmem:[#allocation13 + $0xe8] ss:$16 sps:$4 sm:$0xff]  }
 0x19b   : > { %1060 = vmatprep.subr.bf16.mxu1 %v2383_v15  ;;  %v2413_v35 = vld [vmem:[#allocation13 + $0x10c] ss:$16 sps:$4 sm:$0xff]   ;;  %v2403_v36 = vld [vmem:[#allocation13 + $0x120] ss:$16 sps:$4 sm:$0xff]   ;;  %v2405_v37 = vld [vmem:[#allocation13 + $0x144] ss:$16 sps:$4 sm:$0xff]  }
 0x19c   : > { %v2416_v38 = vld [vmem:[#allocation13 + $0x108] ss:$16 sps:$4 sm:$0xff]   ;;  %v2419_v39 = vld [vmem:[#allocation13 + $0x12c] ss:$16 sps:$4 sm:$0xff]   ;;  %v601_v40 = vld [vmem:[#allocation8] sm:$0xff]  ;;  %s3739_s10 = sld [smem:[#allocation63_spill]] }
 0x19d   : > { %1020 = vmatpush1.bf16.msra.mxu0 %v2367_v11  ;;  %v2409_v41 = vld [vmem:[#allocation13 + $0x140] ss:$16 sps:$4 sm:$0xff]   ;;  %v606_v42 = vpack.c.bf16 %v601_v40, %v601_v40  ;;  %v2411_v43 = vld [vmem:[#allocation13 + $0x164] ss:$16 sps:$4 sm:$0xff]   ;;  %v2422_v44 = vld [vmem:[#allocation13 + $0x128] ss:$16 sps:$4 sm:$0xff]  }
 0x19e   : > { %1021 = vmatprep.subr.bf16.mxu0 %v2369_v12  ;;  %1061 = vmatpush1.bf16.msra.mxu1 %v2386_v18  ;;  %v2425_v45 = vld [vmem:[#allocation13 + $0x14c] ss:$16 sps:$4 sm:$0xff]   ;;  %v2415_v46 = vld [vmem:[#allocation13 + $0x160] ss:$16 sps:$4 sm:$0xff]   ;;  %v2417_v47 = vld [vmem:[#allocation13 + $0x184] ss:$16 sps:$4 sm:$0xff]  }
 0x19f   : > { %1062 = vmatprep.subr.bf16.mxu1 %v2389_v19  ;;  %1045 = vmatprep.mubr.bf16.mxu0 %v606_v42  ;;  %v2428_v48 = vld [vmem:[#allocation13 + $0x148] ss:$16 sps:$4 sm:$0xff]   ;;  %v2431_v49 = vld [vmem:[#allocation13 + $0x16c] ss:$16 sps:$4 sm:$0xff]   ;;  %v2421_v50 = vld [vmem:[#allocation13 + $0x180] ss:$16 sps:$4 sm:$0xff]  }
 0x1a0   : > { %1086 = vmatprep.mubr.bf16.mxu1 %v606_v42  ;;  %v2423_v51 = vld [vmem:[#allocation13 + $0x1a4] ss:$16 sps:$4 sm:$0xff]   ;;  %v2434_v52 = vld [vmem:[#allocation13 + $0x168] ss:$16 sps:$4 sm:$0xff]   ;;  %v2437_v53 = vld [vmem:[#allocation13 + $0x18c] ss:$16 sps:$4 sm:$0xff]  }
 0x1a1   : > { %1022 = vmatpush1.bf16.msra.mxu0 %v2373_v16  ;;  %v2427_v54 = vld [vmem:[#allocation13 + $0x1a0] ss:$16 sps:$4 sm:$0xff]   ;;  %v2429_v55 = vld [vmem:[#allocation13 + $0x1c4] ss:$16 sps:$4 sm:$0xff]   ;;  %v2440_v56 = vld [vmem:[#allocation13 + $0x188] ss:$16 sps:$4 sm:$0xff]  }
 0x1a2   : > { %1023 = vmatprep.subr.bf16.mxu0 %v2375_v17  ;;  %1063 = vmatpush1.bf16.msra.mxu1 %v2392_v22  ;;  %v2433_v57 = vld [vmem:[#allocation13 + $0x1c0] ss:$16 sps:$4 sm:$0xff]   ;;  %v2441_v58 = vld [vmem:[#allocation13 + $0x1ac] ss:$16 sps:$4 sm:$0xff]   ;;  %v2435_v59 = vld [vmem:[#allocation13 + $0x1e4] ss:$16 sps:$4 sm:$0xff]  }
 0x1a3   : > { %1064 = vmatprep.subr.bf16.mxu1 %v2395_v23  ;;  %v2443_v60 = vld [vmem:[#allocation13 + $0x1a8] ss:$16 sps:$4 sm:$0xff]   ;;  %v2444_v61 = vld [vmem:[#allocation13 + $0x1cc] ss:$16 sps:$4 sm:$0xff]   ;;  %v2439_v62 = vld [vmem:[#allocation13 + $0x1e0] ss:$16 sps:$4 sm:$0xff]  }
 0x1a4   : > { %v599_v63 = vld [vmem:[#allocation4] sm:$0xff]  ;;  %v2452_v1 = vld [vmem:[#allocation14 + $0x4] ss:$16 sps:$4 sm:$0xff]   ;;  %v2450_v3 = vld [vmem:[#allocation14] ss:$16 sps:$4 sm:$0xff]  }
 0x1a5   : > { %1024 = vmatpush1.bf16.msra.mxu0 %v2379_v20  ;;  %v2446_v0 = vld [vmem:[#allocation13 + $0x1c8] ss:$16 sps:$4 sm:$0xff]   ;;  %v2447_v2 = vld [vmem:[#allocation13 + $0x1ec] ss:$16 sps:$4 sm:$0xff]   ;;  %v605_v4 = vpack.c.bf16 %v599_v63, %v599_v63  ;;  %v2458_v6 = vld [vmem:[#allocation14 + $0x24] ss:$16 sps:$4 sm:$0xff]  }
 0x1a6   : > { %1025 = vmatprep.subr.bf16.mxu0 %v2381_v21  ;;  %1065 = vmatpush1.bf16.msra.mxu1 %v2398_v26  ;;  %v2449_v5 = vld [vmem:[#allocation13 + $0x1e8] ss:$16 sps:$4 sm:$0xff]   ;;  %v2455_v7 = vld [vmem:[#allocation14 + $0xc] ss:$16 sps:$4 sm:$0xff]   ;;  %v2456_v8 = vld [vmem:[#allocation14 + $0x20] ss:$16 sps:$4 sm:$0xff]  }
 0x1a7   : > { %1066 = vmatprep.subr.bf16.mxu1 %v2401_v27  ;;  %v2453_v9 = vld [vmem:[#allocation14 + $0x8] ss:$16 sps:$4 sm:$0xff]   ;;  %v2464_v10 = vld [vmem:[#allocation14 + $0x44] ss:$16 sps:$4 sm:$0xff]   ;;  %v2461_v11 = vld [vmem:[#allocation14 + $0x2c] ss:$16 sps:$4 sm:$0xff]  }
 0x1a8   : > { %v2462_v12 = vld [vmem:[#allocation14 + $0x40] ss:$16 sps:$4 sm:$0xff]   ;;  %v2459_v13 = vld [vmem:[#allocation14 + $0x28] ss:$16 sps:$4 sm:$0xff]   ;;  %v2470_v14 = vld [vmem:[#allocation14 + $0x64] ss:$16 sps:$4 sm:$0xff]  }
 0x1a9   : > { %1026 = vmatpush1.bf16.msra.mxu0 %v2385_v24  ;;  %v2467_v15 = vld [vmem:[#allocation14 + $0x4c] ss:$16 sps:$4 sm:$0xff]   ;;  %v2468_v16 = vld [vmem:[#allocation14 + $0x60] ss:$16 sps:$4 sm:$0xff]   ;;  %v2465_v17 = vld [vmem:[#allocation14 + $0x48] ss:$16 sps:$4 sm:$0xff]  }
 0x1aa   : > { %1027 = vmatprep.subr.bf16.mxu0 %v2387_v25  ;;  %1067 = vmatpush1.bf16.msra.mxu1 %v2404_v30  ;;  %v2473_v18 = vld [vmem:[#allocation14 + $0x6c] ss:$16 sps:$4 sm:$0xff]   ;;  %v2471_v19 = vld [vmem:[#allocation14 + $0x68] ss:$16 sps:$4 sm:$0xff]   ;;  %v2476_v20 = vld [vmem:[#allocation14 + $0x84] ss:$16 sps:$4 sm:$0xff]  }
 0x1ab   : > { %1068 = vmatprep.subr.bf16.mxu1 %v2407_v31  ;;  %v2479_v21 = vld [vmem:[#allocation14 + $0x8c] ss:$16 sps:$4 sm:$0xff]   ;;  %v2474_v22 = vld [vmem:[#allocation14 + $0x80] ss:$16 sps:$4 sm:$0xff]   ;;  %v2477_v23 = vld [vmem:[#allocation14 + $0x88] ss:$16 sps:$4 sm:$0xff]  }
 0x1ac   : > { %v2482_v24 = vld [vmem:[#allocation14 + $0xa4] ss:$16 sps:$4 sm:$0xff]   ;;  %v2485_v25 = vld [vmem:[#allocation14 + $0xac] ss:$16 sps:$4 sm:$0xff]   ;;  %v2480_v26 = vld [vmem:[#allocation14 + $0xa0] ss:$16 sps:$4 sm:$0xff]  }
 0x1ad   : > { %1028 = vmatpush1.bf16.msra.mxu0 %v2391_v28  ;;  %v2483_v27 = vld [vmem:[#allocation14 + $0xa8] ss:$16 sps:$4 sm:$0xff]   ;;  %v2488_v28 = vld [vmem:[#allocation14 + $0xc4] ss:$16 sps:$4 sm:$0xff]   ;;  %v2486_v30 = vld [vmem:[#allocation14 + $0xc0] ss:$16 sps:$4 sm:$0xff]  }
 0x1ae   : > { %1029 = vmatprep.subr.bf16.mxu0 %v2393_v29  ;;  %1069 = vmatpush1.bf16.msra.mxu1 %v2410_v34  ;;  %v2491_v29 = vld [vmem:[#allocation14 + $0xcc] ss:$16 sps:$4 sm:$0xff]   ;;  %v2489_v31 = vld [vmem:[#allocation14 + $0xc8] ss:$16 sps:$4 sm:$0xff]   ;;  %v2492_v34 = vld [vmem:[#allocation14 + $0xe0] ss:$16 sps:$4 sm:$0xff]  }
 0x1af   : > { %1070 = vmatprep.subr.bf16.mxu1 %v2413_v35  ;;  %v2495_v35 = vld [vmem:[#allocation14 + $0xe8] ss:$16 sps:$4 sm:$0xff]   ;;  %v2506_v40 = vld [vmem:[#allocation14 + $0x124] ss:$16 sps:$4 sm:$0xff]   ;;  %v2504_v42 = vld [vmem:[#allocation14 + $0x120] ss:$16 sps:$4 sm:$0xff]  }
 0x1b0   : > { %v2537_v63 = vld [vmem:[#allocation14 + $0x1c8] ss:$16 sps:$4 sm:$0xff]  }
 0x1b1   : > { %1030 = vmatpush1.bf16.msra.mxu0 %v2397_v32  ;;  %v2494_v32 = vld [vmem:[#allocation14 + $0xe4] ss:$16 sps:$4 sm:$0xff]  }
 0x1b2   : > { %1031 = vmatprep.subr.bf16.mxu0 %v2399_v33  ;;  %1071 = vmatpush1.bf16.msra.mxu1 %v2416_v38  ;;  %v2497_v33 = vld [vmem:[#allocation14 + $0xec] ss:$16 sps:$4 sm:$0xff]   ;;  %v2498_v38 = vld [vmem:[#allocation14 + $0x100] ss:$16 sps:$4 sm:$0xff]  }
 0x1b3   : > { %1072 = vmatprep.subr.bf16.mxu1 %v2419_v39  ;;  %v2501_v39 = vld [vmem:[#allocation14 + $0x108] ss:$16 sps:$4 sm:$0xff]  }
 0x1b5   : > { %1032 = vmatpush1.bf16.msra.mxu0 %v2403_v36  ;;  %v2500_v36 = vld [vmem:[#allocation14 + $0x104] ss:$16 sps:$4 sm:$0xff]  }
 0x1b6   : > { %1033 = vmatprep.subr.bf16.mxu0 %v2405_v37  ;;  %1073 = vmatpush1.bf16.msra.mxu1 %v2422_v44  ;;  %v2503_v37 = vld [vmem:[#allocation14 + $0x10c] ss:$16 sps:$4 sm:$0xff]   ;;  %v2512_v44 = vld [vmem:[#allocation14 + $0x144] ss:$16 sps:$4 sm:$0xff]  }
 0x1b7   : > { %1074 = vmatprep.subr.bf16.mxu1 %v2425_v45  ;;  %v2515_v45 = vld [vmem:[#allocation14 + $0x14c] ss:$16 sps:$4 sm:$0xff]  }
 0x1b9   : > { %1034 = vmatpush1.bf16.msra.mxu0 %v2409_v41  ;;  %v2509_v41 = vld [vmem:[#allocation14 + $0x12c] ss:$16 sps:$4 sm:$0xff]  }
 0x1ba   : > { %1035 = vmatprep.subr.bf16.mxu0 %v2411_v43  ;;  %1075 = vmatpush1.bf16.msra.mxu1 %v2428_v48  ;;  %v2507_v43 = vld [vmem:[#allocation14 + $0x128] ss:$16 sps:$4 sm:$0xff]   ;;  %v2518_v48 = vld [vmem:[#allocation14 + $0x164] ss:$16 sps:$4 sm:$0xff]  }
 0x1bb   : > { %1076 = vmatprep.subr.bf16.mxu1 %v2431_v49  ;;  %v2521_v49 = vld [vmem:[#allocation14 + $0x16c] ss:$16 sps:$4 sm:$0xff]  }
 0x1bd   : > { %1036 = vmatpush1.bf16.msra.mxu0 %v2415_v46  ;;  %v2510_v46 = vld [vmem:[#allocation14 + $0x140] ss:$16 sps:$4 sm:$0xff]  }
 0x1be   : > { %1037 = vmatprep.subr.bf16.mxu0 %v2417_v47  ;;  %1077 = vmatpush1.bf16.msra.mxu1 %v2434_v52  ;;  %v2513_v47 = vld [vmem:[#allocation14 + $0x148] ss:$16 sps:$4 sm:$0xff]   ;;  %v2524_v52 = vld [vmem:[#allocation14 + $0x184] ss:$16 sps:$4 sm:$0xff]  }
 0x1bf   : > { %1078 = vmatprep.subr.bf16.mxu1 %v2437_v53  ;;  %v2527_v53 = vld [vmem:[#allocation14 + $0x18c] ss:$16 sps:$4 sm:$0xff]  }
 0x1c1   : > { %1038 = vmatpush1.bf16.msra.mxu0 %v2421_v50  ;;  %v2516_v50 = vld [vmem:[#allocation14 + $0x160] ss:$16 sps:$4 sm:$0xff]  }
 0x1c2   : > { %1039 = vmatprep.subr.bf16.mxu0 %v2423_v51  ;;  %1079 = vmatpush1.bf16.msra.mxu1 %v2440_v56  ;;  %v2519_v51 = vld [vmem:[#allocation14 + $0x168] ss:$16 sps:$4 sm:$0xff]   ;;  %v2528_v56 = vld [vmem:[#allocation14 + $0x1a0] ss:$16 sps:$4 sm:$0xff]  }
 0x1c3   : > { %1080 = vmatprep.subr.bf16.mxu1 %v2441_v58  ;;  %v2531_v58 = vld [vmem:[#allocation14 + $0x1a8] ss:$16 sps:$4 sm:$0xff]  }
 0x1c5   : > { %1040 = vmatpush1.bf16.msra.mxu0 %v2427_v54  ;;  %v2522_v54 = vld [vmem:[#allocation14 + $0x180] ss:$16 sps:$4 sm:$0xff]  }
 0x1c6   : > { %1041 = vmatprep.subr.bf16.mxu0 %v2429_v55  ;;  %1081 = vmatpush1.bf16.msra.mxu1 %v2443_v60  ;;  %v2525_v55 = vld [vmem:[#allocation14 + $0x188] ss:$16 sps:$4 sm:$0xff]   ;;  %v2536_v60 = vld [vmem:[#allocation14 + $0x1c4] ss:$16 sps:$4 sm:$0xff]  }
 0x1c7   : > { %1082 = vmatprep.subr.bf16.mxu1 %v2444_v61  ;;  %v2539_v61 = vld [vmem:[#allocation14 + $0x1cc] ss:$16 sps:$4 sm:$0xff]  }
 0x1c9   : > { %1042 = vmatpush1.bf16.msra.mxu0 %v2433_v57  ;;  %v2530_v57 = vld [vmem:[#allocation14 + $0x1a4] ss:$16 sps:$4 sm:$0xff]  }
 0x1ca   : > { %1043 = vmatprep.subr.bf16.mxu0 %v2435_v59  ;;  %1083 = vmatpush1.bf16.msra.mxu1 %v2446_v0  ;;  %v2533_v59 = vld [vmem:[#allocation14 + $0x1ac] ss:$16 sps:$4 sm:$0xff]  }
 0x1cb   : > { %1084 = vmatprep.subr.bf16.mxu1 %v2447_v2  ;;  %v1124_v0 = vld [vmem:[#allocation8 + $0x8] sm:$0xff] }
 0x1cc   : > { %v2545_v2 = vld [vmem:[#allocation14 + $0x1ec] ss:$16 sps:$4 sm:$0xff]  }
 0x1cd   : > { %1044 = vmatpush1.bf16.msra.mxu0 %v2439_v62  ;;  %v2534_v62 = vld [vmem:[#allocation14 + $0x1c0] ss:$16 sps:$4 sm:$0xff]  }
 0x1ce   : > { %1536 = vmatprep.subr.bf16.mxu0 %v2452_v1  ;;  %1085 = vmatpush1.bf16.msra.mxu1 %v2449_v5  ;;  %v2542_v1 = vld [vmem:[#allocation14 + $0x1e4] ss:$16 sps:$4 sm:$0xff]   ;;  %v2543_v5 = vld [vmem:[#allocation14 + $0x1e8] ss:$16 sps:$4 sm:$0xff]  }
 0x1cf   : > { %1577 = vmatprep.subr.bf16.mxu1 %v2455_v7 }
 0x1d0   : > { %1046 = vmatmul.mubr.bf16.vlgmr.msra.gmra.mrb[0].mxu0 %v605_v4 }
 0x1d1   : > { %1537 = vmatpush1.bf16.msra.mxu0 %v2450_v3  ;;  %1087 = vmatmul.mubr.bf16.vlgmr.msra.gmra.mrb[0].mxu1 %v605_v4  ;;  %v1129_v3 = vpack.c.bf16 %v1124_v0, %v1124_v0  ;;  %v2540_v4 = vld [vmem:[#allocation14 + $0x1e0] ss:$16 sps:$4 sm:$0xff]  }
 0x1d2   : > { %1538 = vmatprep.subr.bf16.mxu0 %v2458_v6  ;;  %1578 = vmatpush1.bf16.msra.mxu1 %v2453_v9  ;;  %v673_v6 = vlaneseq  ;;  %v671_v9 = vld [vmem:[%s3677_s5] sm:$0xf] }
 0x1d3   : > { %1579 = vmatprep.subr.bf16.mxu1 %v2461_v11  ;;  %1568 = vmatprep.mubr.bf16.mxu0 %v1129_v3 }
 0x1d4   : > { %1609 = vmatprep.mubr.bf16.mxu1 %v1129_v3  ;;  %v3553_v7 = vshrl.u32 %v673_v6, 7 }
 0x1d5   : > { %1539 = vmatpush1.bf16.msra.mxu0 %v2456_v8 }
 0x1d6   : > { %1540 = vmatprep.subr.bf16.mxu0 %v2464_v10  ;;  %1580 = vmatpush1.bf16.msra.mxu1 %v2459_v13  ;;  %v675_v8 = vsub.s32 0, %v3553_v7  ;;  %v679_v10 = vsub.s32 1, %v3553_v7  ;;  %v687_v13 = vsub.s32 3, %v3553_v7 }
 0x1d7   : > { %1581 = vmatprep.subr.bf16.mxu1 %v2467_v15 }
 0x1d8   : > { %v676_v11 = vrot.slane %v671_v9, %v675_v8 }
 0x1d9   : > { %1541 = vmatpush1.bf16.msra.mxu0 %v2462_v12  ;;  %v680_v12 = vrot.slane %v671_v9, %v679_v10 }
 0x1da   : > { %1542 = vmatprep.subr.bf16.mxu0 %v2470_v14  ;;  %1582 = vmatpush1.bf16.msra.mxu1 %v2465_v17 }
 0x1db   : > { %1583 = vmatprep.subr.bf16.mxu1 %v2473_v18 }
 0x1dd   : > { %1543 = vmatpush1.bf16.msra.mxu0 %v2468_v16 }
 0x1de   : > { %1584 = vmatpush1.bf16.msra.mxu1 %v2471_v19  ;;  %1544 = vmatprep.subr.bf16.mxu0 %v2476_v20 }
 0x1df   : > { %1585 = vmatprep.subr.bf16.mxu1 %v2479_v21  ;;  %v688_v21 = vrot.slane %v671_v9, %v687_v13 }
 0x1e1   : > { %1545 = vmatpush1.bf16.msra.mxu0 %v2474_v22 }
 0x1e2   : > { %1586 = vmatpush1.bf16.msra.mxu1 %v2477_v23  ;;  %1546 = vmatprep.subr.bf16.mxu0 %v2482_v24  ;;  %v683_v23 = vsub.s32 2, %v3553_v7 }
 0x1e3   : > { %1587 = vmatprep.subr.bf16.mxu1 %v2485_v25 }
 0x1e5   : > { %1547 = vmatpush1.bf16.msra.mxu0 %v2480_v26 }
 0x1e6   : > { %1588 = vmatpush1.bf16.msra.mxu1 %v2483_v27  ;;  %1548 = vmatprep.subr.bf16.mxu0 %v2488_v28  ;;  %v684_v28 = vrot.slane %v671_v9, %v683_v23 }
 0x1e7   : > { %1589 = vmatprep.subr.bf16.mxu1 %v2491_v29 }
 0x1e9   : > { %1549 = vmatpush1.bf16.msra.mxu0 %v2486_v30 }
 0x1ea   : > { %1590 = vmatpush1.bf16.msra.mxu1 %v2489_v31  ;;  %1550 = vmatprep.subr.bf16.mxu0 %v2494_v32 }
 0x1eb   : > { %1591 = vmatprep.subr.bf16.mxu1 %v2497_v33 }
 0x1ed   : > { %1551 = vmatpush1.bf16.msra.mxu0 %v2492_v34 }
 0x1ee   : > { %1592 = vmatpush1.bf16.msra.mxu1 %v2495_v35  ;;  %1552 = vmatprep.subr.bf16.mxu0 %v2500_v36 }
 0x1ef   : > { %1593 = vmatprep.subr.bf16.mxu1 %v2503_v37 }
 0x1f1   : > { %1553 = vmatpush1.bf16.msra.mxu0 %v2498_v38  ;;  %v1114_v38 = vld [vmem:[#allocation11] sm:$0xff] }
 0x1f2   : > { %1594 = vmatpush1.bf16.msra.mxu1 %v2501_v39  ;;  %1554 = vmatprep.subr.bf16.mxu0 %v2506_v40 }
 0x1f3   : > { %1595 = vmatprep.subr.bf16.mxu1 %v2509_v41 }
 0x1f5   : > { %1555 = vmatpush1.bf16.msra.mxu0 %v2504_v42 }
 0x1f6   : > { %1596 = vmatpush1.bf16.msra.mxu1 %v2507_v43  ;;  %1556 = vmatprep.subr.bf16.mxu0 %v2512_v44 }
 0x1f7   : > { %1597 = vmatprep.subr.bf16.mxu1 %v2515_v45 }
 0x1f9   : > { %1557 = vmatpush1.bf16.msra.mxu0 %v2510_v46 }
 0x1fa   : > { %1598 = vmatpush1.bf16.msra.mxu1 %v2513_v47  ;;  %1558 = vmatprep.subr.bf16.mxu0 %v2518_v48 }
 0x1fb   : > { %1599 = vmatprep.subr.bf16.mxu1 %v2521_v49  ;;  %v1194_v49 = vld [vmem:[%s3739_s10] sm:$0xf] }
 0x1fc   : > { %v1211_v0 = vrot.slane %v1194_v49, %v687_v13 }
 0x1fd   : > { %1559 = vmatpush1.bf16.msra.mxu0 %v2516_v50  ;;  %v1199_v50 = vrot.slane %v1194_v49, %v675_v8 }
 0x1fe   : > { %1600 = vmatpush1.bf16.msra.mxu1 %v2519_v51  ;;  %1560 = vmatprep.subr.bf16.mxu0 %v2524_v52  ;;  %v1203_v51 = vrot.slane %v1194_v49, %v679_v10 }
 0x1ff   : > { %1601 = vmatprep.subr.bf16.mxu1 %v2527_v53 }
 0x201   : > { %1561 = vmatpush1.bf16.msra.mxu0 %v2522_v54 }
 0x202   : > { %1602 = vmatpush1.bf16.msra.mxu1 %v2525_v55  ;;  %1562 = vmatprep.subr.bf16.mxu0 %v2530_v57 }
 0x203   : > { %1603 = vmatprep.subr.bf16.mxu1 %v2533_v59 }
 0x205   : > { %1563 = vmatpush1.bf16.msra.mxu0 %v2528_v56 }
 0x206   : > { %1604 = vmatpush1.bf16.msra.mxu1 %v2531_v58  ;;  %1564 = vmatprep.subr.bf16.mxu0 %v2536_v60 }
 0x207   : > { %1605 = vmatprep.subr.bf16.mxu1 %v2539_v61 }
 0x209   : > { %1565 = vmatpush1.bf16.msra.mxu0 %v2534_v62 }
 0x20a   : > { %1606 = vmatpush1.bf16.msra.mxu1 %v2537_v63  ;;  %1566 = vmatprep.subr.bf16.mxu0 %v2542_v1 }
 0x20b   : > { %1607 = vmatprep.subr.bf16.mxu1 %v2545_v2  ;;  %v1207_v2 = vrot.slane %v1194_v49, %v683_v23 }
 0x20d   : > { %1567 = vmatpush1.bf16.msra.mxu0 %v2540_v4 }
 0x20e   : > { %1608 = vmatpush1.bf16.msra.mxu1 %v2543_v5 }
 0x2a3   : > { %v1047_v14 = vpop.f32.mrb[0].mxu0 }
 0x2a4   : > { %v1048_v15 = vadd.f32 %v1047_v14, %v676_v11  ;;  %v1049_v16 = vpop.f32.mrb[1].mxu0  ;;  %v1088_v24 = vpop.f32.mrb[0].mxu1 }
 0x2a5   : > { %v1050_v17 = vadd.f32 %v1049_v16, %v680_v12  ;;  %v1051_v18 = vpop.f32.mrb[2].mxu0  ;;  %v1090_v25 = vpop.f32.mrb[1].mxu1  ;;  %v1089_v31 = vadd.f32 %v1088_v24, %v684_v28  ;;  %v1638_v12 = vld [vmem:[#allocation11 + $0x8] sm:$0xff] }
 0x2a6   : > { %v2110_v19 = vmul.f32 -1.442695, %v1048_v15  ;;  %v1052_v20 = vpop.f32.mrb[3].mxu0  ;;  %v1091_v26 = vadd.f32 %v1090_v25, %v688_v21  ;;  %v1092_v27 = vpop.f32.mrb[2].mxu1 }
 0x2a7   : > { %v2111_v22 = vmul.f32 -1.442695, %v1050_v17  ;;  %v1093_v29 = vpop.f32.mrb[3].mxu1 }
 0x2a8   : > { %2546 = vpow2.f32 %v2110_v19  ;;  %v2112_v30 = vmul.f32 -1.442695, %v1091_v26 }
 0x2a9   : > { %2548 = vpow2.f32 %v2111_v22 }
 0x2aa   : > { %2550 = vpow2.f32 %v2112_v30 }
 0x2ab   : > { %2552 = vtanh.f32 %v1089_v31 }
 0x2b2   : > { %v2547_v32 = vpop.eup %2546 }
 0x2b3   : > { %v2549_v33 = vpop.eup %2548  ;;  %v1098_v34 = vadd.f32 1.0, %v2547_v32 }
 0x2b4   : > { %v1104_v35 = vadd.f32 1.0, %v2549_v33  ;;  %v2551_v36 = vpop.eup %2550 }
 0x2b5   : > { %2554 = vrcp.f32 %v1098_v34  ;;  %v2553_v37 = vpop.eup %2552  ;;  %v1111_v40 = vadd.f32 1.0, %v2551_v36 }
 0x2b6   : > { %2556 = vrcp.f32 %v1104_v35 }
 0x2b7   : > { %2558 = vrcp.f32 %v1111_v40 }
 0x2bf   : > { %v2555_v39 = vpop.eup %2554 }
 0x2c0   : > { %v2557_v41 = vpop.eup %2556  ;;  %v1116_v42 = vmul.f32 %v2555_v39, %v2553_v37 }
 0x2c1   : > { %v1115_v43 = vmul.f32 %v2557_v41, %v1114_v38  ;;  %v2559_v45 = vpop.eup %2558 }
 0x2c3   : > { %v1117_v44 = vadd.f32 %v1116_v42, %v1115_v43 }
 0x2c5   : > { %2560 = vtanh.f32 %v1117_v44  ;;  %1121 = vst [vmem:[#allocation20] sm:$0xff] %v1117_v44 }
 0x2cf   : > { %v2561_v46 = vpop.eup %2560 }
 0x2d0   : > { %v1119_v47 = vmul.f32 %v2561_v46, %v2559_v45 }
 0x2d2   : > { %1120 = vst [vmem:[#allocation18] sm:$0xff] %v1119_v47  ;;  %v1128_v48 = vpack.c.bf16 %v1119_v47, %v1119_v47 }
 0x2d4   : > { %1569 = vmatmul.mubr.bf16.vlgmr.msra.gmra.mrb[4].mxu0 %v1128_v48  ;;  %1610 = vmatmul.mubr.bf16.vlgmr.msra.gmra.mrb[4].mxu1 %v1128_v48 }
 0x3a7   : > { %v1570_v52 = vpop.f32.mrb[4].mxu0  ;;  %v1611_v53 = vpop.f32.mrb[4].mxu1 }
 0x3a8   : > { %v1571_v54 = vadd.f32 %v1570_v52, %v1199_v50  ;;  %v1572_v55 = vpop.f32.mrb[5].mxu0  ;;  %v1613_v56 = vpop.f32.mrb[5].mxu1  ;;  %v1612_v4 = vadd.f32 %v1611_v53, %v1207_v2 }
 0x3a9   : > { %v1573_v57 = vadd.f32 %v1572_v55, %v1203_v51  ;;  %v1574_v58 = vpop.f32.mrb[6].mxu0  ;;  %v1615_v59 = vpop.f32.mrb[6].mxu1  ;;  %v1614_v1 = vadd.f32 %v1613_v56, %v1211_v0 }
 0x3aa   : > { %v2177_v60 = vmul.f32 -1.442695, %v1571_v54  ;;  %v1575_v61 = vpop.f32.mrb[7].mxu0  ;;  %v1616_v62 = vpop.f32.mrb[7].mxu1 }
 0x3ab   : > { %v2178_v63 = vmul.f32 -1.442695, %v1573_v57  ;;  %v2179_v3 = vmul.f32 -1.442695, %v1614_v1 }
 0x3ac   : > { %2562 = vpow2.f32 %v2177_v60 }
 0x3ad   : > { %2564 = vpow2.f32 %v2178_v63 }
 0x3ae   : > { %2566 = vpow2.f32 %v2179_v3 }
 0x3af   : > { %2568 = vtanh.f32 %v1612_v4 }
 0x3b6   : > { %v2563_v5 = vpop.eup %2562 }
 0x3b7   : > { %v2565_v6 = vpop.eup %2564  ;;  %v1621_v8 = vadd.f32 1.0, %v2563_v5 }
 0x3b8   : > { %v1627_v9 = vadd.f32 1.0, %v2565_v6  ;;  %v2567_v10 = vpop.eup %2566 }
 0x3b9   : > { %2570 = vrcp.f32 %v1621_v8  ;;  %v2569_v11 = vpop.eup %2568  ;;  %v1634_v15 = vadd.f32 1.0, %v2567_v10 }
 0x3ba   : > { %2572 = vrcp.f32 %v1627_v9 }
 0x3bb   : > { %2574 = vrcp.f32 %v1634_v15 }
 0x3c3   : > { %v2571_v14 = vpop.eup %2570 }
 0x3c4   : > { %v2573_v7 = vpop.eup %2572  ;;  %v1640_v13 = vmul.f32 %v2571_v14, %v2569_v11 }
 0x3c5   : > { %v1639_v16 = vmul.f32 %v2573_v7, %v1638_v12  ;;  %v2575_v18 = vpop.eup %2574 }
 0x3c7   : > { %v1641_v17 = vadd.f32 %v1640_v13, %v1639_v16 }
 0x3c9   : > { %2576 = vtanh.f32 %v1641_v17  ;;  %1647 = vst [vmem:[#allocation20 + $0x8] sm:$0xff] %v1641_v17 }
 0x3d3   : > { %v2577_v19 = vpop.eup %2576 }
 0x3d4   : > { %v1643_v20 = vmul.f32 %v2577_v19, %v2575_v18 }
 0x3d6   : > { %1645 = vst [vmem:[#allocation18 + $0x8] sm:$0xff] %v1643_v20  ;;  %v1650_v21 = vpack.c.bf16 %v1643_v20, %v1643_v20 }
 0x3d8   : > { %1651 = vst [vmem:[#allocation3] sm:$0xf] %v1650_v21 }
 0x3d9 PF: > { %v2578_v22 = vld [vmem:[%s3406_s0] sm:$0xff]   ;;  %v3106_v23 = vmov 0.0   ;;  %v2579_v24 = vld [vmem:[%s3406_s0 + $0x8] sm:$0xff]   ;;  %vm3107_vm0 = vmmov 0   ;;  %v2580_v25 = vld [vmem:[%s3406_s0 + $0x10] sm:$0xff]   ;;  %s3108_s7 = smov [#allocation18]  }
 0x3da   : > { %2214 = vmatprep.subr.bf16.mxu0 %v3106_v23  ;;  %2230 = vmatprep.mubr.msk.bf16.mxu0 %vm3107_vm0, %v3106_v23  ;;  %v2581_v26 = vld [vmem:[%s3406_s0 + $0x18] sm:$0xff]   ;;  %v2582_v27 = vld [vmem:[%s3406_s0 + $0x20] sm:$0xff]   ;;  %v2583_v28 = vld [vmem:[%s3406_s0 + $0x28] sm:$0xff]   ;;  %s1789_s4 = sshll.u32 %s3108_s7, 4  ;;  %p3740_p12 = scmp.eq.s32.totalorder %s3202_s29, 1  ;;  %s1790_s4 = int_to_ptr.vmem [resolvable:$true] %s1789_s4 }
 0x3db   : > { %2215 = vmatpush3.bf16.msra.mxu0 %v2578_v22  ;;  %v2584_v29 = vld [vmem:[%s3406_s0 + $0x30] sm:$0xff]   ;;  %v2585_v30 = vld [vmem:[%s3406_s0 + $0x38] sm:$0xff]   ;;  %s2932_s12 = scalar_lea.vmem %s1790_s4, 256  ;;  %p2939_p2 = scmp.lt.s32.totalorder %s1790_s4, %s1790_s4 }
 0x3dc   : > { %2216 = vmatprep.subr.bf16.mxu0 %v3106_v23  ;;  %p2933_p9 = scmp.ne.s32.totalorder %s1790_s4, %s2932_s12  ;;  %p2940_p3 = scmp.lt.s32.totalorder %s2932_s12, %s2932_s12 }
 0x3de   : > { %p2934_p1 = pnand %p2933_p9, %p3740_p12  ;;  %p2941_p6 = por %p2940_p3, %p2939_p2 }
 0x3df   : > { %2217 = vmatpush3.bf16.msra.mxu0 %v2579_v24  ;;  %v1652_v31 = vld [vmem:[#allocation3] sm:$0xf] }
 0x3e0   : > { %2218 = vmatprep.subr.bf16.mxu0 %v3106_v23  ;;  %p2935_p10 = pneg %p2934_p1 }
 0x3e2   : > { %p2942_p11 = pnand %p2941_p6, %p2935_p10 }
 0x3e3   : > { %2219 = vmatpush3.bf16.msra.mxu0 %v2580_v25 }
 0x3e4   : > { %2220 = vmatprep.subr.bf16.mxu0 %v3106_v23 }
 0x3e7   : > { %2221 = vmatpush3.bf16.msra.mxu0 %v2581_v26 }
 0x3e8   : > { %2222 = vmatprep.subr.bf16.mxu0 %v3106_v23 }
 0x3eb   : > { %2223 = vmatpush3.bf16.msra.mxu0 %v2582_v27 }
 0x3ec   : > { %2224 = vmatprep.subr.bf16.mxu0 %v3106_v23 }
 0x3ef   : > { %2225 = vmatpush3.bf16.msra.mxu0 %v2583_v28 }
 0x3f0   : > { %2226 = vmatprep.subr.bf16.mxu0 %v3106_v23 }
 0x3f3   : > { %2227 = vmatpush3.bf16.msra.mxu0 %v2584_v29 }
 0x3f4   : > { %2228 = vmatprep.subr.bf16.mxu0 %v3106_v23 }
 0x3f7   : > { %2229 = vmatpush3.bf16.msra.mxu0 %v2585_v30 }
 0x3fa   : > { %2231 = vmatmul.mubr.bf16.vlgmr.msra.gmra.mrb[0].mxu0 %v1652_v31 }
 0x3fb   : > { %2945 = shalt.err (!%p2942_p11)
}
 0x3fc   : > { %s3741_s0 = sld [smem:[#allocation65_spill]]  ;;  %p3743_p8 = pmov %p3740_p12 }
 0x402   : > { %s3742_s3 = smov %s3741_s0  ;;  %s2946_s22 = scalar_lea.hbm %s3741_s0, 256 }
 0x403   : > { %p2947_p4 = scmp.ne.s32.totalorder %s3742_s3, %s2946_s22  ;;  %p2952_p5 = scmp.lt.u32.totalorder %s2946_s22, %s3742_s3 }
 0x405   : > { %p2948_p13 = pnand %p2947_p4, %p3743_p8 }
 0x407   : > { %p2949_p0 = pneg %p2948_p13 }
 0x409   : > { %p2954_p7 = pnand %p2952_p5, %p2949_p0 }
 0x40b   : > { %2957 = shalt.err (!%p2954_p7)
}
 0x40c   : > { %s3109_s16 = smov 128   ;;  %s3110_s17 = smov 8  }
 0x40d   : > { %p3744_p9 = pmov %p3743_p8  ;;  %s3111_s30 = smov [#allocation20]  }
 0x40e   : > { %s1802_s19 = sshll.u32 %s3111_s30, 4  ;;  %p3745_p1 = pmov %p3743_p8  ;;  %s1803_s19 = int_to_ptr.vmem [resolvable:$true] %s1802_s19 }
 0x40f   : > { %2254 = dma.vmem_to_hbm [thread:$0]  (%p3744_p9), %s1790_s4, 256, %s3742_s3, [#allocation19], %s3109_s16, %s3109_s16, %s3110_s17  }
 0x410   : > { %s2958_s24 = scalar_lea.vmem %s1803_s19, 256  ;;  %p2965_p3 = scmp.lt.s32.totalorder %s1803_s19, %s1803_s19 }
 0x411   : > { %p2959_p12 = scmp.ne.s32.totalorder %s1803_s19, %s2958_s24  ;;  %p2966_p6 = scmp.lt.s32.totalorder %s2958_s24, %s2958_s24 }
 0x413   : > { %p2960_p10 = pnand %p2959_p12, %p3745_p1  ;;  %p2967_p11 = por %p2966_p6, %p2965_p3 }
 0x415   : > { %p2961_p2 = pneg %p2960_p10 }
 0x417   : > { %p2968_p4 = pnand %p2967_p11, %p2961_p2 }
 0x419   : > { %2971 = shalt.err (!%p2968_p4)
}
 0x41a   : > { %s3746_s12 = sld [smem:[#allocation66_spill]]  ;;  %p3747_p13 = pmov %p3745_p1 }
 0x420   : > { %s2972_s6 = scalar_lea.hbm %s3746_s12, 256 }
 0x421   : > { %p2973_p8 = scmp.ne.s32.totalorder %s3746_s12, %s2972_s6  ;;  %p2978_p7 = scmp.lt.u32.totalorder %s2972_s6, %s3746_s12 }
 0x423   : > { %p2974_p0 = pnand %p2973_p8, %p3747_p13 }
 0x425   : > { %p2975_p5 = pneg %p2974_p0 }
 0x427   : > { %p2980_p9 = pnand %p2978_p7, %p2975_p5 }
 0x429   : > { %2983 = shalt.err (!%p2980_p9)
}
 0x42a   : > { %p3748_p12 = pmov %p3745_p1  ;;  %s3749_s14 = sld [smem:[#allocation57_spill]] }
 0x42b   : > { %s3750_s2 = scalar_lea.vmem %s3681_s9, %s3415_s23  ;;  %s2190_s30 = sshll.u32 %s3202_s29, 7 }
 0x42c   : > { %2256 = dma.vmem_to_hbm [thread:$0]  (%p3748_p12), %s1803_s19, 256, %s3746_s12, [#allocation19], %s3109_s16, %s3109_s16, %s3110_s17  }
 0x42d   : > { %v2180_v32 = vld [vmem:[%s3750_s2] ss:$0 sm:$0xff]  ;;  %s1779_s24 = sshll.u32 %s3421_s15, 4  ;;  %s3751_s6 = sld [smem:[#allocation64_spill]]  ;;  %s3625_s24 = int_to_ptr.vmem [resolvable:$true] %s1779_s24 }
 0x42e   : > { %s1766_s23 = scalar_lea.sflag [#allocation10], %s3403_s20  ;;  %s2984_s16 = scalar_lea.vmem %s3625_s24, 128 }
 0x42f   : > { %p2985_p1 = scmp.ne.s32.totalorder %s3625_s24, %s2984_s16  ;;  %s3112_s17 = smov [#allocation17]  }
 0x430   : > { %p3752_p10 = scmp.ne.s32.totalorder %s3749_s14, 0  ;;  %s2988_s19 = sshll.u32 %s3112_s17, 4  ;;  %s2989_s19 = int_to_ptr.vmem [resolvable:$false] %s2988_s19 }
 0x431   : > { %s2990_s4 = scalar_lea.vmem %s2989_s19, 256  ;;  %p2991_p6 = scmp.lt.s32.totalorder %s3625_s24, %s2989_s19 }
 0x432   : > { %p2986_p2 = pnand %p2985_p1, %p3752_p10  ;;  %p2992_p11 = scmp.lt.s32.totalorder %s2990_s4, %s2984_s16 }
 0x433   : > { %s3623_s13 = scalar_lea.hbm %s3751_s6, %s2190_s30 }
 0x434   : > { %p2987_p3 = pneg %p2986_p2  ;;  %p2993_p4 = por %p2992_p11, %p2991_p6 }
 0x436   : > { %p2994_p8 = pnand %p2993_p4, %p2987_p3 }
 0x4cd   : > { %v1758_v33 = vpop.f32.mrb[0].mxu0 }
 0x4ce   : > { %v1759_v34 = vadd.f32 %v2180_v32, %v1758_v33  ;;  %v2232_v35 = vpop.f32.mrb[1].mxu0 }
 0x4cf   : > { %v1761_v36 = vpop.f32.mrb[2].mxu0 }
 0x4d0   : > { %1764 = vst [vmem:[%s3421_s15] sm:$0xff] %v1759_v34  ;;  %v2233_v37 = vpop.f32.mrb[3].mxu0 }
 0x4d1   : > { %2997 = shalt.err (!%p2994_p8)
}
 0x4d2   : > { %s2998_s20 = scalar_lea.hbm %s3623_s13, 128  ;;  %s3002_s22 = scalar_lea.hbm %s3751_s6, 256 }
 0x4d3   : > { %p2999_p13 = scmp.ne.s32.totalorder %s3623_s13, %s2998_s20  ;;  %p3003_p7 = scmp.lt.u32.totalorder %s3623_s13, %s3751_s6 }
 0x4d4   : > { %p3004_p9 = scmp.lt.u32.totalorder %s3002_s22, %s2998_s20  ;;  %p3006_p1 = scmp.lt.u32.totalorder %s2998_s20, %s3623_s13 }
 0x4d5   : > { %p3000_p0 = pnand %p2999_p13, %p3752_p10 }
 0x4d6   : > { %p3005_p12 = por %p3004_p9, %p3003_p7 }
 0x4d7   : > { %p3001_p5 = pneg %p3000_p0 }
 0x4d8   : > { %p3007_p2 = por %p3006_p1, %p3005_p12 }
 0x4da   : > { %p3008_p3 = pnand %p3007_p2, %p3001_p5 }
 0x4dc   : > { %3011 = shalt.err (!%p3008_p3)
}
 0x4dd   : > { %2252 = dma.vmem_to_hbm [thread:$0]  (%p3752_p10), %s3625_s24, 128, %s3623_s13, %s1766_s23  }
 0x4de   : > { %p3753_p6 = scmp.eq.s32.totalorder %s3202_s29, 1 }
 0x4e0   : > { %3063 = dma.done.wait (%p3753_p6), [#allocation19], 512   ;;  %p3754_p11 = pmov %p3753_p6 }
 0x4e2   : > { %3065 = vsyncadd (%p3754_p11), [#allocation19], 4294966784 }
 0x4e3 PF: > { %s3755_s25 = sld [smem:[#allocation54_spill]]  ;;  %s3756_s18 = sld [smem:[#allocation58_spill]] }
 0x4e4   : > { %p3758_p8 = scmp.ge.s32.totalorder %s3084_s28, 2 }
 0x4e9   : > { %s1825_s2 = sand.u32 1, %s3755_s25   ;;  %p3757_p4 = scmp.ne.s32.totalorder %s3756_s18, 0 }
 0x4ea   : > { %s1826_s30 = scalar_lea.sflag [#allocation10], %s1825_s2 }
 0x4eb   : > { %p2280_p13 = pnand %p3758_p8, %p3757_p4 }
 0x4ed   : > { %3067 = dma.done.wait (!%p2280_p13), %s1826_s30, 128  }
 0x4ee   : > { %3069 = vsyncadd (!%p2280_p13), %s1826_s30, 4294967168  ;;  %s3759_s28 = sld [smem:[#allocation55_spill]]  ;;  %s3760_s14 = sld [smem:[#allocation56_spill]] }
 0x4ef   : > { %s3761_s0 = smov %s3076_s26  ;;  %s3762_s26 = smov %s3080_s27 }
 0x4f4   : > { %p33_p10 = scmp.ge.s32.totalorder %s3759_s28, 4   ;;  %s3763_s27 = smov %s3760_s14 }
 0x4f6   :  { %35 = sbr.rel (!%p33_p10) target bundleno = 24 (0x18), region = 200 }
 0x4fd   :  { %1831 = vsyncpa [#allocation9], 1 }
 0x4fe   :  { %1833 = vsyncpa [#allocation9 + $0x1], 1 }
 0x4ff   :  { %1834 = vsyncpa [#allocation12], 1 }
 0x500   :  { %1835 = vsyncpa [#allocation15], 1 }
 0x501   :  { %1836 = vsyncpa [#allocation10], 1 }
 0x502   :  { %1838 = vsyncpa [#allocation10 + $0x1], 1 }
 0x503   :  { %1839 = vsyncpa [#allocation19], 1 }
 0x504   :  { %1840 = vsyncmov [#allocation5] }
 0x507   :  { %s1841_s29 = vpop.sfrf %1840 }
 0x508   :  { %p2197_p0 = scmp.ne.s32.totalorder %s1841_s29, 0 }
 0x50a   :  { %1845 = shalt.err (%p2197_p0)  }
 0x50b   :  { %1847 = vsyncmov [#allocation5 + $0x1] }
 0x50e   :  { %s1848_s24 = vpop.sfrf %1847 }
 0x50f   :  { %p2198_p5 = scmp.ne.s32.totalorder %s1848_s24, 0 }
 0x511   :  { %1852 = shalt.err (%p2198_p5)  }
 0x512   :  { %1854 = vsyncmov [#allocation5 + $0x2] }
 0x515   :  { %s1855_s10 = vpop.sfrf %1854 }
 0x516   :  { %p2199_p7 = scmp.ne.s32.totalorder %s1855_s10, 0 }
 0x518   :  { %1859 = shalt.err (%p2199_p7)  }
 0x519   :  { %1861 = vsyncmov [#allocation5 + $0x3] }
 0x51c   :  { %s1862_s1 = vpop.sfrf %1861 }
 0x51d   :  { %p2200_p9 = scmp.ne.s32.totalorder %s1862_s1, 0 }
 0x51f   :  { %1866 = shalt.err (%p2200_p9)  }
 0x520   :  { %1868 = vsyncmov [#allocation5 + $0x4] }
 0x523   :  { %s1869_s5 = vpop.sfrf %1868 }
 0x524   :  { %p2201_p12 = scmp.ne.s32.totalorder %s1869_s5, 0 }
 0x526   :  { %1873 = shalt.err (%p2201_p12)  }
 0x527   :  { %1875 = vsyncmov [#allocation5 + $0x5] }
 0x52a   :  { %s1876_s8 = vpop.sfrf %1875 }
 0x52b   :  { %p2202_p1 = scmp.ne.s32.totalorder %s1876_s8, 0 }
 0x52d   :  { %1880 = shalt.err (%p2202_p1)  }
 0x52e   :  { %1882 = vsyncmov [#allocation5 + $0x6] }
 0x531   :  { %s1883_s9 = vpop.sfrf %1882 }
 0x532   :  { %p2203_p2 = scmp.ne.s32.totalorder %s1883_s9, 0 }
 0x534   :  { %1887 = shalt.err (%p2203_p2)  }
 0x535   :  { %1889 = vsyncmov [#allocation5 + $0x7] }
 0x538   :  { %s1890_s26 = vpop.sfrf %1889 }
 0x539   :  { %p2204_p3 = scmp.ne.s32.totalorder %s1890_s26, 0 }
 0x53b   :  { %1894 = shalt.err (%p2204_p3)  }

// kernel: tpu_custom_call.1
= control target key start
LH: loop header
LB: loop body
LE: loop exit
PB: predicated region body
PF: predicated region fallthrough
CT: control target
= control target key end

     0   :  { %s3672_s0 = inlined_call_operand.vmem [shape: s32[8], index: 0, kind: input, shape index: {}]   ;;  %s3673_s1 = inlined_call_operand.hbm [shape: f32[256,128], index: 1, kind: input, shape index: {}]   ;;  %s3674_s2 = inlined_call_operand.hbm [shape: f32[2,8,128], index: 2, kind: input, shape index: {}, may-alias: {2,11}]   ;;  %s3675_s3 = inlined_call_operand.hbm [shape: f32[2,8,128], index: 3, kind: input, shape index: {}, may-alias: {3,12}]   ;;  %s3676_s4 = inlined_call_operand.hbm [shape: bf16[256,512], index: 4, kind: input, shape index: {}]   ;;  %s3677_s5 = inlined_call_operand.vmem [shape: f32[1,512], index: 5, kind: input, shape index: {}]   ;;  %s3678_s6 = inlined_call_operand.hbm [shape: bf16[256,512], index: 6, kind: input, shape index: {}]   ;;  %s3679_s7 = inlined_call_operand.vmem [shape: f32[1,512], index: 7, kind: input, shape index: {}]   ;;  %s3680_s8 = inlined_call_operand.hbm [shape: bf16[128,256], index: 8, kind: input, shape index: {}]   ;;  %s3681_s9 = inlined_call_operand.vmem [shape: f32[1,256], index: 9, kind: input, shape index: {}]   ;;  %s3682_s10 = inlined_call_operand.hbm [shape: f32[8,256], index: 10, kind: output, shape index: {0}]   ;;  %s3683_s11 = inlined_call_operand.hbm [shape: f32[2,8,128], index: 11, kind: output, shape index: {1}, may-alias: {2,11}]   ;;  %s3684_s12 = inlined_call_operand.hbm [shape: f32[2,8,128], index: 12, kind: output, shape index: {2}, may-alias: {3,12}]  }
   0x1   :  { %3701 = sst [smem:[#allocation59_spill]] %s3674_s2  ;;  %s18_s23 = sshll.u32 %s3672_s0, 4  ;;  %s19_s23 = int_to_ptr.vmem [resolvable:$true] %s18_s23 }
   0x2   :  { %3702 = sst [smem:[#allocation60_spill]] %s3675_s3  ;;  %s2586_s24 = scalar_lea.vmem %s19_s23, 16 }
   0x3   :  { %3703 = sst [smem:[#allocation61_spill]] %s3676_s4  ;;  %p2587_p0 = scmp.ne.s32.totalorder %s19_s23, %s2586_s24 }
   0x4   :  { %3704 = sst [smem:[#allocation62_spill]] %s3678_s6  ;;  %p2591_p1 = scmp.lt.s32.totalorder %s19_s23, %s19_s23 }
   0x5   :  { %3705 = sst [smem:[#allocation63_spill]] %s3679_s7  ;;  %p2592_p2 = scmp.lt.s32.totalorder %s2586_s24, %s2586_s24 }
   0x6   :  { %3706 = sst [smem:[#allocation64_spill]] %s3682_s10 }
   0x7   :  { %3707 = sst [smem:[#allocation65_spill]] %s3683_s11  ;;  %p2593_p3 = por %p2592_p2, %p2591_p1 }
   0x8   :  { %3708 = sst [smem:[#allocation66_spill]] %s3684_s12 }
   0x9   :  { %p2594_p4 = pnand %p2593_p3, %p2587_p0 }
   0xb   :  { %2597 = shalt.err (!%p2594_p4)  }
   0xc   :  { %s3086_s25 = smov [#allocation7]  }
   0xd   :  { %21 = dma.vmem_to_smem %s19_s23, 16, %s3086_s25, [#allocation6] }
   0xe   :  { %3028 = dma.done.wait [#allocation6], 16 }
   0xf   :  { %3029 = vsyncadd [#allocation6], 4294967280 }
  0x10   :  { %23 = sfence }
  0x11   :  { %24 = vsyncpa [#allocation9], 0 }
  0x12   :  { %25 = vsyncpa [#allocation12], 0 }
  0x13   :  { %26 = vsyncpa [#allocation15], 0 }
  0x14   :  { %27 = vsyncpa [#allocation10], 0 }
  0x15   :  { %29 = vsyncpa [#allocation10 + $0x1], 0 }
  0x16   :  { %30 = vsyncpa [#allocation19], 0  ;;  %s3181_s0 = smov 0   ;;  %s3183_s26 = smov 0  }
  0x17   :  { %s3185_s27 = smov 0   ;;  %s3187_s28 = smov 0  }
  0x18 LB: > { %3709 = sst [smem:[#allocation54_spill]] %s3072_s0  ;;  %s3202_s29 = sadd.s32 4294967295, %s3084_s28   ;;  %s3084_s28 = sphi %s3187_s28, %s3759_s28   ;;  %s3080_s27 = sphi %s3185_s27, %s3763_s27   ;;  %s3076_s26 = sphi %s3183_s26, %s3762_s26   ;;  %s3072_s0 = sphi %s3181_s0, %s3761_s0  }
  0x19   : > { %s2014_s30 = sadd.s32 4294967294, %s3084_s28   ;;  %s3206_s13 = sadd.s32 1, %s3084_s28  }
  0x1a   : > { %3710 = sst [smem:[#allocation55_spill]] %s3206_s13  ;;  %s169_s14 = sadd.s32 1, %s3080_s27 }
  0x1b   : > { %s166_s15 = ssub.s32 %s3084_s28, %s3206_s13  ;;  %p176_p5 = scmp.ne.s32.totalorder %s3080_s27, %s3076_s26 }
  0x1c   : > { %p167_p6 = scmp.eq.s32.totalorder %s166_s15, 0  ;;  %p177_p7 = scmp.eq.s32.totalorder %s3084_s28, 0 }
  0x1d   : > { %p182_p8 = scmp.ne.s32.totalorder %s3076_s26, %s3072_s0  ;;  %p3691_p9 = scmp.eq.s32.totalorder %s3202_s29, 0 }
  0x1e   : > { %s3218_s16 = scalar_select %p167_p6, %s3080_s27, %s169_s14  }
  0x1f   : > { %p3220_p10 = por %p177_p7, %p176_p5  ;;  %p3226_p11 = por %p3691_p9, %p182_p8 }
  0x20   : > { %3711 = sst [smem:[#allocation56_spill]] %s3218_s16  ;;  %p3690_p12 = scmp.eq.s32.totalorder %s3202_s29, 1 }
  0x21   : > { %s3712_s17 = scalar_select %p3220_p10, 1, 0 }
  0x22   : > { %s3713_s18 = scalar_select %p3226_p11, 1, 0 }
  0x23   : > { %p238_p13 = scmp.eq.s32.totalorder %s2014_s30, 1  ;;  %p2015_p0 = scmp.ge.s32.totalorder %s3084_s28, 1 }
  0x24   : > { %p287_p1 = scmp.lt.s32.totalorder %s3084_s28, 3  ;;  %p3235_p2 = por %p3690_p12, %p176_p5 }
  0x25   : > { %p3239_p3 = por %p238_p13, %p182_p8  ;;  %s3087_s22 = smov [#allocation8]  }
  0x26   : > { %s3714_s19 = scalar_select %p3235_p2, 1, 0 }
  0x27   : > { %s3716_s20 = scalar_select %p3239_p3, 1, 0 }
  0x28   : > { %3715 = sst [smem:[#allocation57_spill]] %s3714_s19  ;;  %p3243_p4 = pnand %p2015_p0, %p287_p1 }
  0x29   : > { %3717 = sst [smem:[#allocation58_spill]] %s3716_s20  ;;  %s299_s23 = sshll.u32 %s3087_s22, 4  ;;  %s300_s23 = int_to_ptr.vmem [resolvable:$true] %s299_s23 }
  0x2a   : > { %s3718_s21 = scalar_select %p3243_p4, 1, 0 }
  0x2b   : > { %p2262_p7 = pneg %p3243_p4  ;;  %s3088_s25 = smov [#allocation11]  }
  0x2c   : > { %s312_s30 = sshll.u32 %s3088_s25, 4  ;;  %s3720_s2 = sld [smem:[#allocation59_spill]]  ;;  %s313_s30 = int_to_ptr.vmem [resolvable:$true] %s312_s30 }
  0x2d   : > { %p3252_p5 = pnand %p2262_p7, %p3691_p9 }
  0x2f   : > { %p3266_p1 = pneg %p3252_p5 }
  0x32   : > { %s2598_s16 = scalar_lea.hbm %s3720_s2, 256 }
  0x33   : > { %p2599_p0 = scmp.ne.s32.totalorder %s3720_s2, %s2598_s16  ;;  %p2605_p12 = scmp.lt.u32.totalorder %s2598_s16, %s3720_s2 }
  0x35   : > { %p2601_p7 = pnand %p3266_p1, %p2599_p0 }
  0x37   : > { %p2602_p8 = pneg %p2601_p7 }
  0x39   : > { %p2607_p6 = pnand %p2605_p12, %p2602_p8 }
  0x3b   : > { %2610 = shalt.err (!%p2607_p6)
}
  0x3c   : > { %s2611_s25 = scalar_lea.vmem %s300_s23, 256  ;;  %p2619_p2 = scmp.lt.s32.totalorder %s300_s23, %s300_s23 }
  0x3d   : > { %p2612_p9 = scmp.ne.s32.totalorder %s300_s23, %s2611_s25  ;;  %p2620_p11 = scmp.lt.s32.totalorder %s2611_s25, %s2611_s25 }
  0x3f   : > { %p2614_p13 = pnand %p2612_p9, %p3266_p1  ;;  %p2621_p4 = por %p2620_p11, %p2619_p2 }
  0x41   : > { %p2615_p3 = pneg %p2614_p13 }
  0x43   : > { %p2622_p10 = pnand %p2621_p4, %p2615_p3 }
  0x45   : > { %2625 = shalt.err (!%p2622_p10)
}
  0x46   : > { %s3700_s13 = smov 128   ;;  %s3090_s10 = smov 8  }
  0x47   : > { %2265 = dma.hbm_to_vmem [thread:$0]  (!%p3252_p5), %s3720_s2, 256, %s300_s23, [#allocation9], %s3700_s13, %s3700_s13, %s3090_s10  }
  0x48   : > { %p3722_p9 = scmp.ne.s32.totalorder %s3712_s17, 0  ;;  %p3723_p12 = scmp.lt.s32.totalorder %s3084_s28, 2 }
  0x49   : > { %s3725_s3 = sld [smem:[#allocation60_spill]] }
  0x4a   : > { %p3288_p6 = pnand %p3723_p12, %p3722_p9 }
  0x4c   : > { %s3724_s20 = scalar_select %p3288_p6, 1, 0 }
  0x4f   : > { %s2626_s25 = scalar_lea.hbm %s3725_s3, 256 }
  0x50   : > { %p2627_p10 = scmp.ne.s32.totalorder %s3725_s3, %s2626_s25  ;;  %p2633_p3 = scmp.lt.u32.totalorder %s2626_s25, %s3725_s3 }
  0x52   : > { %p2629_p11 = pnand %p2627_p10, %p3266_p1 }
  0x54   : > { %p2630_p2 = pneg %p2629_p11 }
  0x56   : > { %p2635_p4 = pnand %p2633_p3, %p2630_p2 }
  0x58   : > { %2638 = shalt.err (!%p2635_p4)
}
  0x59   : > { %s2639_s17 = scalar_lea.vmem %s313_s30, 256  ;;  %p2647_p7 = scmp.lt.s32.totalorder %s313_s30, %s313_s30 }
  0x5a   : > { %p2640_p8 = scmp.ne.s32.totalorder %s313_s30, %s2639_s17  ;;  %p2648_p9 = scmp.lt.s32.totalorder %s2639_s17, %s2639_s17 }
  0x5c   : > { %p2642_p13 = pnand %p2640_p8, %p3266_p1  ;;  %p2649_p12 = por %p2648_p9, %p2647_p7 }
  0x5e   : > { %p2643_p0 = pneg %p2642_p13 }
  0x60   : > { %p2650_p6 = pnand %p2649_p12, %p2643_p0 }
  0x62   : > { %2653 = shalt.err (!%p2650_p6)
}
  0x63   : > { %2268 = dma.hbm_to_vmem [thread:$0]  (!%p3252_p5), %s3725_s3, 256, %s313_s30, [#allocation12], %s3700_s13, %s3700_s13, %s3090_s10  }
  0x64   : > { %s3091_s16 = smov [#allocation13]   ;;  %s3726_s4 = sld [smem:[#allocation61_spill]] }
  0x65   : > { %s325_s14 = sshll.u32 %s3091_s16, 4  ;;  %s326_s14 = int_to_ptr.vmem [resolvable:$true] %s325_s14 }
  0x6a   : > { %s2654_s0 = scalar_lea.hbm %s3726_s4, 8192 }
  0x6b   : > { %p2655_p6 = scmp.ne.s32.totalorder %s3726_s4, %s2654_s0  ;;  %p2661_p2 = scmp.lt.u32.totalorder %s2654_s0, %s3726_s4 }
  0x6d   : > { %p2657_p10 = pnand %p2655_p6, %p3266_p1 }
  0x6f   : > { %p2658_p11 = pneg %p2657_p10 }
  0x71   : > { %p2663_p3 = pnand %p2661_p2, %p2658_p11 }
  0x73   : > { %2666 = shalt.err (!%p2663_p3)
}
  0x74   : > { %s2667_s30 = scalar_lea.vmem %s326_s14, 8192  ;;  %p2675_p0 = scmp.lt.s32.totalorder %s326_s14, %s326_s14 }
  0x75   : > { %p2668_p4 = scmp.ne.s32.totalorder %s326_s14, %s2667_s30  ;;  %p2676_p7 = scmp.lt.s32.totalorder %s2667_s30, %s2667_s30 }
  0x77   : > { %p2670_p8 = pnand %p2668_p4, %p3266_p1  ;;  %p2677_p9 = por %p2676_p7, %p2675_p0 }
  0x79   : > { %p2671_p13 = pneg %p2670_p8 }
  0x7b   : > { %p2678_p12 = pnand %p2677_p9, %p2671_p13 }
  0x7d   : > { %2681 = shalt.err (!%p2678_p12)
}
  0x7e   : > { %s3092_s10 = smov 256   ;;  %s3093_s2 = smov 16  }
  0x7f   : > { %2271 = dma.hbm_to_vmem [thread:$0]  (!%p3252_p5), %s3726_s4, 8192, %s326_s14, [#allocation12], %s3092_s10, %s3092_s10, %s3093_s2  }
  0x80   : > { %s358_s19 = sand.u32 1, %s3084_s28   ;;  %s3094_s16 = smov [#allocation14]  }
  0x81   : > { %s341_s15 = sshll.u32 %s3094_s16, 4  ;;  %s360_s25 = sand.u32 1, %s3080_s27   ;;  %s342_s15 = int_to_ptr.vmem [resolvable:$true] %s341_s15 }
  0x82   : > { %s3727_s6 = sld [smem:[#allocation62_spill]] }
  0x88   : > { %s2682_s17 = scalar_lea.hbm %s3727_s6, 8192 }
  0x89   : > { %p2683_p6 = scmp.ne.s32.totalorder %s3727_s6, %s2682_s17  ;;  %p2689_p2 = scmp.lt.u32.totalorder %s2682_s17, %s3727_s6 }
  0x8b   : > { %p2685_p10 = pnand %p2683_p6, %p3266_p1 }
  0x8d   : > { %p2686_p11 = pneg %p2685_p10 }
  0x8f   : > { %p2691_p3 = pnand %p2689_p2, %p2686_p11 }
  0x91   : > { %2694 = shalt.err (!%p2691_p3)
}
  0x92   : > { %s2695_s14 = scalar_lea.vmem %s342_s15, 8192  ;;  %p2703_p0 = scmp.lt.s32.totalorder %s342_s15, %s342_s15 }
  0x93   : > { %p2696_p4 = scmp.ne.s32.totalorder %s342_s15, %s2695_s14  ;;  %p2704_p7 = scmp.lt.s32.totalorder %s2695_s14, %s2695_s14 }
  0x95   : > { %p2698_p8 = pnand %p2696_p4, %p3266_p1  ;;  %p2705_p9 = por %p2704_p7, %p2703_p0 }
  0x97   : > { %p2699_p13 = pneg %p2698_p8 }
  0x99   : > { %p2706_p12 = pnand %p2705_p9, %p2699_p13 }
  0x9b   : > { %2709 = shalt.err (!%p2706_p12)
}
  0x9c   : > { %2274 = dma.hbm_to_vmem [thread:$0]  (!%p3252_p5), %s3727_s6, 8192, %s342_s15, [#allocation15], %s3092_s10, %s3092_s10, %s3093_s2  }
  0x9d   : > { %s2021_s3 = sshll.u32 %s360_s25, 6  ;;  %s2022_s7 = sshll.u32 %s3084_s28, 6 }
  0x9e   : > { %s3354_s16 = scalar_lea.hbm %s3680_s8, %s2022_s7  ;;  %s362_s0 = scalar_lea.vmem [#allocation16], %s2021_s3 }
  0x9f   : > { %s368_s24 = sshll.u32 %s362_s0, 4  ;;  %s3358_s23 = scalar_lea.sflag [#allocation9], %s358_s19  ;;  %s3356_s24 = int_to_ptr.vmem [resolvable:$true] %s368_s24 }
  0xa0   : > { %s2710_s17 = scalar_lea.hbm %s3354_s16, 1024  ;;  %p3728_p5 = scmp.ne.s32.totalorder %s3724_s20, 0 }
  0xa1   : > { %p2711_p1 = scmp.ne.s32.totalorder %s3354_s16, %s2710_s17  ;;  %s2715_s15 = scalar_lea.hbm %s3680_s8, 2048 }
  0xa2   : > { %p2712_p6 = pneg %p3728_p5  ;;  %p2716_p2 = scmp.lt.u32.totalorder %s3354_s16, %s3680_s8 }
  0xa3   : > { %p2717_p3 = scmp.lt.u32.totalorder %s2715_s15, %s2710_s17  ;;  %p2719_p8 = scmp.lt.u32.totalorder %s2710_s17, %s3354_s16 }
  0xa4   : > { %p2713_p10 = pnand %p2712_p6, %p2711_p1 }
  0xa5   : > { %p2718_p4 = por %p2717_p3, %p2716_p2 }
  0xa6   : > { %p2714_p11 = pneg %p2713_p10 }
  0xa7   : > { %p2720_p13 = por %p2719_p8, %p2718_p4 }
  0xa9   : > { %p2721_p0 = pnand %p2720_p13, %p2714_p11 }
  0xab   : > { %2724 = shalt.err (!%p2721_p0)
}
  0xac   : > { %s2725_s19 = scalar_lea.vmem %s3356_s24, 1024  ;;  %s3095_s14 = smov [#allocation16]  }
  0xad   : > { %p2726_p7 = scmp.ne.s32.totalorder %s3356_s24, %s2725_s19  ;;  %s2730_s13 = sshll.u32 %s3095_s14, 4  ;;  %s2731_s13 = int_to_ptr.vmem [resolvable:$false] %s2730_s13 }
  0xae   : > { %s2732_s11 = scalar_lea.vmem %s2731_s13, 2048  ;;  %p2733_p1 = scmp.lt.s32.totalorder %s3356_s24, %s2731_s13 }
  0xaf   : > { %p2728_p9 = pnand %p2726_p7, %p2712_p6  ;;  %p2734_p10 = scmp.lt.s32.totalorder %s2732_s11, %s2725_s19 }
  0xb1   : > { %p2729_p12 = pneg %p2728_p9  ;;  %p2735_p2 = por %p2734_p10, %p2733_p1 }
  0xb3   : > { %p2736_p3 = pnand %p2735_p2, %p2729_p12 }
  0xb5   : > { %2739 = shalt.err (!%p2736_p3)
}
  0xb6   : > { %s3096_s3 = smov 64   ;;  %s3097_s7 = smov 4  }
  0xb7   : > { %s3729_s12 = smov 128   ;;  %p3730_p6 = scmp.ne.s32.totalorder %s3718_s21, 0 }
  0xb8   : > { %2278 = dma.hbm_to_vmem [thread:$0]  (!%p3728_p5), %s3354_s16, 1024, %s3356_s24, %s3358_s23, %s3729_s12, %s3096_s3, %s3097_s7  }
  0xb9   : > { %386 = sbr.rel (%p3730_p6) target bundleno = 1251 (0x4e3), region = 52  ;;  %p3731_p11 = scmp.eq.s32.totalorder (!%p3730_p6), %s3202_s29, 0 }
  0xc0   : > { %3031 = dma.done.wait (%p3731_p11), [#allocation9], 256   ;;  %p3732_p4 = pmov %p3731_p11 }
  0xc2   : > { %3033 = vsyncadd (%p3732_p4), [#allocation9], 4294967040  ;;  %p3733_p8 = pmov %p3732_p4 }
  0xc3   : > { %p3734_p13 = pmov %p3732_p4 }
  0xc4   : > { %3035 = dma.done.wait (%p3733_p8), [#allocation12], 8448  }
  0xc5   : > { %3037 = vsyncadd (%p3734_p13), [#allocation12], 4294958848  ;;  %p3735_p0 = pmov %p3732_p4 }
  0xc7   : > { %3039 = dma.done.wait (%p3735_p0), [#allocation15], 8192   ;;  %p3736_p5 = pmov %p3735_p0 }
  0xc8   : > { %s404_s21 = sand.u32 1, %s3202_s29   ;;  %s3403_s20 = sand.u32 1, %s3076_s26  }
  0xc9   : > { %3041 = vsyncadd (%p3736_p5), [#allocation15], 4294959104  ;;  %s2028_s22 = sshll.u32 %s3403_s20, 6  ;;  %s405_s16 = scalar_lea.sflag [#allocation9], %s404_s21 }
  0xca   : > { %s3406_s0 = scalar_lea.vmem [#allocation16], %s2028_s22  ;;  %p3737_p7 = scmp.ne.s32.totalorder %s3713_s18, 0 }
  0xcc   : > { %3043 = dma.done.wait (%p3737_p7), %s405_s16, 1024  }
  0xcd   : > { %3045 = vsyncadd (%p3737_p7), %s405_s16, 4294966272  ;;  %s2029_s24 = sshll.u32 %s3403_s20, 3  ;;  %p448_p9 = scmp.lt.s32.totalorder %s3202_s29, 1 }
  0xce   : > { %s3421_s15 = scalar_lea.vmem [#allocation17], %s2029_s24  ;;  %p3738_p12 = scmp.ne.s32.totalorder %s3202_s29, 0 }
  0xcf   : > { %s3415_s23 = scalar_select %p448_p9, %s3202_s29, 1 }
  0xd0   : > { %455 = sbr.rel (%p3738_p12) target bundleno = 985 (0x3d9), region = 76  ;;  %s456_s25 = sld [smem:[#allocation7]] (!%p3738_p12) }
  0xd1   : > { %s3098_s18 = smov (!%p3738_p12), [#allocation4]   ;;  %s3425_s19 = sld [smem:[#allocation7 + $0x1]] (!%p3738_p12) }
  0xd2   : > { %s473_s30 = sshll.u32 (!%p3738_p12), %s3098_s18, 4  ;;  %s3099_s14 = smov (!%p3738_p12), [#allocation4 + $0x1]   ;;  %s3427_s30 = int_to_ptr.vmem [resolvable:$true] %s473_s30 }
  0xd3   : > { %s488_s13 = sshll.u32 (!%p3738_p12), %s3099_s14, 4  ;;  %s3429_s11 = sld [smem:[#allocation7 + $0x2]] (!%p3738_p12)  ;;  %s3431_s13 = int_to_ptr.vmem [resolvable:$true] %s488_s13 }
  0xd4   : > { %s3100_s3 = smov (!%p3738_p12), [#allocation4 + $0x2]   ;;  %s3433_s12 = sld [smem:[#allocation7 + $0x3]] (!%p3738_p12) }
  0xd5   : > { %s503_s7 = sshll.u32 (!%p3738_p12), %s3100_s3, 4  ;;  %s3444_s2 = scalar_lea.hbm (!%p3738_p12), %s3673_s1, 4096  ;;  %s3435_s7 = int_to_ptr.vmem [resolvable:$true] %s503_s7 }
  0xd6   : > { %s2038_s21 = sshll.u32 (!%p3738_p12), %s456_s25, 4 }
  0xd7   : > { %s465_s24 = scalar_lea.hbm %s3673_s1, %s2038_s21  ;;  %s2039_s17 = sshll.u32 %s3425_s19, 4 }
  0xd8   : > { %s2740_s10 = scalar_lea.hbm %s465_s24, 16  ;;  %p2743_p10 = scmp.lt.u32.totalorder %s465_s24, %s3673_s1 }
  0xd9   : > { %p2741_p1 = scmp.ne.s32.totalorder %s465_s24, %s2740_s10  ;;  %p2744_p2 = scmp.lt.u32.totalorder %s3444_s2, %s2740_s10 }
  0xda   : > { %p2746_p6 = scmp.lt.u32.totalorder %s2740_s10, %s465_s24 }
  0xdb   : > { %p2745_p3 = por %p2744_p2, %p2743_p10 }
  0xdd   : > { %p2747_p11 = por %p2746_p6, %p2745_p3 }
  0xdf   : > { %p2748_p4 = pnand %p2747_p11, %p2741_p1 }
  0xe1   : > { %2751 = shalt.err (!%p2748_p4)  }
  0xe2   : > { %s2752_s25 = scalar_lea.vmem %s3427_s30, 16  ;;  %s3453_s19 = scalar_lea.vmem %s3427_s30, 128 }
  0xe3   : > { %p2753_p8 = scmp.ne.s32.totalorder %s3427_s30, %s2752_s25  ;;  %p2757_p13 = scmp.lt.s32.totalorder %s3427_s30, %s3427_s30 }
  0xe4   : > { %p2758_p0 = scmp.lt.s32.totalorder %s3453_s19, %s2752_s25 }
  0xe6   : > { %p2759_p5 = por %p2758_p0, %p2757_p13 }
  0xe8   : > { %p2760_p7 = pnand %p2759_p5, %p2753_p8 }
  0xea   : > { %2763 = shalt.err (!%p2760_p7)  }
  0xeb   : > { %476 = dma.hbm_to_vmem [thread:$0]  %s465_s24, 16, %s3427_s30, [#allocation5] }
  0xec   : > { %s478_s3 = scalar_lea.hbm %s3673_s1, %s2039_s17  ;;  %s2040_s21 = sshll.u32 %s3429_s11, 4 }
  0xed   : > { %s2764_s22 = scalar_lea.hbm %s478_s3, 16  ;;  %p2767_p12 = scmp.lt.u32.totalorder %s478_s3, %s3673_s1 }
  0xee   : > { %p2765_p9 = scmp.ne.s32.totalorder %s478_s3, %s2764_s22  ;;  %p2768_p1 = scmp.lt.u32.totalorder %s3444_s2, %s2764_s22 }
  0xef   : > { %p2770_p2 = scmp.lt.u32.totalorder %s2764_s22, %s478_s3 }
  0xf0   : > { %p2769_p10 = por %p2768_p1, %p2767_p12 }
  0xf2   : > { %p2771_p3 = por %p2770_p2, %p2769_p10 }
  0xf4   : > { %p2772_p6 = pnand %p2771_p3, %p2765_p9 }
  0xf6   : > { %2775 = shalt.err (!%p2772_p6)  }
  0xf7   : > { %s2776_s24 = scalar_lea.vmem %s3431_s13, 16  ;;  %p2781_p4 = scmp.lt.s32.totalorder %s3431_s13, %s3427_s30 }
  0xf8   : > { %p2777_p11 = scmp.ne.s32.totalorder %s3431_s13, %s2776_s24  ;;  %p2782_p8 = scmp.lt.s32.totalorder %s3453_s19, %s2776_s24 }
  0xfa   : > { %p2783_p13 = por %p2782_p8, %p2781_p4 }
  0xfc   : > { %p2784_p0 = pnand %p2783_p13, %p2777_p11 }
  0xfe   : > { %2787 = shalt.err (!%p2784_p0)  }
  0xff   : > { %491 = dma.hbm_to_vmem [thread:$0]  %s478_s3, 16, %s3431_s13, [#allocation5 + $0x1] }
 0x100   : > { %s493_s18 = scalar_lea.hbm %s3673_s1, %s2040_s21  ;;  %s2041_s14 = sshll.u32 %s3433_s12, 4 }
 0x101   : > { %s2788_s25 = scalar_lea.hbm %s493_s18, 16  ;;  %p2791_p7 = scmp.lt.u32.totalorder %s493_s18, %s3673_s1 }
 0x102   : > { %p2789_p5 = scmp.ne.s32.totalorder %s493_s18, %s2788_s25  ;;  %p2792_p9 = scmp.lt.u32.totalorder %s3444_s2, %s2788_s25 }
 0x103   : > { %p2794_p1 = scmp.lt.u32.totalorder %s2788_s25, %s493_s18 }
 0x104   : > { %p2793_p12 = por %p2792_p9, %p2791_p7 }
 0x106   : > { %p2795_p10 = por %p2794_p1, %p2793_p12 }
 0x108   : > { %p2796_p2 = pnand %p2795_p10, %p2789_p5 }
 0x10a   : > { %2799 = shalt.err (!%p2796_p2)  }
 0x10b   : > { %s2800_s13 = scalar_lea.vmem %s3435_s7, 16  ;;  %p2805_p6 = scmp.lt.s32.totalorder %s3435_s7, %s3427_s30 }
 0x10c   : > { %p2801_p3 = scmp.ne.s32.totalorder %s3435_s7, %s2800_s13  ;;  %p2806_p11 = scmp.lt.s32.totalorder %s3453_s19, %s2800_s13 }
 0x10e   : > { %p2807_p4 = por %p2806_p11, %p2805_p6 }
 0x110   : > { %p2808_p8 = pnand %p2807_p4, %p2801_p3 }
 0x112   : > { %2811 = shalt.err (!%p2808_p8)  }
 0x113   : > { %506 = dma.hbm_to_vmem [thread:$0]  %s493_s18, 16, %s3435_s7, [#allocation5 + $0x2] }
 0x114   : > { %s508_s21 = scalar_lea.hbm %s3673_s1, %s2041_s14  ;;  %s3101_s22 = smov [#allocation4 + $0x3]  }
 0x115   : > { %s518_s16 = sshll.u32 %s3101_s22, 4  ;;  %s3490_s10 = sld [smem:[#allocation7 + $0x4]]  ;;  %s519_s16 = int_to_ptr.vmem [resolvable:$true] %s518_s16 }
 0x116   : > { %s2812_s24 = scalar_lea.hbm %s508_s21, 16  ;;  %p2815_p0 = scmp.lt.u32.totalorder %s508_s21, %s3673_s1 }
 0x117   : > { %p2813_p13 = scmp.ne.s32.totalorder %s508_s21, %s2812_s24  ;;  %p2816_p5 = scmp.lt.u32.totalorder %s3444_s2, %s2812_s24 }
 0x118   : > { %p2818_p9 = scmp.lt.u32.totalorder %s2812_s24, %s508_s21 }
 0x119   : > { %p2817_p7 = por %p2816_p5, %p2815_p0 }
 0x11b   : > { %p2819_p12 = por %p2818_p9, %p2817_p7 }
 0x11d   : > { %p2820_p1 = pnand %p2819_p12, %p2813_p13 }
 0x11f   : > { %2823 = shalt.err (!%p2820_p1)  }
 0x120   : > { %s2824_s7 = scalar_lea.vmem %s519_s16, 16  ;;  %p2829_p2 = scmp.lt.s32.totalorder %s519_s16, %s3427_s30 }
 0x121   : > { %p2825_p10 = scmp.ne.s32.totalorder %s519_s16, %s2824_s7  ;;  %p2830_p3 = scmp.lt.s32.totalorder %s3453_s19, %s2824_s7 }
 0x123   : > { %p2831_p6 = por %p2830_p3, %p2829_p2 }
 0x125   : > { %p2832_p11 = pnand %p2831_p6, %p2825_p10 }
 0x127   : > { %2835 = shalt.err (!%p2832_p11)  }
 0x128   : > { %521 = dma.hbm_to_vmem [thread:$0]  %s508_s21, 16, %s519_s16, [#allocation5 + $0x3] }
 0x129   : > { %s3102_s18 = smov [#allocation4 + $0x4]   ;;  %s3498_s25 = sld [smem:[#allocation7 + $0x5]] }
 0x12a   : > { %s533_s14 = sshll.u32 %s3102_s18, 4  ;;  %s3103_s4 = smov [#allocation4 + $0x5]   ;;  %s534_s14 = int_to_ptr.vmem [resolvable:$true] %s533_s14 }
 0x12b   : > { %s548_s6 = sshll.u32 %s3103_s4, 4  ;;  %s3500_s13 = sld [smem:[#allocation7 + $0x6]]  ;;  %s3503_s6 = int_to_ptr.vmem [resolvable:$true] %s548_s6 }
 0x12c   : > { %s2042_s12 = sshll.u32 %s3490_s10, 4 }
 0x12d   : > { %s523_s24 = scalar_lea.hbm %s3673_s1, %s2042_s12 }
 0x12e   : > { %s2836_s11 = scalar_lea.hbm %s523_s24, 16  ;;  %p2839_p8 = scmp.lt.u32.totalorder %s523_s24, %s3673_s1 }
 0x12f   : > { %p2837_p4 = scmp.ne.s32.totalorder %s523_s24, %s2836_s11  ;;  %p2840_p13 = scmp.lt.u32.totalorder %s3444_s2, %s2836_s11 }
 0x130   : > { %p2842_p5 = scmp.lt.u32.totalorder %s2836_s11, %s523_s24 }
 0x131   : > { %p2841_p0 = por %p2840_p13, %p2839_p8 }
 0x133   : > { %p2843_p7 = por %p2842_p5, %p2841_p0 }
 0x135   : > { %p2844_p9 = pnand %p2843_p7, %p2837_p4 }
 0x137   : > { %2847 = shalt.err (!%p2844_p9)  }
 0x138   : > { %s2848_s17 = scalar_lea.vmem %s534_s14, 16  ;;  %p2853_p1 = scmp.lt.s32.totalorder %s534_s14, %s3427_s30 }
 0x139   : > { %p2849_p12 = scmp.ne.s32.totalorder %s534_s14, %s2848_s17  ;;  %p2854_p10 = scmp.lt.s32.totalorder %s3453_s19, %s2848_s17 }
 0x13b   : > { %p2855_p2 = por %p2854_p10, %p2853_p1 }
 0x13d   : > { %p2856_p3 = pnand %p2855_p2, %p2849_p12 }
 0x13f   : > { %2859 = shalt.err (!%p2856_p3)  }
 0x140   : > { %536 = dma.hbm_to_vmem [thread:$0]  %s523_s24, 16, %s534_s14, [#allocation5 + $0x4] }
 0x141   : > { %s2043_s10 = sshll.u32 %s3498_s25, 4  ;;  %s3104_s7 = smov [#allocation4 + $0x6]  }
 0x142   : > { %s563_s18 = sshll.u32 %s3104_s7, 4  ;;  %s538_s3 = scalar_lea.hbm %s3673_s1, %s2043_s10  ;;  %s3518_s18 = int_to_ptr.vmem [resolvable:$true] %s563_s18 }
 0x143   : > { %s2860_s22 = scalar_lea.hbm %s538_s3, 16  ;;  %p2863_p11 = scmp.lt.u32.totalorder %s538_s3, %s3673_s1 }
 0x144   : > { %p2861_p6 = scmp.ne.s32.totalorder %s538_s3, %s2860_s22  ;;  %p2864_p4 = scmp.lt.u32.totalorder %s3444_s2, %s2860_s22 }
 0x145   : > { %p2866_p13 = scmp.lt.u32.totalorder %s2860_s22, %s538_s3 }
 0x146   : > { %p2865_p8 = por %p2864_p4, %p2863_p11 }
 0x148   : > { %p2867_p0 = por %p2866_p13, %p2865_p8 }
 0x14a   : > { %p2868_p5 = pnand %p2867_p0, %p2861_p6 }
 0x14c   : > { %2871 = shalt.err (!%p2868_p5)  }
 0x14d   : > { %s2872_s14 = scalar_lea.vmem %s3503_s6, 16  ;;  %p2877_p9 = scmp.lt.s32.totalorder %s3503_s6, %s3427_s30 }
 0x14e   : > { %p2873_p7 = scmp.ne.s32.totalorder %s3503_s6, %s2872_s14  ;;  %p2878_p12 = scmp.lt.s32.totalorder %s3453_s19, %s2872_s14 }
 0x150   : > { %p2879_p1 = por %p2878_p12, %p2877_p9 }
 0x152   : > { %p2880_p10 = pnand %p2879_p1, %p2873_p7 }
 0x154   : > { %2883 = shalt.err (!%p2880_p10)  }
 0x155   : > { %551 = dma.hbm_to_vmem [thread:$0]  %s538_s3, 16, %s3503_s6, [#allocation5 + $0x5] }
 0x156   : > { %s2044_s25 = sshll.u32 %s3500_s13, 4  ;;  %s2037_s24 = sld [smem:[#allocation7 + $0x7]] }
 0x157   : > { %s553_s10 = scalar_lea.hbm %s3673_s1, %s2044_s25 }
 0x158   : > { %s2884_s7 = scalar_lea.hbm %s553_s10, 16  ;;  %p2887_p3 = scmp.lt.u32.totalorder %s553_s10, %s3673_s1 }
 0x159   : > { %p2885_p2 = scmp.ne.s32.totalorder %s553_s10, %s2884_s7  ;;  %p2888_p6 = scmp.lt.u32.totalorder %s3444_s2, %s2884_s7 }
 0x15a   : > { %p2890_p4 = scmp.lt.u32.totalorder %s2884_s7, %s553_s10 }
 0x15b   : > { %p2889_p11 = por %p2888_p6, %p2887_p3 }
 0x15d   : > { %p2891_p8 = por %p2890_p4, %p2889_p11 }
 0x15f   : > { %p2892_p13 = pnand %p2891_p8, %p2885_p2 }
 0x161   : > { %2895 = shalt.err (!%p2892_p13)  }
 0x162   : > { %s2896_s6 = scalar_lea.vmem %s3518_s18, 16  ;;  %p2901_p5 = scmp.lt.s32.totalorder %s3518_s18, %s3427_s30 }
 0x163   : > { %p2897_p0 = scmp.ne.s32.totalorder %s3518_s18, %s2896_s6  ;;  %p2902_p7 = scmp.lt.s32.totalorder %s3453_s19, %s2896_s6 }
 0x165   : > { %p2903_p9 = por %p2902_p7, %p2901_p5 }
 0x167   : > { %p2904_p12 = pnand %p2903_p9, %p2897_p0 }
 0x169   : > { %2907 = shalt.err (!%p2904_p12)  }
 0x16a   : > { %566 = dma.hbm_to_vmem [thread:$0]  %s553_s10, 16, %s3518_s18, [#allocation5 + $0x6] }
 0x16b   : > { %s3105_s13 = smov [#allocation4 + $0x7]   ;;  %s2045_s22 = sshll.u32 %s2037_s24, 4 }
 0x16c   : > { %s578_s3 = sshll.u32 %s3105_s13, 4  ;;  %s568_s14 = scalar_lea.hbm %s3673_s1, %s2045_s22  ;;  %s579_s3 = int_to_ptr.vmem [resolvable:$true] %s578_s3 }
 0x16d   : > { %s2908_s25 = scalar_lea.hbm %s568_s14, 16  ;;  %p2911_p10 = scmp.lt.u32.totalorder %s568_s14, %s3673_s1 }
 0x16e   : > { %p2909_p1 = scmp.ne.s32.totalorder %s568_s14, %s2908_s25  ;;  %p2912_p2 = scmp.lt.u32.totalorder %s3444_s2, %s2908_s25 }
 0x16f   : > { %p2914_p6 = scmp.lt.u32.totalorder %s2908_s25, %s568_s14 }
 0x170   : > { %p2913_p3 = por %p2912_p2, %p2911_p10 }
 0x172   : > { %p2915_p11 = por %p2914_p6, %p2913_p3 }
 0x174   : > { %p2916_p4 = pnand %p2915_p11, %p2909_p1 }
 0x176   : > { %2919 = shalt.err (!%p2916_p4)  }
 0x177   : > { %s2920_s18 = scalar_lea.vmem %s579_s3, 16  ;;  %p2925_p13 = scmp.lt.s32.totalorder %s579_s3, %s3427_s30 }
 0x178   : > { %p2921_p8 = scmp.ne.s32.totalorder %s579_s3, %s2920_s18  ;;  %p2926_p0 = scmp.lt.s32.totalorder %s3453_s19, %s2920_s18 }
 0x17a   : > { %p2927_p5 = por %p2926_p0, %p2925_p13 }
 0x17c   : > { %p2928_p7 = pnand %p2927_p5, %p2921_p8 }
 0x17e   : > { %2931 = shalt.err (!%p2928_p7)  }
 0x17f   : > { %581 = dma.hbm_to_vmem [thread:$0]  %s568_s14, 16, %s579_s3, [#allocation5 + $0x7] }
 0x180   : > { %3046 = dma.done.wait [#allocation5], 16 }
 0x181   : > { %3047 = vsyncadd [#allocation5], 4294967280 }
 0x182   : > { %3048 = dma.done.wait [#allocation5 + $0x1], 16 }
 0x183   : > { %3049 = vsyncadd [#allocation5 + $0x1], 4294967280 }
 0x184   : > { %3050 = dma.done.wait [#allocation5 + $0x2], 16 }
 0x185   : > { %3051 = vsyncadd [#allocation5 + $0x2], 4294967280 }
 0x186   : > { %3052 = dma.done.wait [#allocation5 + $0x3], 16 }
 0x187   : > { %3053 = vsyncadd [#allocation5 + $0x3], 4294967280 }
 0x188   : > { %3054 = dma.done.wait [#allocation5 + $0x4], 16 }
 0x189   : > { %3055 = vsyncadd [#allocation5 + $0x4], 4294967280 }
 0x18a   : > { %3056 = dma.done.wait [#allocation5 + $0x5], 16 }
 0x18b   : > { %3057 = vsyncadd [#allocation5 + $0x5], 4294967280 }
 0x18c   : > { %3058 = dma.done.wait [#allocation5 + $0x6], 16 }
 0x18d   : > { %3059 = vsyncadd [#allocation5 + $0x6], 4294967280 }
 0x18e   : > { %3060 = dma.done.wait [#allocation5 + $0x7], 16 }
 0x18f   : > { %3061 = vsyncadd [#allocation5 + $0x7], 4294967280  ;;  %v2354_v0 = vld [vmem:[#allocation13 + $0x4] ss:$16 sps:$4 sm:$0xff]   ;;  %v2356_v1 = vld [vmem:[#allocation13] ss:$16 sps:$4 sm:$0xff]  }
 0x190   : > { %1013 = vmatprep.subr.bf16.mxu0 %v2354_v0  ;;  %v2357_v2 = vld [vmem:[#allocation13 + $0x24] ss:$16 sps:$4 sm:$0xff]   ;;  %v2359_v3 = vld [vmem:[#allocation13 + $0x20] ss:$16 sps:$4 sm:$0xff]   ;;  %v2365_v5 = vld [vmem:[#allocation13 + $0xc] ss:$16 sps:$4 sm:$0xff]  }
 0x191   : > { %1014 = vmatpush1.bf16.msra.mxu0 %v2356_v1  ;;  %v2360_v4 = vld [vmem:[#allocation13 + $0x44] ss:$16 sps:$4 sm:$0xff]   ;;  %v2368_v6 = vld [vmem:[#allocation13 + $0x8] ss:$16 sps:$4 sm:$0xff]   ;;  %v2362_v7 = vld [vmem:[#allocation13 + $0x40] ss:$16 sps:$4 sm:$0xff]   ;;  %1054 = vmatprep.subr.bf16.mxu1 %v2365_v5 }
 0x192   : > { %1015 = vmatprep.subr.bf16.mxu0 %v2357_v2  ;;  %v2363_v8 = vld [vmem:[#allocation13 + $0x64] ss:$16 sps:$4 sm:$0xff]   ;;  %1055 = vmatpush1.bf16.msra.mxu1 %v2368_v6  ;;  %v2371_v9 = vld [vmem:[#allocation13 + $0x2c] ss:$16 sps:$4 sm:$0xff]   ;;  %v2374_v10 = vld [vmem:[#allocation13 + $0x28] ss:$16 sps:$4 sm:$0xff]  }
 0x193   : > { %1056 = vmatprep.subr.bf16.mxu1 %v2371_v9  ;;  %v2367_v11 = vld [vmem:[#allocation13 + $0x60] ss:$16 sps:$4 sm:$0xff]   ;;  %v2369_v12 = vld [vmem:[#allocation13 + $0x84] ss:$16 sps:$4 sm:$0xff]   ;;  %v2377_v13 = vld [vmem:[#allocation13 + $0x4c] ss:$16 sps:$4 sm:$0xff]  }
 0x194   : > { %v2380_v14 = vld [vmem:[#allocation13 + $0x48] ss:$16 sps:$4 sm:$0xff]   ;;  %v2383_v15 = vld [vmem:[#allocation13 + $0x6c] ss:$16 sps:$4 sm:$0xff]   ;;  %v2373_v16 = vld [vmem:[#allocation13 + $0x80] ss:$16 sps:$4 sm:$0xff]  }
 0x195   : > { %1016 = vmatpush1.bf16.msra.mxu0 %v2359_v3  ;;  %v2375_v17 = vld [vmem:[#allocation13 + $0xa4] ss:$16 sps:$4 sm:$0xff]   ;;  %v2386_v18 = vld [vmem:[#allocation13 + $0x68] ss:$16 sps:$4 sm:$0xff]   ;;  %v2389_v19 = vld [vmem:[#allocation13 + $0x8c] ss:$16 sps:$4 sm:$0xff]  }
 0x196   : > { %1017 = vmatprep.subr.bf16.mxu0 %v2360_v4  ;;  %1057 = vmatpush1.bf16.msra.mxu1 %v2374_v10  ;;  %v2379_v20 = vld [vmem:[#allocation13 + $0xa0] ss:$16 sps:$4 sm:$0xff]   ;;  %v2381_v21 = vld [vmem:[#allocation13 + $0xc4] ss:$16 sps:$4 sm:$0xff]   ;;  %v2392_v22 = vld [vmem:[#allocation13 + $0x88] ss:$16 sps:$4 sm:$0xff]  }
 0x197   : > { %1058 = vmatprep.subr.bf16.mxu1 %v2377_v13  ;;  %v2395_v23 = vld [vmem:[#allocation13 + $0xac] ss:$16 sps:$4 sm:$0xff]   ;;  %v2385_v24 = vld [vmem:[#allocation13 + $0xc0] ss:$16 sps:$4 sm:$0xff]   ;;  %v2387_v25 = vld [vmem:[#allocation13 + $0xe4] ss:$16 sps:$4 sm:$0xff]  }
 0x198   : > { %v2398_v26 = vld [vmem:[#allocation13 + $0xa8] ss:$16 sps:$4 sm:$0xff]   ;;  %v2401_v27 = vld [vmem:[#allocation13 + $0xcc] ss:$16 sps:$4 sm:$0xff]   ;;  %v2391_v28 = vld [vmem:[#allocation13 + $0xe0] ss:$16 sps:$4 sm:$0xff]  }
 0x199   : > { %1018 = vmatpush1.bf16.msra.mxu0 %v2362_v7  ;;  %v2393_v29 = vld [vmem:[#allocation13 + $0x104] ss:$16 sps:$4 sm:$0xff]   ;;  %v2404_v30 = vld [vmem:[#allocation13 + $0xc8] ss:$16 sps:$4 sm:$0xff]   ;;  %v2407_v31 = vld [vmem:[#allocation13 + $0xec] ss:$16 sps:$4 sm:$0xff]  }
 0x19a   : > { %1019 = vmatprep.subr.bf16.mxu0 %v2363_v8  ;;  %1059 = vmatpush1.bf16.msra.mxu1 %v2380_v14  ;;  %v2397_v32 = vld [vmem:[#allocation13 + $0x100] ss:$16 sps:$4 sm:$0xff]   ;;  %v2399_v33 = vld [vmem:[#allocation13 + $0x124] ss:$16 sps:$4 sm:$0xff]   ;;  %v2410_v34 = vld [vmem:[#allocation13 + $0xe8] ss:$16 sps:$4 sm:$0xff]  }
 0x19b   : > { %1060 = vmatprep.subr.bf16.mxu1 %v2383_v15  ;;  %v2413_v35 = vld [vmem:[#allocation13 + $0x10c] ss:$16 sps:$4 sm:$0xff]   ;;  %v2403_v36 = vld [vmem:[#allocation13 + $0x120] ss:$16 sps:$4 sm:$0xff]   ;;  %v2405_v37 = vld [vmem:[#allocation13 + $0x144] ss:$16 sps:$4 sm:$0xff]  }
 0x19c   : > { %v2416_v38 = vld [vmem:[#allocation13 + $0x108] ss:$16 sps:$4 sm:$0xff]   ;;  %v2419_v39 = vld [vmem:[#allocation13 + $0x12c] ss:$16 sps:$4 sm:$0xff]   ;;  %v601_v40 = vld [vmem:[#allocation8] sm:$0xff]  ;;  %s3739_s10 = sld [smem:[#allocation63_spill]] }
 0x19d   : > { %1020 = vmatpush1.bf16.msra.mxu0 %v2367_v11  ;;  %v2409_v41 = vld [vmem:[#allocation13 + $0x140] ss:$16 sps:$4 sm:$0xff]   ;;  %v606_v42 = vpack.c.bf16 %v601_v40, %v601_v40  ;;  %v2411_v43 = vld [vmem:[#allocation13 + $0x164] ss:$16 sps:$4 sm:$0xff]   ;;  %v2422_v44 = vld [vmem:[#allocation13 + $0x128] ss:$16 sps:$4 sm:$0xff]  }
 0x19e   : > { %1021 = vmatprep.subr.bf16.mxu0 %v2369_v12  ;;  %1061 = vmatpush1.bf16.msra.mxu1 %v2386_v18  ;;  %v2425_v45 = vld [vmem:[#allocation13 + $0x14c] ss:$16 sps:$4 sm:$0xff]   ;;  %v2415_v46 = vld [vmem:[#allocation13 + $0x160] ss:$16 sps:$4 sm:$0xff]   ;;  %v2417_v47 = vld [vmem:[#allocation13 + $0x184] ss:$16 sps:$4 sm:$0xff]  }
 0x19f   : > { %1062 = vmatprep.subr.bf16.mxu1 %v2389_v19  ;;  %1045 = vmatprep.mubr.bf16.mxu0 %v606_v42  ;;  %v2428_v48 = vld [vmem:[#allocation13 + $0x148] ss:$16 sps:$4 sm:$0xff]   ;;  %v2431_v49 = vld [vmem:[#allocation13 + $0x16c] ss:$16 sps:$4 sm:$0xff]   ;;  %v2421_v50 = vld [vmem:[#allocation13 + $0x180] ss:$16 sps:$4 sm:$0xff]  }
 0x1a0   : > { %1086 = vmatprep.mubr.bf16.mxu1 %v606_v42  ;;  %v2423_v51 = vld [vmem:[#allocation13 + $0x1a4] ss:$16 sps:$4 sm:$0xff]   ;;  %v2434_v52 = vld [vmem:[#allocation13 + $0x168] ss:$16 sps:$4 sm:$0xff]   ;;  %v2437_v53 = vld [vmem:[#allocation13 + $0x18c] ss:$16 sps:$4 sm:$0xff]  }
 0x1a1   : > { %1022 = vmatpush1.bf16.msra.mxu0 %v2373_v16  ;;  %v2427_v54 = vld [vmem:[#allocation13 + $0x1a0] ss:$16 sps:$4 sm:$0xff]   ;;  %v2429_v55 = vld [vmem:[#allocation13 + $0x1c4] ss:$16 sps:$4 sm:$0xff]   ;;  %v2440_v56 = vld [vmem:[#allocation13 + $0x188] ss:$16 sps:$4 sm:$0xff]  }
 0x1a2   : > { %1023 = vmatprep.subr.bf16.mxu0 %v2375_v17  ;;  %1063 = vmatpush1.bf16.msra.mxu1 %v2392_v22  ;;  %v2433_v57 = vld [vmem:[#allocation13 + $0x1c0] ss:$16 sps:$4 sm:$0xff]   ;;  %v2441_v58 = vld [vmem:[#allocation13 + $0x1ac] ss:$16 sps:$4 sm:$0xff]   ;;  %v2435_v59 = vld [vmem:[#allocation13 + $0x1e4] ss:$16 sps:$4 sm:$0xff]  }
 0x1a3   : > { %1064 = vmatprep.subr.bf16.mxu1 %v2395_v23  ;;  %v2443_v60 = vld [vmem:[#allocation13 + $0x1a8] ss:$16 sps:$4 sm:$0xff]   ;;  %v2444_v61 = vld [vmem:[#allocation13 + $0x1cc] ss:$16 sps:$4 sm:$0xff]   ;;  %v2439_v62 = vld [vmem:[#allocation13 + $0x1e0] ss:$16 sps:$4 sm:$0xff]  }
 0x1a4   : > { %v599_v63 = vld [vmem:[#allocation4] sm:$0xff]  ;;  %v2452_v1 = vld [vmem:[#allocation14 + $0x4] ss:$16 sps:$4 sm:$0xff]   ;;  %v2450_v3 = vld [vmem:[#allocation14] ss:$16 sps:$4 sm:$0xff]  }
 0x1a5   : > { %1024 = vmatpush1.bf16.msra.mxu0 %v2379_v20  ;;  %v2446_v0 = vld [vmem:[#allocation13 + $0x1c8] ss:$16 sps:$4 sm:$0xff]   ;;  %v2447_v2 = vld [vmem:[#allocation13 + $0x1ec] ss:$16 sps:$4 sm:$0xff]   ;;  %v605_v4 = vpack.c.bf16 %v599_v63, %v599_v63  ;;  %v2458_v6 = vld [vmem:[#allocation14 + $0x24] ss:$16 sps:$4 sm:$0xff]  }
 0x1a6   : > { %1025 = vmatprep.subr.bf16.mxu0 %v2381_v21  ;;  %1065 = vmatpush1.bf16.msra.mxu1 %v2398_v26  ;;  %v2449_v5 = vld [vmem:[#allocation13 + $0x1e8] ss:$16 sps:$4 sm:$0xff]   ;;  %v2455_v7 = vld [vmem:[#allocation14 + $0xc] ss:$16 sps:$4 sm:$0xff]   ;;  %v2456_v8 = vld [vmem:[#allocation14 + $0x20] ss:$16 sps:$4 sm:$0xff]  }
 0x1a7   : > { %1066 = vmatprep.subr.bf16.mxu1 %v2401_v27  ;;  %v2453_v9 = vld [vmem:[#allocation14 + $0x8] ss:$16 sps:$4 sm:$0xff]   ;;  %v2464_v10 = vld [vmem:[#allocation14 + $0x44] ss:$16 sps:$4 sm:$0xff]   ;;  %v2461_v11 = vld [vmem:[#allocation14 + $0x2c] ss:$16 sps:$4 sm:$0xff]  }
 0x1a8   : > { %v2462_v12 = vld [vmem:[#allocation14 + $0x40] ss:$16 sps:$4 sm:$0xff]   ;;  %v2459_v13 = vld [vmem:[#allocation14 + $0x28] ss:$16 sps:$4 sm:$0xff]   ;;  %v2470_v14 = vld [vmem:[#allocation14 + $0x64] ss:$16 sps:$4 sm:$0xff]  }
 0x1a9   : > { %1026 = vmatpush1.bf16.msra.mxu0 %v2385_v24  ;;  %v2467_v15 = vld [vmem:[#allocation14 + $0x4c] ss:$16 sps:$4 sm:$0xff]   ;;  %v2468_v16 = vld [vmem:[#allocation14 + $0x60] ss:$16 sps:$4 sm:$0xff]   ;;  %v2465_v17 = vld [vmem:[#allocation14 + $0x48] ss:$16 sps:$4 sm:$0xff]  }
 0x1aa   : > { %1027 = vmatprep.subr.bf16.mxu0 %v2387_v25  ;;  %1067 = vmatpush1.bf16.msra.mxu1 %v2404_v30  ;;  %v2473_v18 = vld [vmem:[#allocation14 + $0x6c] ss:$16 sps:$4 sm:$0xff]   ;;  %v2471_v19 = vld [vmem:[#allocation14 + $0x68] ss:$16 sps:$4 sm:$0xff]   ;;  %v2476_v20 = vld [vmem:[#allocation14 + $0x84] ss:$16 sps:$4 sm:$0xff]  }
 0x1ab   : > { %1068 = vmatprep.subr.bf16.mxu1 %v2407_v31  ;;  %v2479_v21 = vld [vmem:[#allocation14 + $0x8c] ss:$16 sps:$4 sm:$0xff]   ;;  %v2474_v22 = vld [vmem:[#allocation14 + $0x80] ss:$16 sps:$4 sm:$0xff]   ;;  %v2477_v23 = vld [vmem:[#allocation14 + $0x88] ss:$16 sps:$4 sm:$0xff]  }
 0x1ac   : > { %v2482_v24 = vld [vmem:[#allocation14 + $0xa4] ss:$16 sps:$4 sm:$0xff]   ;;  %v2485_v25 = vld [vmem:[#allocation14 + $0xac] ss:$16 sps:$4 sm:$0xff]   ;;  %v2480_v26 = vld [vmem:[#allocation14 + $0xa0] ss:$16 sps:$4 sm:$0xff]  }
 0x1ad   : > { %1028 = vmatpush1.bf16.msra.mxu0 %v2391_v28  ;;  %v2483_v27 = vld [vmem:[#allocation14 + $0xa8] ss:$16 sps:$4 sm:$0xff]   ;;  %v2488_v28 = vld [vmem:[#allocation14 + $0xc4] ss:$16 sps:$4 sm:$0xff]   ;;  %v2486_v30 = vld [vmem:[#allocation14 + $0xc0] ss:$16 sps:$4 sm:$0xff]  }
 0x1ae   : > { %1029 = vmatprep.subr.bf16.mxu0 %v2393_v29  ;;  %1069 = vmatpush1.bf16.msra.mxu1 %v2410_v34  ;;  %v2491_v29 = vld [vmem:[#allocation14 + $0xcc] ss:$16 sps:$4 sm:$0xff]   ;;  %v2489_v31 = vld [vmem:[#allocation14 + $0xc8] ss:$16 sps:$4 sm:$0xff]   ;;  %v2492_v34 = vld [vmem:[#allocation14 + $0xe0] ss:$16 sps:$4 sm:$0xff]  }
 0x1af   : > { %1070 = vmatprep.subr.bf16.mxu1 %v2413_v35  ;;  %v2495_v35 = vld [vmem:[#allocation14 + $0xe8] ss:$16 sps:$4 sm:$0xff]   ;;  %v2506_v40 = vld [vmem:[#allocation14 + $0x124] ss:$16 sps:$4 sm:$0xff]   ;;  %v2504_v42 = vld [vmem:[#allocation14 + $0x120] ss:$16 sps:$4 sm:$0xff]  }
 0x1b0   : > { %v2537_v63 = vld [vmem:[#allocation14 + $0x1c8] ss:$16 sps:$4 sm:$0xff]  }
 0x1b1   : > { %1030 = vmatpush1.bf16.msra.mxu0 %v2397_v32  ;;  %v2494_v32 = vld [vmem:[#allocation14 + $0xe4] ss:$16 sps:$4 sm:$0xff]  }
 0x1b2   : > { %1031 = vmatprep.subr.bf16.mxu0 %v2399_v33  ;;  %1071 = vmatpush1.bf16.msra.mxu1 %v2416_v38  ;;  %v2497_v33 = vld [vmem:[#allocation14 + $0xec] ss:$16 sps:$4 sm:$0xff]   ;;  %v2498_v38 = vld [vmem:[#allocation14 + $0x100] ss:$16 sps:$4 sm:$0xff]  }
 0x1b3   : > { %1072 = vmatprep.subr.bf16.mxu1 %v2419_v39  ;;  %v2501_v39 = vld [vmem:[#allocation14 + $0x108] ss:$16 sps:$4 sm:$0xff]  }
 0x1b5   : > { %1032 = vmatpush1.bf16.msra.mxu0 %v2403_v36  ;;  %v2500_v36 = vld [vmem:[#allocation14 + $0x104] ss:$16 sps:$4 sm:$0xff]  }
 0x1b6   : > { %1033 = vmatprep.subr.bf16.mxu0 %v2405_v37  ;;  %1073 = vmatpush1.bf16.msra.mxu1 %v2422_v44  ;;  %v2503_v37 = vld [vmem:[#allocation14 + $0x10c] ss:$16 sps:$4 sm:$0xff]   ;;  %v2512_v44 = vld [vmem:[#allocation14 + $0x144] ss:$16 sps:$4 sm:$0xff]  }
 0x1b7   : > { %1074 = vmatprep.subr.bf16.mxu1 %v2425_v45  ;;  %v2515_v45 = vld [vmem:[#allocation14 + $0x14c] ss:$16 sps:$4 sm:$0xff]  }
 0x1b9   : > { %1034 = vmatpush1.bf16.msra.mxu0 %v2409_v41  ;;  %v2509_v41 = vld [vmem:[#allocation14 + $0x12c] ss:$16 sps:$4 sm:$0xff]  }
 0x1ba   : > { %1035 = vmatprep.subr.bf16.mxu0 %v2411_v43  ;;  %1075 = vmatpush1.bf16.msra.mxu1 %v2428_v48  ;;  %v2507_v43 = vld [vmem:[#allocation14 + $0x128] ss:$16 sps:$4 sm:$0xff]   ;;  %v2518_v48 = vld [vmem:[#allocation14 + $0x164] ss:$16 sps:$4 sm:$0xff]  }
 0x1bb   : > { %1076 = vmatprep.subr.bf16.mxu1 %v2431_v49  ;;  %v2521_v49 = vld [vmem:[#allocation14 + $0x16c] ss:$16 sps:$4 sm:$0xff]  }
 0x1bd   : > { %1036 = vmatpush1.bf16.msra.mxu0 %v2415_v46  ;;  %v2510_v46 = vld [vmem:[#allocation14 + $0x140] ss:$16 sps:$4 sm:$0xff]  }
 0x1be   : > { %1037 = vmatprep.subr.bf16.mxu0 %v2417_v47  ;;  %1077 = vmatpush1.bf16.msra.mxu1 %v2434_v52  ;;  %v2513_v47 = vld [vmem:[#allocation14 + $0x148] ss:$16 sps:$4 sm:$0xff]   ;;  %v2524_v52 = vld [vmem:[#allocation14 + $0x184] ss:$16 sps:$4 sm:$0xff]  }
 0x1bf   : > { %1078 = vmatprep.subr.bf16.mxu1 %v2437_v53  ;;  %v2527_v53 = vld [vmem:[#allocation14 + $0x18c] ss:$16 sps:$4 sm:$0xff]  }
 0x1c1   : > { %1038 = vmatpush1.bf16.msra.mxu0 %v2421_v50  ;;  %v2516_v50 = vld [vmem:[#allocation14 + $0x160] ss:$16 sps:$4 sm:$0xff]  }
 0x1c2   : > { %1039 = vmatprep.subr.bf16.mxu0 %v2423_v51  ;;  %1079 = vmatpush1.bf16.msra.mxu1 %v2440_v56  ;;  %v2519_v51 = vld [vmem:[#allocation14 + $0x168] ss:$16 sps:$4 sm:$0xff]   ;;  %v2528_v56 = vld [vmem:[#allocation14 + $0x1a0] ss:$16 sps:$4 sm:$0xff]  }
 0x1c3   : > { %1080 = vmatprep.subr.bf16.mxu1 %v2441_v58  ;;  %v2531_v58 = vld [vmem:[#allocation14 + $0x1a8] ss:$16 sps:$4 sm:$0xff]  }
 0x1c5   : > { %1040 = vmatpush1.bf16.msra.mxu0 %v2427_v54  ;;  %v2522_v54 = vld [vmem:[#allocation14 + $0x180] ss:$16 sps:$4 sm:$0xff]  }
 0x1c6   : > { %1041 = vmatprep.subr.bf16.mxu0 %v2429_v55  ;;  %1081 = vmatpush1.bf16.msra.mxu1 %v2443_v60  ;;  %v2525_v55 = vld [vmem:[#allocation14 + $0x188] ss:$16 sps:$4 sm:$0xff]   ;;  %v2536_v60 = vld [vmem:[#allocation14 + $0x1c4] ss:$16 sps:$4 sm:$0xff]  }
 0x1c7   : > { %1082 = vmatprep.subr.bf16.mxu1 %v2444_v61  ;;  %v2539_v61 = vld [vmem:[#allocation14 + $0x1cc] ss:$16 sps:$4 sm:$0xff]  }
 0x1c9   : > { %1042 = vmatpush1.bf16.msra.mxu0 %v2433_v57  ;;  %v2530_v57 = vld [vmem:[#allocation14 + $0x1a4] ss:$16 sps:$4 sm:$0xff]  }
 0x1ca   : > { %1043 = vmatprep.subr.bf16.mxu0 %v2435_v59  ;;  %1083 = vmatpush1.bf16.msra.mxu1 %v2446_v0  ;;  %v2533_v59 = vld [vmem:[#allocation14 + $0x1ac] ss:$16 sps:$4 sm:$0xff]  }
 0x1cb   : > { %1084 = vmatprep.subr.bf16.mxu1 %v2447_v2  ;;  %v1124_v0 = vld [vmem:[#allocation8 + $0x8] sm:$0xff] }
 0x1cc   : > { %v2545_v2 = vld [vmem:[#allocation14 + $0x1ec] ss:$16 sps:$4 sm:$0xff]  }
 0x1cd   : > { %1044 = vmatpush1.bf16.msra.mxu0 %v2439_v62  ;;  %v2534_v62 = vld [vmem:[#allocation14 + $0x1c0] ss:$16 sps:$4 sm:$0xff]  }
 0x1ce   : > { %1536 = vmatprep.subr.bf16.mxu0 %v2452_v1  ;;  %1085 = vmatpush1.bf16.msra.mxu1 %v2449_v5  ;;  %v2542_v1 = vld [vmem:[#allocation14 + $0x1e4] ss:$16 sps:$4 sm:$0xff]   ;;  %v2543_v5 = vld [vmem:[#allocation14 + $0x1e8] ss:$16 sps:$4 sm:$0xff]  }
 0x1cf   : > { %1577 = vmatprep.subr.bf16.mxu1 %v2455_v7 }
 0x1d0   : > { %1046 = vmatmul.mubr.bf16.vlgmr.msra.gmra.mrb[0].mxu0 %v605_v4 }
 0x1d1   : > { %1537 = vmatpush1.bf16.msra.mxu0 %v2450_v3  ;;  %1087 = vmatmul.mubr.bf16.vlgmr.msra.gmra.mrb[0].mxu1 %v605_v4  ;;  %v1129_v3 = vpack.c.bf16 %v1124_v0, %v1124_v0  ;;  %v2540_v4 = vld [vmem:[#allocation14 + $0x1e0] ss:$16 sps:$4 sm:$0xff]  }
 0x1d2   : > { %1538 = vmatprep.subr.bf16.mxu0 %v2458_v6  ;;  %1578 = vmatpush1.bf16.msra.mxu1 %v2453_v9  ;;  %v673_v6 = vlaneseq  ;;  %v671_v9 = vld [vmem:[%s3677_s5] sm:$0xf] }
 0x1d3   : > { %1579 = vmatprep.subr.bf16.mxu1 %v2461_v11  ;;  %1568 = vmatprep.mubr.bf16.mxu0 %v1129_v3 }
 0x1d4   : > { %1609 = vmatprep.mubr.bf16.mxu1 %v1129_v3  ;;  %v3553_v7 = vshrl.u32 %v673_v6, 7 }
 0x1d5   : > { %1539 = vmatpush1.bf16.msra.mxu0 %v2456_v8 }
 0x1d6   : > { %1540 = vmatprep.subr.bf16.mxu0 %v2464_v10  ;;  %1580 = vmatpush1.bf16.msra.mxu1 %v2459_v13  ;;  %v675_v8 = vsub.s32 0, %v3553_v7  ;;  %v679_v10 = vsub.s32 1, %v3553_v7  ;;  %v687_v13 = vsub.s32 3, %v3553_v7 }
 0x1d7   : > { %1581 = vmatprep.subr.bf16.mxu1 %v2467_v15 }
 0x1d8   : > { %v676_v11 = vrot.slane %v671_v9, %v675_v8 }
 0x1d9   : > { %1541 = vmatpush1.bf16.msra.mxu0 %v2462_v12  ;;  %v680_v12 = vrot.slane %v671_v9, %v679_v10 }
 0x1da   : > { %1542 = vmatprep.subr.bf16.mxu0 %v2470_v14  ;;  %1582 = vmatpush1.bf16.msra.mxu1 %v2465_v17 }
 0x1db   : > { %1583 = vmatprep.subr.bf16.mxu1 %v2473_v18 }
 0x1dd   : > { %1543 = vmatpush1.bf16.msra.mxu0 %v2468_v16 }
 0x1de   : > { %1584 = vmatpush1.bf16.msra.mxu1 %v2471_v19  ;;  %1544 = vmatprep.subr.bf16.mxu0 %v2476_v20 }
 0x1df   : > { %1585 = vmatprep.subr.bf16.mxu1 %v2479_v21  ;;  %v688_v21 = vrot.slane %v671_v9, %v687_v13 }
 0x1e1   : > { %1545 = vmatpush1.bf16.msra.mxu0 %v2474_v22 }
 0x1e2   : > { %1586 = vmatpush1.bf16.msra.mxu1 %v2477_v23  ;;  %1546 = vmatprep.subr.bf16.mxu0 %v2482_v24  ;;  %v683_v23 = vsub.s32 2, %v3553_v7 }
 0x1e3   : > { %1587 = vmatprep.subr.bf16.mxu1 %v2485_v25 }
 0x1e5   : > { %1547 = vmatpush1.bf16.msra.mxu0 %v2480_v26 }
 0x1e6   : > { %1588 = vmatpush1.bf16.msra.mxu1 %v2483_v27  ;;  %1548 = vmatprep.subr.bf16.mxu0 %v2488_v28  ;;  %v684_v28 = vrot.slane %v671_v9, %v683_v23 }
 0x1e7   : > { %1589 = vmatprep.subr.bf16.mxu1 %v2491_v29 }
 0x1e9   : > { %1549 = vmatpush1.bf16.msra.mxu0 %v2486_v30 }
 0x1ea   : > { %1590 = vmatpush1.bf16.msra.mxu1 %v2489_v31  ;;  %1550 = vmatprep.subr.bf16.mxu0 %v2494_v32 }
 0x1eb   : > { %1591 = vmatprep.subr.bf16.mxu1 %v2497_v33 }
 0x1ed   : > { %1551 = vmatpush1.bf16.msra.mxu0 %v2492_v34 }
 0x1ee   : > { %1592 = vmatpush1.bf16.msra.mxu1 %v2495_v35  ;;  %1552 = vmatprep.subr.bf16.mxu0 %v2500_v36 }
 0x1ef   : > { %1593 = vmatprep.subr.bf16.mxu1 %v2503_v37 }
 0x1f1   : > { %1553 = vmatpush1.bf16.msra.mxu0 %v2498_v38  ;;  %v1114_v38 = vld [vmem:[#allocation11] sm:$0xff] }
 0x1f2   : > { %1594 = vmatpush1.bf16.msra.mxu1 %v2501_v39  ;;  %1554 = vmatprep.subr.bf16.mxu0 %v2506_v40 }
 0x1f3   : > { %1595 = vmatprep.subr.bf16.mxu1 %v2509_v41 }
 0x1f5   : > { %1555 = vmatpush1.bf16.msra.mxu0 %v2504_v42 }
 0x1f6   : > { %1596 = vmatpush1.bf16.msra.mxu1 %v2507_v43  ;;  %1556 = vmatprep.subr.bf16.mxu0 %v2512_v44 }
 0x1f7   : > { %1597 = vmatprep.subr.bf16.mxu1 %v2515_v45 }
 0x1f9   : > { %1557 = vmatpush1.bf16.msra.mxu0 %v2510_v46 }
 0x1fa   : > { %1598 = vmatpush1.bf16.msra.mxu1 %v2513_v47  ;;  %1558 = vmatprep.subr.bf16.mxu0 %v2518_v48 }
 0x1fb   : > { %1599 = vmatprep.subr.bf16.mxu1 %v2521_v49  ;;  %v1194_v49 = vld [vmem:[%s3739_s10] sm:$0xf] }
 0x1fc   : > { %v1211_v0 = vrot.slane %v1194_v49, %v687_v13 }
 0x1fd   : > { %1559 = vmatpush1.bf16.msra.mxu0 %v2516_v50  ;;  %v1199_v50 = vrot.slane %v1194_v49, %v675_v8 }
 0x1fe   : > { %1600 = vmatpush1.bf16.msra.mxu1 %v2519_v51  ;;  %1560 = vmatprep.subr.bf16.mxu0 %v2524_v52  ;;  %v1203_v51 = vrot.slane %v1194_v49, %v679_v10 }
 0x1ff   : > { %1601 = vmatprep.subr.bf16.mxu1 %v2527_v53 }
 0x201   : > { %1561 = vmatpush1.bf16.msra.mxu0 %v2522_v54 }
 0x202   : > { %1602 = vmatpush1.bf16.msra.mxu1 %v2525_v55  ;;  %1562 = vmatprep.subr.bf16.mxu0 %v2530_v57 }
 0x203   : > { %1603 = vmatprep.subr.bf16.mxu1 %v2533_v59 }
 0x205   : > { %1563 = vmatpush1.bf16.msra.mxu0 %v2528_v56 }
 0x206   : > { %1604 = vmatpush1.bf16.msra.mxu1 %v2531_v58  ;;  %1564 = vmatprep.subr.bf16.mxu0 %v2536_v60 }
 0x207   : > { %1605 = vmatprep.subr.bf16.mxu1 %v2539_v61 }
 0x209   : > { %1565 = vmatpush1.bf16.msra.mxu0 %v2534_v62 }
 0x20a   : > { %1606 = vmatpush1.bf16.msra.mxu1 %v2537_v63  ;;  %1566 = vmatprep.subr.bf16.mxu0 %v2542_v1 }
 0x20b   : > { %1607 = vmatprep.subr.bf16.mxu1 %v2545_v2  ;;  %v1207_v2 = vrot.slane %v1194_v49, %v683_v23 }
 0x20d   : > { %1567 = vmatpush1.bf16.msra.mxu0 %v2540_v4 }
 0x20e   : > { %1608 = vmatpush1.bf16.msra.mxu1 %v2543_v5 }
 0x2a3   : > { %v1047_v14 = vpop.f32.mrb[0].mxu0 }
 0x2a4   : > { %v1048_v15 = vadd.f32 %v1047_v14, %v676_v11  ;;  %v1049_v16 = vpop.f32.mrb[1].mxu0  ;;  %v1088_v24 = vpop.f32.mrb[0].mxu1 }
 0x2a5   : > { %v1050_v17 = vadd.f32 %v1049_v16, %v680_v12  ;;  %v1051_v18 = vpop.f32.mrb[2].mxu0  ;;  %v1090_v25 = vpop.f32.mrb[1].mxu1  ;;  %v1089_v31 = vadd.f32 %v1088_v24, %v684_v28  ;;  %v1638_v12 = vld [vmem:[#allocation11 + $0x8] sm:$0xff] }
 0x2a6   : > { %v2110_v19 = vmul.f32 -1.442695, %v1048_v15  ;;  %v1052_v20 = vpop.f32.mrb[3].mxu0  ;;  %v1091_v26 = vadd.f32 %v1090_v25, %v688_v21  ;;  %v1092_v27 = vpop.f32.mrb[2].mxu1 }
 0x2a7   : > { %v2111_v22 = vmul.f32 -1.442695, %v1050_v17  ;;  %v1093_v29 = vpop.f32.mrb[3].mxu1 }
 0x2a8   : > { %2546 = vpow2.f32 %v2110_v19  ;;  %v2112_v30 = vmul.f32 -1.442695, %v1091_v26 }
 0x2a9   : > { %2548 = vpow2.f32 %v2111_v22 }
 0x2aa   : > { %2550 = vpow2.f32 %v2112_v30 }
 0x2ab   : > { %2552 = vtanh.f32 %v1089_v31 }
 0x2b2   : > { %v2547_v32 = vpop.eup %2546 }
 0x2b3   : > { %v2549_v33 = vpop.eup %2548  ;;  %v1098_v34 = vadd.f32 1.0, %v2547_v32 }
 0x2b4   : > { %v1104_v35 = vadd.f32 1.0, %v2549_v33  ;;  %v2551_v36 = vpop.eup %2550 }
 0x2b5   : > { %2554 = vrcp.f32 %v1098_v34  ;;  %v2553_v37 = vpop.eup %2552  ;;  %v1111_v40 = vadd.f32 1.0, %v2551_v36 }
 0x2b6   : > { %2556 = vrcp.f32 %v1104_v35 }
 0x2b7   : > { %2558 = vrcp.f32 %v1111_v40 }
 0x2bf   : > { %v2555_v39 = vpop.eup %2554 }
 0x2c0   : > { %v2557_v41 = vpop.eup %2556  ;;  %v1116_v42 = vmul.f32 %v2555_v39, %v2553_v37 }
 0x2c1   : > { %v1115_v43 = vmul.f32 %v2557_v41, %v1114_v38  ;;  %v2559_v45 = vpop.eup %2558 }
 0x2c3   : > { %v1117_v44 = vadd.f32 %v1116_v42, %v1115_v43 }
 0x2c5   : > { %2560 = vtanh.f32 %v1117_v44  ;;  %1121 = vst [vmem:[#allocation20] sm:$0xff] %v1117_v44 }
 0x2cf   : > { %v2561_v46 = vpop.eup %2560 }
 0x2d0   : > { %v1119_v47 = vmul.f32 %v2561_v46, %v2559_v45 }
 0x2d2   : > { %1120 = vst [vmem:[#allocation18] sm:$0xff] %v1119_v47  ;;  %v1128_v48 = vpack.c.bf16 %v1119_v47, %v1119_v47 }
 0x2d4   : > { %1569 = vmatmul.mubr.bf16.vlgmr.msra.gmra.mrb[4].mxu0 %v1128_v48  ;;  %1610 = vmatmul.mubr.bf16.vlgmr.msra.gmra.mrb[4].mxu1 %v1128_v48 }
 0x3a7   : > { %v1570_v52 = vpop.f32.mrb[4].mxu0  ;;  %v1611_v53 = vpop.f32.mrb[4].mxu1 }
 0x3a8   : > { %v1571_v54 = vadd.f32 %v1570_v52, %v1199_v50  ;;  %v1572_v55 = vpop.f32.mrb[5].mxu0  ;;  %v1613_v56 = vpop.f32.mrb[5].mxu1  ;;  %v1612_v4 = vadd.f32 %v1611_v53, %v1207_v2 }
 0x3a9   : > { %v1573_v57 = vadd.f32 %v1572_v55, %v1203_v51  ;;  %v1574_v58 = vpop.f32.mrb[6].mxu0  ;;  %v1615_v59 = vpop.f32.mrb[6].mxu1  ;;  %v1614_v1 = vadd.f32 %v1613_v56, %v1211_v0 }
 0x3aa   : > { %v2177_v60 = vmul.f32 -1.442695, %v1571_v54  ;;  %v1575_v61 = vpop.f32.mrb[7].mxu0  ;;  %v1616_v62 = vpop.f32.mrb[7].mxu1 }
 0x3ab   : > { %v2178_v63 = vmul.f32 -1.442695, %v1573_v57  ;;  %v2179_v3 = vmul.f32 -1.442695, %v1614_v1 }
 0x3ac   : > { %2562 = vpow2.f32 %v2177_v60 }
 0x3ad   : > { %2564 = vpow2.f32 %v2178_v63 }
 0x3ae   : > { %2566 = vpow2.f32 %v2179_v3 }
 0x3af   : > { %2568 = vtanh.f32 %v1612_v4 }
 0x3b6   : > { %v2563_v5 = vpop.eup %2562 }
 0x3b7   : > { %v2565_v6 = vpop.eup %2564  ;;  %v1621_v8 = vadd.f32 1.0, %v2563_v5 }
 0x3b8   : > { %v1627_v9 = vadd.f32 1.0, %v2565_v6  ;;  %v2567_v10 = vpop.eup %2566 }
 0x3b9   : > { %2570 = vrcp.f32 %v1621_v8  ;;  %v2569_v11 = vpop.eup %2568  ;;  %v1634_v15 = vadd.f32 1.0, %v2567_v10 }
 0x3ba   : > { %2572 = vrcp.f32 %v1627_v9 }
 0x3bb   : > { %2574 = vrcp.f32 %v1634_v15 }
 0x3c3   : > { %v2571_v14 = vpop.eup %2570 }
 0x3c4   : > { %v2573_v7 = vpop.eup %2572  ;;  %v1640_v13 = vmul.f32 %v2571_v14, %v2569_v11 }
 0x3c5   : > { %v1639_v16 = vmul.f32 %v2573_v7, %v1638_v12  ;;  %v2575_v18 = vpop.eup %2574 }
 0x3c7   : > { %v1641_v17 = vadd.f32 %v1640_v13, %v1639_v16 }
 0x3c9   : > { %2576 = vtanh.f32 %v1641_v17  ;;  %1647 = vst [vmem:[#allocation20 + $0x8] sm:$0xff] %v1641_v17 }
 0x3d3   : > { %v2577_v19 = vpop.eup %2576 }
 0x3d4   : > { %v1643_v20 = vmul.f32 %v2577_v19, %v2575_v18 }
 0x3d6   : > { %1645 = vst [vmem:[#allocation18 + $0x8] sm:$0xff] %v1643_v20  ;;  %v1650_v21 = vpack.c.bf16 %v1643_v20, %v1643_v20 }
 0x3d8   : > { %1651 = vst [vmem:[#allocation3] sm:$0xf] %v1650_v21 }
 0x3d9 PF: > { %v2578_v22 = vld [vmem:[%s3406_s0] sm:$0xff]   ;;  %v3106_v23 = vmov 0.0   ;;  %v2579_v24 = vld [vmem:[%s3406_s0 + $0x8] sm:$0xff]   ;;  %vm3107_vm0 = vmmov 0   ;;  %v2580_v25 = vld [vmem:[%s3406_s0 + $0x10] sm:$0xff]   ;;  %s3108_s7 = smov [#allocation18]  }
 0x3da   : > { %2214 = vmatprep.subr.bf16.mxu0 %v3106_v23  ;;  %2230 = vmatprep.mubr.msk.bf16.mxu0 %vm3107_vm0, %v3106_v23  ;;  %v2581_v26 = vld [vmem:[%s3406_s0 + $0x18] sm:$0xff]   ;;  %v2582_v27 = vld [vmem:[%s3406_s0 + $0x20] sm:$0xff]   ;;  %v2583_v28 = vld [vmem:[%s3406_s0 + $0x28] sm:$0xff]   ;;  %s1789_s4 = sshll.u32 %s3108_s7, 4  ;;  %p3740_p12 = scmp.eq.s32.totalorder %s3202_s29, 1  ;;  %s1790_s4 = int_to_ptr.vmem [resolvable:$true] %s1789_s4 }
 0x3db   : > { %2215 = vmatpush3.bf16.msra.mxu0 %v2578_v22  ;;  %v2584_v29 = vld [vmem:[%s3406_s0 + $0x30] sm:$0xff]   ;;  %v2585_v30 = vld [vmem:[%s3406_s0 + $0x38] sm:$0xff]   ;;  %s2932_s12 = scalar_lea.vmem %s1790_s4, 256  ;;  %p2939_p2 = scmp.lt.s32.totalorder %s1790_s4, %s1790_s4 }
 0x3dc   : > { %2216 = vmatprep.subr.bf16.mxu0 %v3106_v23  ;;  %p2933_p9 = scmp.ne.s32.totalorder %s1790_s4, %s2932_s12  ;;  %p2940_p3 = scmp.lt.s32.totalorder %s2932_s12, %s2932_s12 }
 0x3de   : > { %p2934_p1 = pnand %p2933_p9, %p3740_p12  ;;  %p2941_p6 = por %p2940_p3, %p2939_p2 }
 0x3df   : > { %2217 = vmatpush3.bf16.msra.mxu0 %v2579_v24  ;;  %v1652_v31 = vld [vmem:[#allocation3] sm:$0xf] }
 0x3e0   : > { %2218 = vmatprep.subr.bf16.mxu0 %v3106_v23  ;;  %p2935_p10 = pneg %p2934_p1 }
 0x3e2   : > { %p2942_p11 = pnand %p2941_p6, %p2935_p10 }
 0x3e3   : > { %2219 = vmatpush3.bf16.msra.mxu0 %v2580_v25 }
 0x3e4   : > { %2220 = vmatprep.subr.bf16.mxu0 %v3106_v23 }
 0x3e7   : > { %2221 = vmatpush3.bf16.msra.mxu0 %v2581_v26 }
 0x3e8   : > { %2222 = vmatprep.subr.bf16.mxu0 %v3106_v23 }
 0x3eb   : > { %2223 = vmatpush3.bf16.msra.mxu0 %v2582_v27 }
 0x3ec   : > { %2224 = vmatprep.subr.bf16.mxu0 %v3106_v23 }
 0x3ef   : > { %2225 = vmatpush3.bf16.msra.mxu0 %v2583_v28 }
 0x3f0   : > { %2226 = vmatprep.subr.bf16.mxu0 %v3106_v23 }
 0x3f3   : > { %2227 = vmatpush3.bf16.msra.mxu0 %v2584_v29 }
 0x3f4   : > { %2228 = vmatprep.subr.bf16.mxu0 %v3106_v23 }
 0x3f7   : > { %2229 = vmatpush3.bf16.msra.mxu0 %v2585_v30 }
 0x3fa   : > { %2231 = vmatmul.mubr.bf16.vlgmr.msra.gmra.mrb[0].mxu0 %v1652_v31 }
 0x3fb   : > { %2945 = shalt.err (!%p2942_p11)
}
 0x3fc   : > { %s3741_s0 = sld [smem:[#allocation65_spill]]  ;;  %p3743_p8 = pmov %p3740_p12 }
 0x402   : > { %s3742_s3 = smov %s3741_s0  ;;  %s2946_s22 = scalar_lea.hbm %s3741_s0, 256 }
 0x403   : > { %p2947_p4 = scmp.ne.s32.totalorder %s3742_s3, %s2946_s22  ;;  %p2952_p5 = scmp.lt.u32.totalorder %s2946_s22, %s3742_s3 }
 0x405   : > { %p2948_p13 = pnand %p2947_p4, %p3743_p8 }
 0x407   : > { %p2949_p0 = pneg %p2948_p13 }
 0x409   : > { %p2954_p7 = pnand %p2952_p5, %p2949_p0 }
 0x40b   : > { %2957 = shalt.err (!%p2954_p7)
}
 0x40c   : > { %s3109_s16 = smov 128   ;;  %s3110_s17 = smov 8  }
 0x40d   : > { %p3744_p9 = pmov %p3743_p8  ;;  %s3111_s30 = smov [#allocation20]  }
 0x40e   : > { %s1802_s19 = sshll.u32 %s3111_s30, 4  ;;  %p3745_p1 = pmov %p3743_p8  ;;  %s1803_s19 = int_to_ptr.vmem [resolvable:$true] %s1802_s19 }
 0x40f   : > { %2254 = dma.vmem_to_hbm [thread:$0]  (%p3744_p9), %s1790_s4, 256, %s3742_s3, [#allocation19], %s3109_s16, %s3109_s16, %s3110_s17  }
 0x410   : > { %s2958_s24 = scalar_lea.vmem %s1803_s19, 256  ;;  %p2965_p3 = scmp.lt.s32.totalorder %s1803_s19, %s1803_s19 }
 0x411   : > { %p2959_p12 = scmp.ne.s32.totalorder %s1803_s19, %s2958_s24  ;;  %p2966_p6 = scmp.lt.s32.totalorder %s2958_s24, %s2958_s24 }
 0x413   : > { %p2960_p10 = pnand %p2959_p12, %p3745_p1  ;;  %p2967_p11 = por %p2966_p6, %p2965_p3 }
 0x415   : > { %p2961_p2 = pneg %p2960_p10 }
 0x417   : > { %p2968_p4 = pnand %p2967_p11, %p2961_p2 }
 0x419   : > { %2971 = shalt.err (!%p2968_p4)
}
 0x41a   : > { %s3746_s12 = sld [smem:[#allocation66_spill]]  ;;  %p3747_p13 = pmov %p3745_p1 }
 0x420   : > { %s2972_s6 = scalar_lea.hbm %s3746_s12, 256 }
 0x421   : > { %p2973_p8 = scmp.ne.s32.totalorder %s3746_s12, %s2972_s6  ;;  %p2978_p7 = scmp.lt.u32.totalorder %s2972_s6, %s3746_s12 }
 0x423   : > { %p2974_p0 = pnand %p2973_p8, %p3747_p13 }
 0x425   : > { %p2975_p5 = pneg %p2974_p0 }
 0x427   : > { %p2980_p9 = pnand %p2978_p7, %p2975_p5 }
 0x429   : > { %2983 = shalt.err (!%p2980_p9)
}
 0x42a   : > { %p3748_p12 = pmov %p3745_p1  ;;  %s3749_s14 = sld [smem:[#allocation57_spill]] }
 0x42b   : > { %s3750_s2 = scalar_lea.vmem %s3681_s9, %s3415_s23  ;;  %s2190_s30 = sshll.u32 %s3202_s29, 7 }
 0x42c   : > { %2256 = dma.vmem_to_hbm [thread:$0]  (%p3748_p12), %s1803_s19, 256, %s3746_s12, [#allocation19], %s3109_s16, %s3109_s16, %s3110_s17  }
 0x42d   : > { %v2180_v32 = vld [vmem:[%s3750_s2] ss:$0 sm:$0xff]  ;;  %s1779_s24 = sshll.u32 %s3421_s15, 4  ;;  %s3751_s6 = sld [smem:[#allocation64_spill]]  ;;  %s3625_s24 = int_to_ptr.vmem [resolvable:$true] %s1779_s24 }
 0x42e   : > { %s1766_s23 = scalar_lea.sflag [#allocation10], %s3403_s20  ;;  %s2984_s16 = scalar_lea.vmem %s3625_s24, 128 }
 0x42f   : > { %p2985_p1 = scmp.ne.s32.totalorder %s3625_s24, %s2984_s16  ;;  %s3112_s17 = smov [#allocation17]  }
 0x430   : > { %p3752_p10 = scmp.ne.s32.totalorder %s3749_s14, 0  ;;  %s2988_s19 = sshll.u32 %s3112_s17, 4  ;;  %s2989_s19 = int_to_ptr.vmem [resolvable:$false] %s2988_s19 }
 0x431   : > { %s2990_s4 = scalar_lea.vmem %s2989_s19, 256  ;;  %p2991_p6 = scmp.lt.s32.totalorder %s3625_s24, %s2989_s19 }
 0x432   : > { %p2986_p2 = pnand %p2985_p1, %p3752_p10  ;;  %p2992_p11 = scmp.lt.s32.totalorder %s2990_s4, %s2984_s16 }
 0x433   : > { %s3623_s13 = scalar_lea.hbm %s3751_s6, %s2190_s30 }
 0x434   : > { %p2987_p3 = pneg %p2986_p2  ;;  %p2993_p4 = por %p2992_p11, %p2991_p6 }
 0x436   : > { %p2994_p8 = pnand %p2993_p4, %p2987_p3 }
 0x4cd   : > { %v1758_v33 = vpop.f32.mrb[0].mxu0 }
 0x4ce   : > { %v1759_v34 = vadd.f32 %v2180_v32, %v1758_v33  ;;  %v2232_v35 = vpop.f32.mrb[1].mxu0 }
 0x4cf   : > { %v1761_v36 = vpop.f32.mrb[2].mxu0 }
 0x4d0   : > { %1764 = vst [vmem:[%s3421_s15] sm:$0xff] %v1759_v34  ;;  %v2233_v37 = vpop.f32.mrb[3].mxu0 }
 0x4d1   : > { %2997 = shalt.err (!%p2994_p8)
}
 0x4d2   : > { %s2998_s20 = scalar_lea.hbm %s3623_s13, 128  ;;  %s3002_s22 = scalar_lea.hbm %s3751_s6, 256 }
 0x4d3   : > { %p2999_p13 = scmp.ne.s32.totalorder %s3623_s13, %s2998_s20  ;;  %p3003_p7 = scmp.lt.u32.totalorder %s3623_s13, %s3751_s6 }
 0x4d4   : > { %p3004_p9 = scmp.lt.u32.totalorder %s3002_s22, %s2998_s20  ;;  %p3006_p1 = scmp.lt.u32.totalorder %s2998_s20, %s3623_s13 }
 0x4d5   : > { %p3000_p0 = pnand %p2999_p13, %p3752_p10 }
 0x4d6   : > { %p3005_p12 = por %p3004_p9, %p3003_p7 }
 0x4d7   : > { %p3001_p5 = pneg %p3000_p0 }
 0x4d8   : > { %p3007_p2 = por %p3006_p1, %p3005_p12 }
 0x4da   : > { %p3008_p3 = pnand %p3007_p2, %p3001_p5 }
 0x4dc   : > { %3011 = shalt.err (!%p3008_p3)
}
 0x4dd   : > { %2252 = dma.vmem_to_hbm [thread:$0]  (%p3752_p10), %s3625_s24, 128, %s3623_s13, %s1766_s23  }
 0x4de   : > { %p3753_p6 = scmp.eq.s32.totalorder %s3202_s29, 1 }
 0x4e0   : > { %3063 = dma.done.wait (%p3753_p6), [#allocation19], 512   ;;  %p3754_p11 = pmov %p3753_p6 }
 0x4e2   : > { %3065 = vsyncadd (%p3754_p11), [#allocation19], 4294966784 }
 0x4e3 PF: > { %s3755_s25 = sld [smem:[#allocation54_spill]]  ;;  %s3756_s18 = sld [smem:[#allocation58_spill]] }
 0x4e4   : > { %p3758_p8 = scmp.ge.s32.totalorder %s3084_s28, 2 }
 0x4e9   : > { %s1825_s2 = sand.u32 1, %s3755_s25   ;;  %p3757_p4 = scmp.ne.s32.totalorder %s3756_s18, 0 }
 0x4ea   : > { %s1826_s30 = scalar_lea.sflag [#allocation10], %s1825_s2 }
 0x4eb   : > { %p2280_p13 = pnand %p3758_p8, %p3757_p4 }
 0x4ed   : > { %3067 = dma.done.wait (!%p2280_p13), %s1826_s30, 128  }
 0x4ee   : > { %3069 = vsyncadd (!%p2280_p13), %s1826_s30, 4294967168  ;;  %s3759_s28 = sld [smem:[#allocation55_spill]]  ;;  %s3760_s14 = sld [smem:[#allocation56_spill]] }
 0x4ef   : > { %s3761_s0 = smov %s3076_s26  ;;  %s3762_s26 = smov %s3080_s27 }
 0x4f4   : > { %p33_p10 = scmp.ge.s32.totalorder %s3759_s28, 4   ;;  %s3763_s27 = smov %s3760_s14 }
 0x4f6   :  { %35 = sbr.rel (!%p33_p10) target bundleno = 24 (0x18), region = 200 }
 0x4fd   :  { %1831 = vsyncpa [#allocation9], 1 }
 0x4fe   :  { %1833 = vsyncpa [#allocation9 + $0x1], 1 }
 0x4ff   :  { %1834 = vsyncpa [#allocation12], 1 }
 0x500   :  { %1835 = vsyncpa [#allocation15], 1 }
 0x501   :  { %1836 = vsyncpa [#allocation10], 1 }
 0x502   :  { %1838 = vsyncpa [#allocation10 + $0x1], 1 }
 0x503   :  { %1839 = vsyncpa [#allocation19], 1 }
 0x504   :  { %1840 = vsyncmov [#allocation5] }
 0x507   :  { %s1841_s29 = vpop.sfrf %1840 }
 0x508   :  { %p2197_p0 = scmp.ne.s32.totalorder %s1841_s29, 0 }
 0x50a   :  { %1845 = shalt.err (%p2197_p0)  }
 0x50b   :  { %1847 = vsyncmov [#allocation5 + $0x1] }
 0x50e   :  { %s1848_s24 = vpop.sfrf %1847 }
 0x50f   :  { %p2198_p5 = scmp.ne.s32.totalorder %s1848_s24, 0 }
 0x511   :  { %1852 = shalt.err (%p2198_p5)  }
 0x512   :  { %1854 = vsyncmov [#allocation5 + $0x2] }
 0x515   :  { %s1855_s10 = vpop.sfrf %1854 }
 0x516   :  { %p2199_p7 = scmp.ne.s32.totalorder %s1855_s10, 0 }
 0x518   :  { %1859 = shalt.err (%p2199_p7)  }
 0x519   :  { %1861 = vsyncmov [#allocation5 + $0x3] }
 0x51c   :  { %s1862_s1 = vpop.sfrf %1861 }
 0x51d   :  { %p2200_p9 = scmp.ne.s32.totalorder %s1862_s1, 0 }
 0x51f   :  { %1866 = shalt.err (%p2200_p9)  }
 0x520   :  { %1868 = vsyncmov [#allocation5 + $0x4] }
 0x523   :  { %s1869_s5 = vpop.sfrf %1868 }
 0x524   :  { %p2201_p12 = scmp.ne.s32.totalorder %s1869_s5, 0 }
 0x526   :  { %1873 = shalt.err (%p2201_p12)  }
 0x527   :  { %1875 = vsyncmov [#allocation5 + $0x5] }
 0x52a   :  { %s1876_s8 = vpop.sfrf %1875 }
 0x52b   :  { %p2202_p1 = scmp.ne.s32.totalorder %s1876_s8, 0 }
 0x52d   :  { %1880 = shalt.err (%p2202_p1)  }
 0x52e   :  { %1882 = vsyncmov [#allocation5 + $0x6] }
 0x531   :  { %s1883_s9 = vpop.sfrf %1882 }
 0x532   :  { %p2203_p2 = scmp.ne.s32.totalorder %s1883_s9, 0 }
 0x534   :  { %1887 = shalt.err (%p2203_p2)  }
 0x535   :  { %1889 = vsyncmov [#allocation5 + $0x7] }
 0x538   :  { %s1890_s26 = vpop.sfrf %1889 }
 0x539   :  { %p2204_p3 = scmp.ne.s32.totalorder %s1890_s26, 0 }
 0x53b   :  { %1894 = shalt.err (%p2204_p3)  }

</bundles_post_ra>
